<compile_context>
chip_gen: v5e
topology: v5e:2x2
jax: 0.10.0
libtpu: 0.0.40
codegen_flags: <defaults>
</compile_context>

<pallas_src>
import functools

import jax
import jax.numpy as jnp
from jax import lax
from jax.experimental import pallas as pl
from jax.experimental.pallas import tpu as pltpu

# ----------------------------------------------------------------------------
# Phoneme / viseme tables (host-side, strings — no Pallas equivalent)
# ----------------------------------------------------------------------------
phoneme_dict = {'SIL': ['SIL'], 'AA0': ['ㅏ'], 'AA1': ['ㅏ'], 'AA2': ['ㅏ'], 'AE0': ['ㅔ'],
                'AE1': ['ㅔ'], 'AE2': ['ㅔ'], 'AH0': ['ㅓ'], 'AH1': ['ㅓ'], 'AH2': ['ㅓ'],
                'AO0': ['ㅗ'], 'AO1': ['ㅗ'], 'AO2': ['ㅗ'], 'AW0': ['ㅏ', 'ㅜ'], 'AW1': ['ㅏ', 'ㅜ'],
                'AW2': ['ㅏ', 'ㅜ'], 'AY0': ['ㅏ', 'ㅣ'], 'AY1': ['ㅏ', 'ㅣ'], 'AY2': ['ㅏ', 'ㅣ'],
                'EH0': ['ㅓ'], 'EH1': ['ㅓ'], 'EH2': ['ㅓ'], 'ER0': ['ㅓ'], 'ER1': ['ㅓ'],
                'ER2': ['ㅓ'], 'EY0': ['ㅔ'], 'EY1': ['ㅔ'], 'EY2': ['ㅔ'], 'IH0': ['ㅣ'],
                'IH1': ['ㅣ'], 'IH2': ['ㅣ'], 'IY0': ['ㅣ'], 'IY1': ['ㅣ'], 'IY2': ['ㅣ'],
                'OW0': ['ㅗ', 'ㅜ'], 'OW1': ['ㅗ', 'ㅜ'], 'OW2': ['ㅗ', 'ㅜ'], 'OY0': ['ㅗ', 'ㅣ'],
                'OY1': ['ㅗ', 'ㅣ'], 'OY2': ['ㅗ', 'ㅣ'], 'UH0': ['ㅜ'], 'UH1': ['ㅜ'], 'UH2': ['ㅜ'],
                'UW0': ['ㅜ'], 'UW1': ['ㅜ'], 'UW2': ['ㅜ'], 'W': ['ㅜ', 'ㅣ'], 'Y': ['ㅜ'],
                'B': ['ㅂ'], 'F': ['ㅍ'], 'M': ['ㅁ'], 'N': ['ㄴ'], 'P': ['ㅍ'], 'V': ['ㅂ'],
                'D': ['ㄷ'], 'DH': ['ㄸ'], 'L': ['ㄹ'], 'R': ['ㄹ'], 'S': ['ㅅ'], 'SH': ['ㅅ'],
                'T': ['ㅌ'], 'TH': ['ㄸ'], 'CH': ['ㅊ'], 'JH': ['ㅈ'], 'Z': ['ㅈ'], 'ZH': ['ㅈ'],
                'G': ['ㄱ'], 'K': ['ㅋ'], 'HH': ['ㅎ']}

phoneme_viseme_dict = {'B': ['음'], 'F': ['음'], 'M': ['음'], 'P': ['음'], 'V': ['음']}

phoneme_vowel_viseme_dict = {k: v for k, v in phoneme_dict.items()
                             if k not in ('B', 'F', 'M', 'N', 'P', 'V', 'D', 'DH', 'L', 'R',
                                          'S', 'SH', 'T', 'TH', 'CH', 'JH', 'Z', 'ZH',
                                          'G', 'K', 'HH')}

PHONEME_LIST = list(phoneme_dict.keys())   # deterministic stand-in for librispeech_phoneme.txt
NUM_PHONEMES = len(PHONEME_LIST)           # 71
CHUNK = 160                                # 0.01 s at 16 kHz
P_PAD = 128                                # phoneme axis padded to a full lane width
TILE_F_MAX = 1024                          # frames per grid step (v7x-VMEM-safe, >=128)


# ----------------------------------------------------------------------------
# Pallas kernel: fused (frames @ W) -> argmax  +  per-frame mean(|x|)
# ----------------------------------------------------------------------------
def _viseme_kernel(frames_ref, w_ref, idx_ref, accent_ref, *, num_phonemes):
    frames = frames_ref[...]                       # (TILE_F, C) float32
    w = w_ref[...]                                 # (C, P_PAD) float32 (zero-padded cols)

    # Synthetic PPG phoneme logits on the MXU.
    # TODO(synk): optional bf16 cast of frames/W here would halve HBM read
    # traffic on v6e; kept f32 so argmax matches the f32 reference bit-exactly.
    logits = jnp.dot(frames, w, preferred_element_type=jnp.float32)   # (TILE_F, P_PAD)

    # Transpose (XLU) so the frame axis lands on lanes -> lane-dense outputs.
    logits_t = logits.T                                               # (P_PAD, TILE_F)

    # Phoneme row index; padded rows (>= num_phonemes) can never win the argmax.
    prow = lax.broadcasted_iota(jnp.int32, logits_t.shape, 0)         # (P_PAD, TILE_F)
    masked = jnp.where(prow < num_phonemes, logits_t, -jnp.inf)

    # argmax over the phoneme axis, first-occurrence tie-break (np.argmax).
    mx = jnp.max(masked, axis=0, keepdims=True)                       # (1, TILE_F)
    is_max = masked == mx
    idx = jnp.min(jnp.where(is_max, prow, num_phonemes), axis=0,
                  keepdims=True)                                      # (1, TILE_F)
    idx_ref[...] = idx.astype(jnp.int32)

    # get_accent: mean of |audio| over each 160-sample chunk (= frame), f32.
    absf_t = jnp.abs(frames).T                                        # (C, TILE_F)
    accent_ref[...] = jnp.sum(absf_t, axis=0, keepdims=True) * (1.0 / frames.shape[1])


@functools.partial(jax.jit, static_argnames=("tile_f", "num_phonemes"))
def viseme_numeric_forward(frames_padded, w_padded, *, tile_f, num_phonemes):
    """frames_padded: (F_pad, C) f32 with F_pad % tile_f == 0.
    w_padded: (C, P_PAD) f32. Returns idx (F_pad,) i32 and accent (F_pad,) f32."""
    f_pad, chunk = frames_padded.shape
    _, p_pad = w_padded.shape
    num_tiles = f_pad // tile_f

    kernel = functools.partial(_viseme_kernel, num_phonemes=num_phonemes)

    grid_spec = pltpu.PrefetchScalarGridSpec(
        num_scalar_prefetch=0,
        grid=(num_tiles,),
        in_specs=[
            # Frame tiles stream through VMEM (double-buffered by Pallas).
            pl.BlockSpec((tile_f, chunk), lambda i: (i, 0)),
            # W stays resident across the whole grid.
            pl.BlockSpec((chunk, p_pad), lambda i: (0, 0)),
        ],
        out_specs=[
            # Lane-dense outputs: frames on the lane axis -> unmasked full vst.
            pl.BlockSpec((1, tile_f), lambda i: (0, i)),
            pl.BlockSpec((1, tile_f), lambda i: (0, i)),
        ],
    )
    out_shape = (
        jax.ShapeDtypeStruct((1, f_pad), jnp.int32),     # argmax phoneme idx
        jax.ShapeDtypeStruct((1, f_pad), jnp.float32),   # accent (mean |x|)
    )
    cost = pl.CostEstimate(
        flops=2 * f_pad * chunk * p_pad,
        transcendentals=0,
        bytes_accessed=(f_pad * chunk * 4) + (chunk * p_pad * 4) + (2 * f_pad * 4),
    )
    idx2d, acc2d = pl.pallas_call(
        kernel,
        out_shape=out_shape,
        grid_spec=grid_spec,
        compiler_params=pltpu.CompilerParams(
            dimension_semantics=("parallel",)),   # independent tiles -> both TCs on v7x
        cost_estimate=cost,
    )(frames_padded, w_padded)
    return idx2d[0], acc2d[0]


# ----------------------------------------------------------------------------
# Host-side glue mirroring VisemeModel.forward's string processing
# ----------------------------------------------------------------------------
def phonme_dedup(phoneme, accent, phoneme_len):
    phoneme_list = [phoneme[0]]
    timming_list = [0.0]
    accent_list = [accent[0]]
    for i in range(1, len(phoneme)):
        if phoneme[i] == phoneme_list[-1]:
            timming_list[-1] += phoneme_len
            accent_list[-1] = (accent_list[-1] + accent[i]) / 2
        else:
            phoneme_list.append(phoneme[i])
            timming_list.append(phoneme_len)
            accent_list.append(accent[i])
    return phoneme_list, accent_list, timming_list


def phonme_to_viseme(phoneme, accent, timming):
    viseme_list, timming_list, accent_list = [], [], []
    for i in range(len(phoneme)):
        accent_list.append(accent[i])
        timming_list.append(timming[i])
        if phoneme[i] in phoneme_vowel_viseme_dict:
            viseme_list.extend(phoneme_vowel_viseme_dict[phoneme[i]])
            if len(phoneme_vowel_viseme_dict[phoneme[i]]) > 1:
                timming_list[-1] = timming_list[-1] / 2
                timming_list.append(timming[i] / 2)
                accent_list.append(accent[i])
        elif phoneme[i] in phoneme_viseme_dict:
            viseme_list.extend(phoneme_viseme_dict[phoneme[i]])
        else:
            viseme_list.append(phoneme[i])
    return viseme_list, accent_list, timming_list


def _round_up(x, m):
    return ((x + m - 1) // m) * m


def viseme_model_forward(audio, w, SR=16000):
    """Mirror of VisemeModel.forward. `audio` is a 1-D float32 jnp array whose
    length is a multiple of CHUNK."""
    # TODO(synk): original get_accent handles a ragged final chunk (<160
    # samples); here the audio is truncated to whole 160-sample frames.
    n = audio.shape[0]
    num_frames = n // CHUNK
    wav_length = n / SR

    frames = audio[: num_frames * CHUNK].reshape(num_frames, CHUNK)

    # Pad phoneme axis to a full 128-lane tile (zero columns, masked in-kernel).
    w_padded = jnp.pad(w, ((0, 0), (0, P_PAD - w.shape[1])))

    # Pick a frame tile: multiple of 128 (lane-dense outputs), capped for VMEM.
    tile_f = min(TILE_F_MAX, _round_up(num_frames, 128))
    f_pad = _round_up(num_frames, tile_f)
    frames_padded = jnp.pad(frames, ((0, f_pad - num_frames), (0, 0)))

    idx, accent = viseme_numeric_forward(
        frames_padded, w_padded, tile_f=tile_f, num_phonemes=NUM_PHONEMES)
    idx, accent = jax.block_until_ready((idx, accent))
    idx = idx[:num_frames]          # drop zero-padded rows before host processing
    accent = accent[:num_frames]

    # Host-side string processing (no Pallas equivalent).
    # TODO(synk): PPGPhonemeModel.from_static() checkpoint replaced with a
    # deterministic synthetic linear projection inside the kernel.
    # NOTE: the original's one-hot "active_phoneme" matrix was only an
    # intermediate for argmax; it is no longer materialized (kernel returns
    # the argmax index directly).
    idx_host = idx.tolist()
    accent_host = accent.tolist()
    active_phoneme_list = [PHONEME_LIST[i] for i in idx_host]

    phoneme_len = wav_length / len(active_phoneme_list)
    phoneme_list, accent_list, timming_list = phonme_dedup(
        active_phoneme_list, accent_host, phoneme_len)
    viseme_list, accent_list, timming_list = phonme_to_viseme(
        phoneme_list, accent_list, timming_list)

    return active_phoneme_list, viseme_list, accent_list, timming_list, idx, accent


# ----------------------------------------------------------------------------
if __name__ == "__main__":
    key = jax.random.PRNGKey(0)
    k_audio, k_w = jax.random.split(key)

    # 2000 frames = 20 s of 16 kHz audio (~1.3 MB): exercises a 2-step grid
    # (tile_f=1024) including a zero-padded ragged last tile.
    NUM_FRAMES = 2000
    audio = jax.random.normal(k_audio, (NUM_FRAMES * CHUNK,), dtype=jnp.float32)
    # Deterministic synthetic PPG projection weight (C, P).
    w = jax.random.normal(k_w, (CHUNK, NUM_PHONEMES), dtype=jnp.float32) * 0.05

    (active_phoneme_list, viseme_list, accent_list, timming_list,
     idx, accent) = viseme_model_forward(audio, w, SR=16000)

    # Pure-JAX reference check of the kernel's numeric outputs.
    frames = audio.reshape(NUM_FRAMES, CHUNK)
    logits_ref = frames @ w
    idx_ref = jnp.argmax(logits_ref, axis=-1).astype(jnp.int32)
    accent_ref = jnp.mean(jnp.abs(frames), axis=-1)

    assert idx.shape == (NUM_FRAMES,) and accent.shape == (NUM_FRAMES,)
    assert jnp.array_equal(idx, idx_ref), "argmax mismatch"
    assert jnp.allclose(accent, accent_ref, rtol=1e-5, atol=1e-6), "accent mismatch"
    assert len(active_phoneme_list) == NUM_FRAMES
    assert len(viseme_list) >= 1 and len(accent_list) == len(timming_list)

    print("KERNEL_OK")
</pallas_src>

<mosaic_0001>
module attributes {stable_mosaic.version = 11 : i64} {
  func.func @_viseme_kernel(%arg0: i32, %arg1: memref<1024x160xf32, #tpu.memory_space<vmem>>, %arg2: memref<160x128xf32, #tpu.memory_space<vmem>>, %arg3: memref<1x1024xi32, #tpu.memory_space<vmem>>, %arg4: memref<1x1024xf32, #tpu.memory_space<vmem>>) attributes {dimension_semantics = [#tpu.dimension_semantics<parallel>], iteration_bounds = array<i64: 2>, scalar_prefetch = 0 : i64, scratch_operands = 0 : i64, tpu.core_type = #tpu.core_type<tc>, window_params = [{transform_indices = @transform_0, window_bounds = array<i64: 1024, 160>}, {pipeline_mode = #tpu.pipeline_mode<synchronous>, transform_indices = @transform_1, window_bounds = array<i64: 160, 128>}, {transform_indices = @transform_2, window_bounds = array<i64: 1, 1024>}, {transform_indices = @transform_3, window_bounds = array<i64: 1, 1024>}]} {
    %c0 = arith.constant 0 : index
    %c0_0 = arith.constant 0 : index
    %0 = vector.load %arg1[%c0, %c0_0] : memref<1024x160xf32, #tpu.memory_space<vmem>>, vector<1024x160xf32>
    %c0_1 = arith.constant 0 : index
    %c0_2 = arith.constant 0 : index
    %1 = vector.load %arg2[%c0_1, %c0_2] : memref<160x128xf32, #tpu.memory_space<vmem>>, vector<160x128xf32>
    %cst = arith.constant dense<0.000000e+00> : vector<1024x128xf32>
    %2 = tpu.matmul %0, %1, %cst {dimension_numbers = #tpu.dot_dimension_numbers<[1], [0], [0], [1], [0, 0, 1, 1], [], []>} : vector<1024x160xf32>, vector<160x128xf32>, vector<1024x128xf32> -> vector<1024x128xf32>
    %3 = tpu.transpose %2, [1, 0] : vector<1024x128xf32> -> vector<128x1024xf32>
    %4 = tpu.iota {dimensions = array<i32: 0>} : vector<128x1024xi32>
    %c69_i32 = arith.constant 69 : i32
    %5 = vector.broadcast %c69_i32 : i32 to vector<128x1024xi32>
    %6 = arith.cmpi slt, %4, %5 : vector<128x1024xi32>
    %cst_3 = arith.constant 0xFF800000 : f32
    %7 = vector.broadcast %cst_3 : f32 to vector<128x1024xf32>
    %8 = arith.select %6, %3, %7 : vector<128x1024xi1>, vector<128x1024xf32>
    %cst_4 = arith.constant dense<0xFF800000> : vector<1024xf32>
    %9 = vector.multi_reduction <maximumf>, %8, %cst_4 [0] : vector<128x1024xf32> to vector<1024xf32>
    %10 = vector.shape_cast %9 : vector<1024xf32> to vector<1x1024xf32>
    %11 = vector.broadcast %10 : vector<1x1024xf32> to vector<128x1024xf32>
    %12 = arith.cmpf oeq, %8, %11 : vector<128x1024xf32>
    %c69_i32_5 = arith.constant 69 : i32
    %13 = vector.broadcast %c69_i32_5 : i32 to vector<128x1024xi32>
    %14 = arith.select %12, %4, %13 : vector<128x1024xi1>, vector<128x1024xi32>
    %cst_6 = arith.constant dense<2147483647> : vector<1024xi32>
    %15 = vector.multi_reduction <minsi>, %14, %cst_6 [0] : vector<128x1024xi32> to vector<1024xi32>
    %16 = vector.shape_cast %15 : vector<1024xi32> to vector<1x1024xi32>
    %c0_7 = arith.constant 0 : index
    %c0_8 = arith.constant 0 : index
    %17 = vector.load %arg3[%c0_7, %c0_8] : memref<1x1024xi32, #tpu.memory_space<vmem>>, vector<1x1024xi32>
    tpu.vector_store %arg3[%c0_7, %c0_8], %16 {strides = array<i32>} : memref<1x1024xi32, #tpu.memory_space<vmem>>, vector<1x1024xi32>,
    %18 = math.absf %0 : vector<1024x160xf32>
    %19 = tpu.transpose %18, [1, 0] : vector<1024x160xf32> -> vector<160x1024xf32>
    %cst_9 = arith.constant dense<0.000000e+00> : vector<1024xf32>
    %20 = vector.multi_reduction <add>, %19, %cst_9 [0] : vector<160x1024xf32> to vector<1024xf32>
    %21 = vector.shape_cast %20 : vector<1024xf32> to vector<1x1024xf32>
    %cst_10 = arith.constant 6.250000e-03 : f32
    %22 = vector.broadcast %cst_10 : f32 to vector<1x1024xf32>
    %23 = arith.mulf %21, %22 : vector<1x1024xf32>
    %c0_11 = arith.constant 0 : index
    %c0_12 = arith.constant 0 : index
    %24 = vector.load %arg4[%c0_11, %c0_12] : memref<1x1024xf32, #tpu.memory_space<vmem>>, vector<1x1024xf32>
    tpu.vector_store %arg4[%c0_11, %c0_12], %23 {strides = array<i32>} : memref<1x1024xf32, #tpu.memory_space<vmem>>, vector<1x1024xf32>,
    return
  }
  func.func @transform_0(%arg0: i32) -> (i32, i32) {
    %c0_i32 = arith.constant 0 : i32
    %c0_i32_0 = arith.constant 0 : i32
    return %arg0, %c0_i32 : i32, i32
  }
  func.func @transform_1(%arg0: i32) -> (i32, i32) {
    %c0_i32 = arith.constant 0 : i32
    %c0_i32_0 = arith.constant 0 : i32
    %c0_i32_1 = arith.constant 0 : i32
    return %c0_i32, %c0_i32_0 : i32, i32
  }
  func.func @transform_2(%arg0: i32) -> (i32, i32) {
    %c0_i32 = arith.constant 0 : i32
    %c0_i32_0 = arith.constant 0 : i32
    return %c0_i32, %arg0 : i32, i32
  }
  func.func @transform_3(%arg0: i32) -> (i32, i32) {
    %c0_i32 = arith.constant 0 : i32
    %c0_i32_0 = arith.constant 0 : i32
    return %c0_i32, %arg0 : i32, i32
  }
}

</mosaic_0001>

<bundles_post_ra>
// kernel: viseme_numeric_forward.1
= control target key start
LH: loop header
LB: loop body
LE: loop exit
PB: predicated region body
PF: predicated region fallthrough
CT: control target
= control target key end

     0   :  { %9 = vsyncpa [#allocation3], 0  ;;  %s6553_s0 = inlined_call_operand.vmem [shape: f32[2048,160], index: 0, kind: input, shape index: {}]   ;;  %s6554_s1 = inlined_call_operand.vmem [shape: f32[160,128], index: 1, kind: input, shape index: {}]   ;;  %s6555_s2 = inlined_call_operand.hbm [shape: s32[1,2048], index: 2, kind: output, shape index: {0}]   ;;  %s6556_s3 = inlined_call_operand.hbm [shape: f32[1,2048], index: 3, kind: output, shape index: {1}]  }
   0x1   :  { %11 = vsyncpa [#allocation3 + $0x1], 0 }
   0x2   :  { %12 = vsyncpa [#allocation5], 0 }
   0x3   :  { %14 = vsyncpa [#allocation5 + $0x1], 0  ;;  %s4491_s12 = smov 0   ;;  %s4493_s13 = smov 0  }
   0x4   :  { %s4495_s14 = smov 0   ;;  %s4497_s15 = smov 0  }
   0x5 LB: > { %s4512_s16 = sadd.s32 4294967295, %s4469_s15   ;;  %s3952_s17 = sadd.s32 4294967294, %s4469_s15   ;;  %s4469_s15 = sphi %s4497_s15, %s6637_s15   ;;  %s4465_s14 = sphi %s4495_s14, %s6636_s14   ;;  %s4461_s13 = sphi %s4493_s13, %s6635_s13   ;;  %s4457_s12 = sphi %s4491_s12, %s6634_s12  }
   0x6   : > { %s4516_s18 = sadd.s32 1, %s4469_s15   ;;  %s74_s19 = sadd.s32 1, %s4465_s14 }
   0x7   : > { %s71_s20 = ssub.s32 %s4469_s15, %s4516_s18  ;;  %p84_p0 = scmp.ne.s32.totalorder %s4465_s14, %s4461_s13 }
   0x8   : > { %p72_p1 = scmp.eq.s32.totalorder %s71_s20, 0  ;;  %p85_p2 = scmp.eq.s32.totalorder %s4512_s16, 1 }
   0x9   : > { %p90_p3 = scmp.ne.s32.totalorder %s4461_s13, %s4457_s12  ;;  %p91_p4 = scmp.eq.s32.totalorder %s3952_s17, 1 }
   0xa   : > { %s4527_s21 = scalar_select %p72_p1, %s4465_s14, %s74_s19  }
   0xb   : > { %p4529_p5 = por %p85_p2, %p84_p0  ;;  %p4533_p6 = por %p91_p4, %p90_p3 }
   0xc   : > { %p3955_p7 = scmp.ge.s32.totalorder %s4469_s15, 1  ;;  %p148_p8 = scmp.lt.s32.totalorder %s4469_s15, 3 }
   0xe   : > { %p149_p9 = pnand %p3955_p7, %p148_p8 }
  0x10   : > { %152 = sbr.rel (%p149_p9) target bundleno = 1280 (0x500), region = 28 }
  0x15   : > { %v458_v0 = vld [vmem:[%s6554_s1 + $0x78] sm:$0xff]  ;;  %v457_v2 = vld [vmem:[%s6554_s1 + $0x70] sm:$0xff]  ;;  %s3958_s30 = sshll.u32 %s4512_s16, 7  ;;  %v456_v4 = vld [vmem:[%s6554_s1 + $0x68] sm:$0xff]  ;;  %vm463_vm0 = vcmask 261120   ;;  %s6436_s7 = sand.u32 1, %s4461_s13  }
  0x16   : > { %v4545_v1 = vld [vmem:[%s6554_s1 + $0x98] sm:$0xff]  ;;  %4152 = vmatpush.msra.mxu2 %v458_v0  ;;  %4153 = vmatpush.msra.mxu3 %v458_v0  ;;  %v4554_v3 = vld [vmem:[%s6554_s1 + $0x90] sm:$0xff]  ;;  %p179_p10 = scmp.lt.s32.totalorder %s3958_s30, 255  ;;  %v4563_v5 = vld [vmem:[%s6554_s1 + $0x88] sm:$0xff]  ;;  %s3956_s8 = sshll.u32 %s6436_s7, 3 }
  0x17   : > { %1261 = vmatpush.msra.mxu1 %v4545_v1  ;;  %848 = vmatpush.msra.mxu0 %v458_v0  ;;  %v455_v6 = vld [vmem:[%s6554_s1 + $0x60] sm:$0xff]  ;;  %v454_v8 = vld [vmem:[%s6554_s1 + $0x58] sm:$0xff]  ;;  %v453_v10 = vld [vmem:[%s6554_s1 + $0x50] sm:$0xff]  ;;  %s6449_s9 = scalar_lea.vmem [#allocation2], %s3956_s8  ;;  %s4147_s10 = sshll.u32 %s4512_s16, 3 }
  0x18   : > { %4154 = vmatpush.msra.mxu2 %v457_v2  ;;  %4155 = vmatpush.msra.mxu3 %v457_v2  ;;  %s6639_s30 = smov (!%p179_p10, %s3958_s30), 255  ;;  %v4572_v7 = vld [vmem:[%s6554_s1 + $0x80] sm:$0xff]  ;;  %v452_v11 = vld [vmem:[%s6554_s1 + $0x48] sm:$0xff]  ;;  %v450_v18 = vld [vmem:[%s6554_s1 + $0x38] sm:$0xff]  ;;  %s3841_s19 = scalar_lea.hbm %s6555_s2, %s4147_s10 }
  0x19   : > { %1262 = vmatpush.msra.mxu1 %v4554_v3  ;;  %849 = vmatpush.msra.mxu0 %v457_v2  ;;  %s4151_s20 = sshll.u32 %s6639_s30, 4  ;;  %v451_v15 = vld [vmem:[%s6554_s1 + $0x40] sm:$0xff]  ;;  %v449_v20 = vld [vmem:[%s6554_s1 + $0x30] sm:$0xff]  ;;  %v448_v22 = vld [vmem:[%s6554_s1 + $0x28] sm:$0xff]  ;;  %s3845_s24 = sshll.u32 %s3841_s19, 4  ;;  %s3846_s24 = int_to_ptr.hbm [resolvable:$true] %s3845_s24 }
  0x1a   : > { %4156 = vmatpush.msra.mxu2 %v456_v4  ;;  %4157 = vmatpush.msra.mxu3 %v456_v4  ;;  %s4578_s26 = scalar_lea.vmem %s6553_s0, %s4151_s20  ;;  %v447_v25 = vld [vmem:[%s6554_s1 + $0x20] sm:$0xff]  ;;  %v446_v28 = vld [vmem:[%s6554_s1 + $0x18] sm:$0xff]  ;;  %v445_v30 = vld [vmem:[%s6554_s1 + $0x10] sm:$0xff]  ;;  %s3843_s20 = sshll.u32 %s6449_s9, 4  ;;  %s3844_s20 = int_to_ptr.vmem [resolvable:$true] %s3843_s20 }
  0x1b   : > { %1263 = vmatpush.msra.mxu1 %v4563_v5  ;;  %850 = vmatpush.msra.mxu0 %v456_v4  ;;  %v188_v9 = vld [vmem:[%s4578_s26 + $0x8] sm:$0xff]  ;;  %v4593_v12 = vld [vmem:[%s4578_s26 + $0x100] sm:$0xff]  ;;  %v190_v17 = vld [vmem:[%s4578_s26 + $0x18] sm:$0xff]  ;;  %s3826_s25 = scalar_lea.sflag [#allocation3], %s6436_s7  ;;  %s4389_s27 = sshra.s32 %s3846_s24, 4  ;;  %s4390_s27 = int_to_ptr.hbm [resolvable:$true] %s4389_s27 }
  0x1c   : > { %4158 = vmatpush.msra.mxu2 %v455_v6  ;;  %4159 = vmatpush.msra.mxu3 %v455_v6  ;;  %v2857_v13 = vand.u32 2147483647, %v4593_v12  ;;  %v2826_v14 = vand.u32 2147483647, %v188_v9  ;;  %v4600_v16 = vld [vmem:[%s4578_s26] sm:$0xff]  ;;  %v4612_v21 = vld [vmem:[%s4578_s26 + $0x110] sm:$0xff]  ;;  %p4396_p0 = scmp.lt.s32.totalorder %s4390_s27, %s6555_s2 }
  0x1d   : > { %1264 = vmatpush.msra.mxu1 %v4572_v7  ;;  %851 = vmatpush.msra.mxu0 %v455_v6  ;;  %v2825_v19 = vand.u32 2147483647, %v4600_v16  ;;  %v2859_v23 = vand.u32 2147483647, %v4612_v21  ;;  %v2828_v24 = vand.u32 2147483647, %v190_v17 }
  0x1e   : > { %3961 = vmatmul.msk.f32.vlgmr.msra.gmra.mxu1 %vm463_vm0, %v188_v9  ;;  %4160 = vmatpush.msra.mxu2 %v454_v8  ;;  %v189_v26 = vld [vmem:[%s4578_s26 + $0x10] sm:$0xff]  ;;  %v192_v27 = vld [vmem:[%s4578_s26 + $0x28] sm:$0xff]  ;;  %v4631_v31 = vld [vmem:[%s4578_s26 + $0x120] sm:$0xff]  ;;  %s4391_s28 = scalar_lea.hbm %s4390_s27, 8  ;;  %s4395_s4 = scalar_lea.hbm %s6555_s2, 16 }
  0x1f   : > { %4161 = vmatpush.msra.mxu3 %v454_v8  ;;  %852 = vmatpush.msra.mxu0 %v454_v8  ;;  %v2827_v29 = vand.u32 2147483647, %v189_v26  ;;  %v444_v32 = vld [vmem:[%s6554_s1 + $0x8] sm:$0xff]  ;;  %v2861_v33 = vand.u32 2147483647, %v4631_v31  ;;  %v443_v35 = vld [vmem:[%s6554_s1] sm:$0xff]  ;;  %p4392_p11 = scmp.ne.s32.totalorder %s4390_s27, %s4391_s28  ;;  %p4397_p1 = scmp.lt.s32.totalorder %s4395_s4, %s4391_s28 }
  0x20   : > { %4162 = vmatpush.msra.mxu2 %v453_v10  ;;  %3145 = vxpose.xlu1.b32.start [1/16] %v2857_v13, 128  ;;  %v2830_v34 = vand.u32 2147483647, %v192_v27  ;;  %v191_v36 = vld [vmem:[%s4578_s26 + $0x20] sm:$0xff]  ;;  %v313_v37 = vld [vmem:[%s4578_s26 + $0x3f0] sm:$0xff]  ;;  %v194_v39 = vld [vmem:[%s4578_s26 + $0x38] sm:$0xff] }
  0x21   : > { %4163 = vmatpush.msra.mxu3 %v453_v10  ;;  %853 = vmatpush.msra.mxu0 %v453_v10  ;;  %v441_v38 = vld [vmem:[%s4578_s26 + $0x7f0] sm:$0xff]  ;;  %v2829_v40 = vand.u32 2147483647, %v191_v36  ;;  %v2832_v43 = vand.u32 2147483647, %v194_v39  ;;  %v315_v45 = vld [vmem:[%s4578_s26 + $0x400] sm:$0xff]  ;;  %p4393_p12 = pnand %p4392_p11, %p4529_p5  ;;  %p4398_p2 = por %p4397_p1, %p4396_p0 }
  0x22   : > { %4164 = vmatpush.msra.mxu2 %v452_v11  ;;  %3113 = vxpose.xlu0.b32.start [1/16] (narrow) %v2826_v14, 32  ;;  %v4646_v41 = vld [vmem:[%s4578_s26 + $0x130] sm:$0xff]  ;;  %v196_v46 = vld [vmem:[%s4578_s26 + $0x48] sm:$0xff]  ;;  %v4661_v49 = vld [vmem:[%s4578_s26 + $0x140] sm:$0xff] }
  0x23   : > { %4165 = vmatpush.msra.mxu3 %v452_v11  ;;  %854 = vmatpush.msra.mxu0 %v452_v11  ;;  %v2863_v42 = vand.u32 2147483647, %v4646_v41  ;;  %v193_v44 = vld [vmem:[%s4578_s26 + $0x30] sm:$0xff]  ;;  %v320_v47 = vld [vmem:[%s4578_s26 + $0x428] sm:$0xff]  ;;  %v2865_v50 = vand.u32 2147483647, %v4661_v49  ;;  %p4394_p13 = pneg %p4393_p12 }
  0x24   : > { %4166 = vmatpush.msra.mxu2 %v451_v15  ;;  %3081 = vxpose.xlu2.b32.start [1/16] %v2825_v19, 128  ;;  %v2831_v48 = vand.u32 2147483647, %v193_v44  ;;  %v2834_v51 = vand.u32 2147483647, %v196_v46  ;;  %v195_v52 = vld [vmem:[%s4578_s26 + $0x40] sm:$0xff]  ;;  %v317_v53 = vld [vmem:[%s4578_s26 + $0x410] sm:$0xff] }
  0x25   : > { %4167 = vmatpush.msra.mxu3 %v451_v15  ;;  %855 = vmatpush.msra.mxu0 %v451_v15  ;;  %v198_v54 = vld [vmem:[%s4578_s26 + $0x58] sm:$0xff]  ;;  %v2833_v56 = vand.u32 2147483647, %v195_v52  ;;  %v4671_v57 = vld [vmem:[%s4578_s26 + $0x150] sm:$0xff]  ;;  %v319_v61 = vld [vmem:[%s4578_s26 + $0x420] sm:$0xff]  ;;  %p4399_p3 = pnand %p4398_p2, %p4394_p13 }
  0x26   : > { %3962 = vmatmul.msk.f32.gmra.mxu1 %vm463_vm0, %v190_v17  ;;  %4168 = vmatpush.msra.mxu2 %v450_v18  ;;  %v322_v55 = vld [vmem:[%s4578_s26 + $0x438] sm:$0xff]  ;;  %v2867_v58 = vand.u32 2147483647, %v4671_v57  ;;  %v2836_v59 = vand.u32 2147483647, %v198_v54  ;;  %v197_v60 = vld [vmem:[%s4578_s26 + $0x50] sm:$0xff] }
  0x27   : > { %4169 = vmatpush.msra.mxu3 %v450_v18  ;;  %856 = vmatpush.msra.mxu0 %v450_v18  ;;  %v200_v62 = vld [vmem:[%s4578_s26 + $0x68] sm:$0xff]  ;;  %v2835_v0 = vand.u32 2147483647, %v197_v60  ;;  %v199_v4 = vld [vmem:[%s4578_s26 + $0x60] sm:$0xff]  ;;  %v202_v6 = vld [vmem:[%s4578_s26 + $0x78] sm:$0xff] }
  0x28   : > { %4170 = vmatpush.msra.mxu2 %v449_v20  ;;  %3146 = vxpose.xlu1.b32.cont [2/16] %v2859_v23, 128  ;;  %v324_v63 = vld [vmem:[%s4578_s26 + $0x448] sm:$0xff]  ;;  %v2837_v8 = vand.u32 2147483647, %v199_v4  ;;  %v4691_v9 = vld [vmem:[%s4578_s26 + $0x170] sm:$0xff]  ;;  %v2840_v11 = vand.u32 2147483647, %v202_v6 }
  0x29   : > { %4171 = vmatpush.msra.mxu3 %v449_v20  ;;  %857 = vmatpush.msra.mxu0 %v449_v20  ;;  %v2871_v10 = vand.u32 2147483647, %v4691_v9  ;;  %v201_v13 = vld [vmem:[%s4578_s26 + $0x70] sm:$0xff]  ;;  %v323_v14 = vld [vmem:[%s4578_s26 + $0x440] sm:$0xff]  ;;  %v204_v15 = vld [vmem:[%s4578_s26 + $0x88] sm:$0xff] }
  0x2a   : > { %4172 = vmatpush.msra.mxu2 %v448_v22  ;;  %3114 = vxpose.xlu0.b32.cont [2/16] (narrow) %v2828_v24, 32  ;;  %v2839_v17 = vand.u32 2147483647, %v201_v13  ;;  %v4701_v18 = vld [vmem:[%s4578_s26 + $0x180] sm:$0xff]  ;;  %v2842_v20 = vand.u32 2147483647, %v204_v15 }
  0x2b   : > { %4173 = vmatpush.msra.mxu3 %v448_v22  ;;  %858 = vmatpush.msra.mxu0 %v448_v22  ;;  %v2873_v19 = vand.u32 2147483647, %v4701_v18  ;;  %v203_v22 = vld [vmem:[%s4578_s26 + $0x80] sm:$0xff]  ;;  %v325_v23 = vld [vmem:[%s4578_s26 + $0x450] sm:$0xff]  ;;  %v206_v24 = vld [vmem:[%s4578_s26 + $0x98] sm:$0xff] }
  0x2c   : > { %4174 = vmatpush.msra.mxu2 %v447_v25  ;;  %3082 = vxpose.xlu2.b32.cont [2/16] %v2827_v29, 128  ;;  %v2844_v29 = vand.u32 2147483647, %v206_v24 }
  0x2d   : > { %4175 = vmatpush.msra.mxu3 %v447_v25  ;;  %859 = vmatpush.msra.mxu0 %v447_v25  ;;  %v330_v25 = vld [vmem:[%s4578_s26 + $0x478] sm:$0xff] }
  0x2e   : > { %3963 = vmatmul.msk.f32.gmra.mxu1 %vm463_vm0, %v192_v27  ;;  %4176 = vmatpush.msra.mxu2 %v446_v28  ;;  %v4711_v27 = vld [vmem:[%s4578_s26 + $0x190] sm:$0xff] }
  0x2f   : > { %4177 = vmatpush.msra.mxu3 %v446_v28  ;;  %860 = vmatpush.msra.mxu0 %v446_v28  ;;  %v2875_v28 = vand.u32 2147483647, %v4711_v27 }
  0x30   : > { %4178 = vmatpush.msra.mxu2 %v445_v30  ;;  %3147 = vxpose.xlu1.b32.cont [3/16] %v2861_v33, 128  ;;  %v208_v33 = vld [vmem:[%s4578_s26 + $0xa8] sm:$0xff] }
  0x31   : > { %4179 = vmatpush.msra.mxu3 %v445_v30  ;;  %861 = vmatpush.msra.mxu0 %v445_v30  ;;  %v205_v30 = vld [vmem:[%s4578_s26 + $0x90] sm:$0xff] }
  0x32   : > { %4180 = vmatpush.msra.mxu2 %v444_v32  ;;  %3115 = vxpose.xlu0.b32.cont [3/16] (narrow) %v2830_v34, 32  ;;  %v332_v34 = vld [vmem:[%s4578_s26 + $0x488] sm:$0xff] }
  0x33   : > { %4181 = vmatpush.msra.mxu3 %v444_v32  ;;  %862 = vmatpush.msra.mxu0 %v444_v32  ;;  %v327_v32 = vld [vmem:[%s4578_s26 + $0x460] sm:$0xff] }
  0x34   : > { %4182 = vmatpush.msra.mxu2 %v443_v35  ;;  %3083 = vxpose.xlu2.b32.cont [3/16] %v2829_v40, 128  ;;  %v329_v40 = vld [vmem:[%s4578_s26 + $0x470] sm:$0xff] }
  0x35   : > { %4183 = vmatpush.msra.mxu3 %v443_v35  ;;  %1053 = vmatmul.f32.vlgmr.msra.gmra.mxu2 %v313_v37 }
  0x36   : > { %1245 = vmatmul.f32.vlgmr.msra.gmra.mxu3 %v441_v38  ;;  %3964 = vmatmul.msk.f32.gmra.mxu1 %vm463_vm0, %v194_v39  ;;  %v2846_v38 = vand.u32 2147483647, %v208_v33  ;;  %v207_v39 = vld [vmem:[%s4578_s26 + $0xa0] sm:$0xff] }
  0x37   : > { %4184 = vmatpush.msrb.mxu3 %v4545_v1  ;;  %863 = vmatpush.msra.mxu0 %v443_v35  ;;  %v4681_v1 = vld [vmem:[%s4578_s26 + $0x160] sm:$0xff]  ;;  %v2843_v35 = vand.u32 2147483647, %v205_v30 }
  0x38   : > { %864 = vmatmul.f32.vlgmr.msra.gmra.mxu0 %v4600_v16  ;;  %3148 = vxpose.xlu1.b32.cont [4/16] %v2863_v42, 128  ;;  %v2869_v2 = vand.u32 2147483647, %v4681_v1  ;;  %v328_v16 = vld [vmem:[%s4578_s26 + $0x468] sm:$0xff]  ;;  %v210_v42 = vld [vmem:[%s4578_s26 + $0xb8] sm:$0xff] }
  0x39   : > { %4185 = vmatpush.msrb.mxu3 %v4554_v3  ;;  %v2838_v3 = vand.u32 2147483647, %v200_v62 }
  0x3a   : > { %3116 = vxpose.xlu0.b32.cont [4/16] (narrow) %v2832_v43, 32  ;;  %v334_v43 = vld [vmem:[%s4578_s26 + $0x498] sm:$0xff] }
  0x3b   : > { %4186 = vmatpush.msrb.mxu3 %v4563_v5  ;;  %v321_v5 = vld [vmem:[%s4578_s26 + $0x430] sm:$0xff] }
  0x3c   : > { %3084 = vxpose.xlu2.b32.cont [4/16] %v2831_v48, 128 }
  0x3d   : > { %4187 = vmatpush.msrb.mxu3 %v4572_v7  ;;  %1056 = vmatmul.f32.gmra.mxu2 %v315_v45  ;;  %v326_v7 = vld [vmem:[%s4578_s26 + $0x458] sm:$0xff]  ;;  %v4731_v45 = vld [vmem:[%s4578_s26 + $0x1b0] sm:$0xff] }
  0x3e   : > { %3965 = vmatmul.msk.f32.gmra.mxu1 %vm463_vm0, %v196_v46  ;;  %4027 = vmatmul.msk.f32.vlgmr.msrb.gmra.mxu3 %vm463_vm0, %v320_v47  ;;  %v209_v46 = vld [vmem:[%s4578_s26 + $0xb0] sm:$0xff]  ;;  %v331_v47 = vld [vmem:[%s4578_s26 + $0x480] sm:$0xff]  ;;  %v2879_v48 = vand.u32 2147483647, %v4731_v45 }
  0x40   : > { %867 = vmatmul.f32.gmra.mxu0 %v189_v26  ;;  %3149 = vxpose.xlu1.b32.cont [5/16] %v2865_v50, 128  ;;  %v2841_v26 = vand.u32 2147483647, %v203_v22  ;;  %v2848_v50 = vand.u32 2147483647, %v210_v42 }
  0x42   : > { %3117 = vxpose.xlu0.b32.cont [5/16] (narrow) %v2834_v51, 32  ;;  %v212_v51 = vld [vmem:[%s4578_s26 + $0xc8] sm:$0xff] }
  0x44   : > { %3085 = vxpose.xlu2.b32.cont [5/16] %v2833_v56, 128  ;;  %v333_v56 = vld [vmem:[%s4578_s26 + $0x490] sm:$0xff] }
  0x45   : > { %1059 = vmatmul.f32.gmra.mxu2 %v317_v53  ;;  %v2847_v53 = vand.u32 2147483647, %v209_v46 }
  0x46   : > { %3966 = vmatmul.msk.f32.gmra.mxu1 %vm463_vm0, %v198_v54  ;;  %4028 = vmatmul.msk.f32.gmra.mxu3 %vm463_vm0, %v322_v55  ;;  %v4741_v54 = vld [vmem:[%s4578_s26 + $0x1c0] sm:$0xff] }
  0x47   : > { %v211_v55 = vld [vmem:[%s4578_s26 + $0xc0] sm:$0xff] }
  0x48   : > { %870 = vmatmul.f32.gmra.mxu0 %v191_v36  ;;  %3150 = vxpose.xlu1.b32.cont [6/16] %v2867_v58, 128  ;;  %v4721_v36 = vld [vmem:[%s4578_s26 + $0x1a0] sm:$0xff]  ;;  %v2881_v58 = vand.u32 2147483647, %v4741_v54 }
  0x49   : > { %v2877_v37 = vand.u32 2147483647, %v4721_v36 }
  0x4a   : > { %3118 = vxpose.xlu0.b32.cont [6/16] (narrow) %v2836_v59, 32  ;;  %v2850_v59 = vand.u32 2147483647, %v212_v51 }
  0x4c   : > { %3086 = vxpose.xlu2.b32.cont [6/16] %v2835_v0, 128  ;;  %v213_v0 = vld [vmem:[%s4578_s26 + $0xd0] sm:$0xff] }
  0x4d   : > { %1062 = vmatmul.f32.gmra.mxu2 %v319_v61  ;;  %v338_v61 = vld [vmem:[%s4578_s26 + $0x4b8] sm:$0xff] }
  0x4e   : > { %3967 = vmatmul.msk.f32.gmra.mxu1 %vm463_vm0, %v200_v62  ;;  %4029 = vmatmul.msk.f32.gmra.mxu3 %vm463_vm0, %v324_v63  ;;  %v2849_v62 = vand.u32 2147483647, %v211_v55  ;;  %v4751_v63 = vld [vmem:[%s4578_s26 + $0x1d0] sm:$0xff] }
  0x50   : > { %873 = vmatmul.f32.gmra.mxu0 %v193_v44  ;;  %3151 = vxpose.xlu1.b32.cont [7/16] %v2869_v2, 128  ;;  %v2845_v44 = vand.u32 2147483647, %v207_v39  ;;  %v335_v2 = vld [vmem:[%s4578_s26 + $0x4a0] sm:$0xff] }
  0x52   : > { %3119 = vxpose.xlu0.b32.cont [7/16] (narrow) %v2838_v3, 32  ;;  %v2883_v3 = vand.u32 2147483647, %v4751_v63 }
  0x54   : > { %3087 = vxpose.xlu2.b32.cont [7/16] %v2837_v8, 128  ;;  %v4761_v8 = vld [vmem:[%s4578_s26 + $0x1e0] sm:$0xff] }
  0x55   : > { %1065 = vmatmul.f32.gmra.mxu2 %v321_v5  ;;  %v216_v5 = vld [vmem:[%s4578_s26 + $0xe8] sm:$0xff] }
  0x56   : > { %3968 = vmatmul.msk.f32.gmra.mxu1 %vm463_vm0, %v202_v6  ;;  %4030 = vmatmul.msk.f32.gmra.mxu3 %vm463_vm0, %v326_v7  ;;  %v340_v6 = vld [vmem:[%s4578_s26 + $0x4c8] sm:$0xff]  ;;  %v2851_v7 = vand.u32 2147483647, %v213_v0 }
  0x58   : > { %876 = vmatmul.f32.gmra.mxu0 %v195_v52  ;;  %3152 = vxpose.xlu1.b32.cont [8/16] %v2871_v10, 128  ;;  %v336_v52 = vld [vmem:[%s4578_s26 + $0x4a8] sm:$0xff]  ;;  %v215_v10 = vld [vmem:[%s4578_s26 + $0xe0] sm:$0xff] }
  0x5a   : > { %3120 = vxpose.xlu0.b32.cont [8/16] (narrow) %v2840_v11, 32  ;;  %v337_v11 = vld [vmem:[%s4578_s26 + $0x4b0] sm:$0xff] }
  0x5c   : > { %3088 = vxpose.xlu2.b32.cont [8/16] %v2839_v17, 128  ;;  %v2853_v17 = vand.u32 2147483647, %v215_v10 }
  0x5d   : > { %1068 = vmatmul.f32.gmra.mxu2 %v323_v14  ;;  %v2854_v14 = vand.u32 2147483647, %v216_v5 }
  0x5e   : > { %3969 = vmatmul.msk.f32.gmra.mxu1 %vm463_vm0, %v204_v15  ;;  %4031 = vmatmul.msk.f32.gmra.mxu3 %vm463_vm0, %v328_v16  ;;  %v218_v15 = vld [vmem:[%s4578_s26 + $0xf8] sm:$0xff] }
  0x5f   : > { %v342_v16 = vld [vmem:[%s4578_s26 + $0x4d8] sm:$0xff] }
  0x60   : > { %879 = vmatmul.f32.gmra.mxu0 %v197_v60  ;;  %3153 = vxpose.xlu1.b32.cont [9/16] %v2873_v19, 128  ;;  %v214_v60 = vld [vmem:[%s4578_s26 + $0xd8] sm:$0xff]  ;;  %v4771_v19 = vld [vmem:[%s4578_s26 + $0x1f0] sm:$0xff] }
  0x62   : > { %3121 = vxpose.xlu0.b32.cont [9/16] (narrow) %v2842_v20, 32  ;;  %v217_v20 = vld [vmem:[%s4578_s26 + $0xf0] sm:$0xff] }
  0x64   : > { %3089 = vxpose.xlu2.b32.cont [9/16] %v2841_v26, 128  ;;  %v220_v26 = vld [vmem:[%s4578_s26 + $0x108] sm:$0xff] }
  0x65   : > { %1071 = vmatmul.f32.gmra.mxu2 %v325_v23  ;;  %v2887_v23 = vand.u32 2147483647, %v4771_v19 }
  0x66   : > { %3970 = vmatmul.msk.f32.gmra.mxu1 %vm463_vm0, %v206_v24  ;;  %4032 = vmatmul.msk.f32.gmra.mxu3 %vm463_vm0, %v330_v25  ;;  %v2856_v24 = vand.u32 2147483647, %v218_v15 }
  0x68   : > { %882 = vmatmul.f32.gmra.mxu0 %v199_v4  ;;  %3154 = vxpose.xlu1.b32.cont [10/16] %v2875_v28, 128  ;;  %v2852_v4 = vand.u32 2147483647, %v214_v60  ;;  %v344_v28 = vld [vmem:[%s4578_s26 + $0x4e8] sm:$0xff] }
  0x6a   : > { %3122 = vxpose.xlu0.b32.cont [10/16] (narrow) %v2844_v29, 32  ;;  %v2855_v29 = vand.u32 2147483647, %v217_v20 }
  0x6c   : > { %3090 = vxpose.xlu2.b32.cont [10/16] %v2843_v35, 128  ;;  %v222_v35 = vld [vmem:[%s4578_s26 + $0x118] sm:$0xff] }
  0x6d   : > { %1074 = vmatmul.f32.gmra.mxu2 %v327_v32  ;;  %v341_v32 = vld [vmem:[%s4578_s26 + $0x4d0] sm:$0xff] }
  0x6e   : > { %3971 = vmatmul.msk.f32.gmra.mxu1 %vm463_vm0, %v208_v33  ;;  %4033 = vmatmul.msk.f32.gmra.mxu3 %vm463_vm0, %v332_v34 }
  0x70   : > { %885 = vmatmul.f32.gmra.mxu0 %v201_v13  ;;  %3155 = vxpose.xlu1.b32.cont [11/16] %v2877_v37, 128  ;;  %v2885_v13 = vand.u32 2147483647, %v4761_v8  ;;  %v346_v37 = vld [vmem:[%s4578_s26 + $0x4f8] sm:$0xff] }
  0x72   : > { %3123 = vxpose.xlu0.b32.cont [11/16] (narrow) %v2846_v38, 32  ;;  %v2858_v38 = vand.u32 2147483647, %v220_v26 }
  0x74   : > { %3091 = vxpose.xlu2.b32.cont [11/16] %v2845_v44, 128  ;;  %v224_v44 = vld [vmem:[%s4578_s26 + $0x128] sm:$0xff] }
  0x75   : > { %1077 = vmatmul.f32.gmra.mxu2 %v329_v40  ;;  %v343_v40 = vld [vmem:[%s4578_s26 + $0x4e0] sm:$0xff] }
  0x76   : > { %3972 = vmatmul.msk.f32.gmra.mxu1 %vm463_vm0, %v210_v42  ;;  %4034 = vmatmul.msk.f32.gmra.mxu3 %vm463_vm0, %v334_v43 }
  0x78   : > { %888 = vmatmul.f32.gmra.mxu0 %v203_v22  ;;  %3156 = vxpose.xlu1.b32.cont [12/16] %v2879_v48, 128  ;;  %v339_v22 = vld [vmem:[%s4578_s26 + $0x4c0] sm:$0xff]  ;;  %v4799_v48 = vld [vmem:[%s4578_s26 + $0x228] sm:$0xff] }
  0x7a   : > { %3124 = vxpose.xlu0.b32.cont [12/16] (narrow) %v2848_v50, 32  ;;  %v345_v50 = vld [vmem:[%s4578_s26 + $0x4f0] sm:$0xff] }
  0x7c   : > { %3092 = vxpose.xlu2.b32.cont [12/16] %v2847_v53, 128  ;;  %v226_v53 = vld [vmem:[%s4578_s26 + $0x138] sm:$0xff] }
  0x7d   : > { %1080 = vmatmul.f32.gmra.mxu2 %v331_v47  ;;  %v2860_v47 = vand.u32 2147483647, %v222_v35 }
  0x7e   : > { %3973 = vmatmul.msk.f32.gmra.mxu1 %vm463_vm0, %v212_v51  ;;  %4035 = vmatmul.msk.f32.gmra.mxu3 %vm463_vm0, %v336_v52  ;;  %v2894_v51 = vand.u32 2147483647, %v4799_v48 }
  0x80   : > { %891 = vmatmul.f32.gmra.mxu0 %v205_v30  ;;  %3157 = vxpose.xlu1.b32.cont [13/16] %v2881_v58, 128  ;;  %v4781_v30 = vld [vmem:[%s4578_s26 + $0x208] sm:$0xff] }
  0x81   : > { %v2890_v33 = vand.u32 2147483647, %v4781_v30 }
  0x82   : > { %3125 = vxpose.xlu0.b32.cont [13/16] (narrow) %v2850_v59, 32 }
  0x84   : > { %3093 = vxpose.xlu2.b32.cont [13/16] %v2849_v62, 128  ;;  %v4815_v62 = vld [vmem:[%s4578_s26 + $0x238] sm:$0xff] }
  0x85   : > { %1083 = vmatmul.f32.gmra.mxu2 %v333_v56  ;;  %v2862_v56 = vand.u32 2147483647, %v224_v44 }
  0x86   : > { %3974 = vmatmul.msk.f32.gmra.mxu1 %vm463_vm0, %v214_v60  ;;  %4036 = vmatmul.msk.f32.gmra.mxu3 %vm463_vm0, %v338_v61 }
  0x88   : > { %894 = vmatmul.f32.gmra.mxu0 %v207_v39  ;;  %3158 = vxpose.xlu1.b32.cont [14/16] %v2883_v3, 128  ;;  %v4790_v39 = vld [vmem:[%s4578_s26 + $0x218] sm:$0xff] }
  0x89   : > { %v2892_v42 = vand.u32 2147483647, %v4790_v39 }
  0x8a   : > { %3126 = vxpose.xlu0.b32.cont [14/16] (narrow) %v2852_v4, 32  ;;  %v228_v4 = vld [vmem:[%s4578_s26 + $0x148] sm:$0xff] }
  0x8c   : > { %3094 = vxpose.xlu2.b32.cont [14/16] %v2851_v7, 128 }
  0x8d   : > { %1086 = vmatmul.f32.gmra.mxu2 %v335_v2  ;;  %v2896_v2 = vand.u32 2147483647, %v4815_v62 }
  0x8e   : > { %3975 = vmatmul.msk.f32.gmra.mxu1 %vm463_vm0, %v216_v5  ;;  %4037 = vmatmul.msk.f32.gmra.mxu3 %vm463_vm0, %v340_v6  ;;  %v352_v5 = vld [vmem:[%s4578_s26 + $0x528] sm:$0xff]  ;;  %v2864_v6 = vand.u32 2147483647, %v226_v53 }
  0x90   : > { %897 = vmatmul.f32.gmra.mxu0 %v209_v46  ;;  %3159 = vxpose.xlu1.b32.cont [15/16] %v2885_v13, 128  ;;  %v348_v46 = vld [vmem:[%s4578_s26 + $0x508] sm:$0xff] }
  0x91   : > { %v4829_v13 = vld [vmem:[%s4578_s26 + $0x248] sm:$0xff] }
  0x92   : > { %3127 = vxpose.xlu0.b32.cont [15/16] (narrow) %v2854_v14, 32  ;;  %v349_v14 = vld [vmem:[%s4578_s26 + $0x510] sm:$0xff] }
  0x94   : > { %3095 = vxpose.xlu2.b32.cont [15/16] %v2853_v17, 128  ;;  %v230_v17 = vld [vmem:[%s4578_s26 + $0x158] sm:$0xff] }
  0x95   : > { %1089 = vmatmul.f32.gmra.mxu2 %v337_v11 }
  0x96   : > { %3976 = vmatmul.msk.f32.gmra.mxu1 %vm463_vm0, %v218_v15  ;;  %4038 = vmatmul.msk.f32.gmra.mxu3 %vm463_vm0, %v342_v16  ;;  %v2898_v15 = vand.u32 2147483647, %v4829_v13 }
  0x98   : > { %900 = vmatmul.f32.gmra.mxu0 %v211_v55  ;;  %3160 = vxpose.xlu1.b32.end [16/16] %v2887_v23, 128  ;;  %v350_v55 = vld [vmem:[%s4578_s26 + $0x518] sm:$0xff] }
  0x9a   : > { %3128 = vxpose.xlu0.b32.end [16/16] (narrow) %v2856_v24, 32 }
  0x9b   : > { %v1266_v25 = vpop.f32.mrf.mxu1 }
  0x9c   : > { %3096 = vxpose.xlu2.b32.end [16/16] %v2855_v29, 128 }
  0x9d   : > { %1092 = vmatmul.f32.gmra.mxu2 %v339_v22  ;;  %v2866_v22 = vand.u32 2147483647, %v228_v4 }
  0x9e   : > { %3977 = vmatmul.msk.f32.gmra.mxu1 %vm463_vm0, %v220_v26  ;;  %4039 = vmatmul.msk.f32.gmra.mxu3 %vm463_vm0, %v344_v28  ;;  %v4843_v26 = vld [vmem:[%s4578_s26 + $0x258] sm:$0xff]  ;;  %v351_v28 = vld [vmem:[%s4578_s26 + $0x520] sm:$0xff] }
  0x9f   : > { %v2900_v29 = vand.u32 2147483647, %v4843_v26 }
  0xa0   : > { %903 = vmatmul.f32.gmra.mxu0 %v213_v0  ;;  %3241 = vxpose.xlu1.b32.start [1/16] (narrow) %v2890_v33, 32  ;;  %v347_v0 = vld [vmem:[%s4578_s26 + $0x500] sm:$0xff]  ;;  %v232_v33 = vld [vmem:[%s4578_s26 + $0x168] sm:$0xff] }
  0xa3   : > { %v1269_v34 = vpop.f32.mrf.mxu1 }
  0xa4   : > { %3177 = vxpose.xlu2.b32.start [1/16] (narrow) %v2858_v38, 32 }
  0xa5   : > { %1095 = vmatmul.f32.gmra.mxu2 %v341_v32 }
  0xa6   : > { %3978 = vmatmul.msk.f32.gmra.mxu1 %vm463_vm0, %v222_v35  ;;  %4040 = vmatmul.msk.f32.gmra.mxu3 %vm463_vm0, %v346_v37  ;;  %v2868_v35 = vand.u32 2147483647, %v230_v17 }
  0xa8   : > { %906 = vmatmul.f32.gmra.mxu0 %v215_v10  ;;  %3242 = vxpose.xlu1.b32.cont [2/16] (narrow) %v2892_v42, 32 }
  0xab   : > { %v1272_v43 = vpop.f32.mrf.mxu1 }
  0xac   : > { %3178 = vxpose.xlu2.b32.cont [2/16] (narrow) %v2860_v47, 32 }
  0xad   : > { %1098 = vmatmul.f32.gmra.mxu2 %v343_v40 }
  0xae   : > { %3979 = vmatmul.msk.f32.gmra.mxu1 %vm463_vm0, %v224_v44  ;;  %4041 = vmatmul.msk.f32.gmra.mxu3 %vm463_vm0, %v348_v46  ;;  %v353_v44 = vld [vmem:[%s4578_s26 + $0x530] sm:$0xff] }
  0xb0   : > { %909 = vmatmul.f32.gmra.mxu0 %v217_v20  ;;  %3243 = vxpose.xlu1.b32.cont [3/16] (narrow) %v2894_v51, 32  ;;  %v354_v20 = vld [vmem:[%s4578_s26 + $0x538] sm:$0xff] }
  0xb1   : > { %v358_v51 = vld [vmem:[%s4578_s26 + $0x558] sm:$0xff] }
  0xb3   : > { %v4803_v52 = vpop.f32.mrf.mxu1 }
  0xb4   : > { %3179 = vxpose.xlu2.b32.cont [3/16] (narrow) %v2862_v56, 32 }
  0xb5   : > { %1101 = vmatmul.f32.gmra.mxu2 %v345_v50  ;;  %v865_v58 = vpop.f32.mrf.mxu0  ;;  %v234_v50 = vld [vmem:[%s4578_s26 + $0x178] sm:$0xff] }
  0xb6   : > { %3980 = vmatmul.msk.f32.gmra.mxu1 %vm463_vm0, %v226_v53  ;;  %4042 = vmatmul.msk.f32.gmra.mxu3 %vm463_vm0, %v350_v55  ;;  %v1267_v59 = vadd.f32 %v1266_v25, %v865_v58 }
  0xb8   : > { %v4809_v60 = vpop.f32.mrf.mxu2  ;;  %912 = vmatmul.f32.gmra.mxu0 %v4593_v12  ;;  %1650 = vxpose.xlu0.b32.start [1/16] (narrow) %v1267_v59, 72  ;;  %v4873_v59 = vld [vmem:[%s4578_s26 + $0x278] sm:$0xff] }
  0xb9   : > { %6570 = vst [vmem:[#allocation8_spill] sm:$0xff] %v4809_v60  ;;  %v4812_v61 = vpop.f32.mrf.mxu3  ;;  %3244 = vxpose.xlu1.b32.cont [4/16] (narrow) %v2896_v2, 32  ;;  %v2904_v2 = vand.u32 2147483647, %v4873_v59 }
  0xba   : > { %6571 = vst [vmem:[#allocation9_spill] sm:$0xff] %v4812_v61  ;;  %v5411_v61 = vld [vmem:[%s4578_s26 + $0x3c0] sm:$0xff] }
  0xbb   : > { %v4819_v3 = vpop.f32.mrf.mxu1  ;;  %6588 = vst [vmem:[#allocation26_spill] sm:$0xff] %v5411_v61 }
  0xbc   : > { %3180 = vxpose.xlu2.b32.cont [4/16] (narrow) %v2864_v6, 32  ;;  %v360_v6 = vld [vmem:[%s4578_s26 + $0x568] sm:$0xff] }
  0xbd   : > { %1104 = vmatmul.f32.gmra.mxu2 %v347_v0  ;;  %v868_v12 = vpop.f32.mrf.mxu0  ;;  %v355_v0 = vld [vmem:[%s4578_s26 + $0x540] sm:$0xff] }
  0xbe   : > { %3981 = vmatmul.msk.f32.gmra.mxu1 %vm463_vm0, %v228_v4  ;;  %4043 = vmatmul.msk.f32.gmra.mxu3 %vm463_vm0, %v352_v5  ;;  %v1270_v7 = vadd.f32 %v1269_v34, %v868_v12  ;;  %v356_v34 = vld [vmem:[%s4578_s26 + $0x548] sm:$0xff] }
  0xbf   : > { %v236_v5 = vld [vmem:[%s4578_s26 + $0x188] sm:$0xff] }
  0xc0   : > { %v4825_v10 = vpop.f32.mrf.mxu2  ;;  %915 = vmatmul.f32.gmra.mxu0 %v4612_v21  ;;  %1651 = vxpose.xlu0.b32.cont [2/16] (narrow) %v1270_v7, 72 }
  0xc1   : > { %6572 = vst [vmem:[#allocation10_spill] sm:$0xff] %v4825_v10  ;;  %v1464_v11 = vpop.f32.mrf.mxu3  ;;  %3245 = vxpose.xlu1.b32.cont [5/16] (narrow) %v2898_v15, 32  ;;  %v4888_v15 = vld [vmem:[%s4578_s26 + $0x288] sm:$0xff] }
  0xc3   : > { %v4833_v16 = vpop.f32.mrf.mxu1 }
  0xc4   : > { %3181 = vxpose.xlu2.b32.cont [5/16] (narrow) %v2866_v22, 32 }
  0xc5   : > { %1107 = vmatmul.f32.gmra.mxu2 %v349_v14  ;;  %v871_v21 = vpop.f32.mrf.mxu0 }
  0xc6   : > { %3982 = vmatmul.msk.f32.gmra.mxu1 %vm463_vm0, %v230_v17  ;;  %4044 = vmatmul.msk.f32.gmra.mxu3 %vm463_vm0, %v354_v20  ;;  %v1273_v23 = vadd.f32 %v1272_v43, %v871_v21  ;;  %v4858_v43 = vld [vmem:[%s4578_s26 + $0x268] sm:$0xff]  ;;  %v357_v17 = vld [vmem:[%s4578_s26 + $0x550] sm:$0xff]  ;;  %v2906_v20 = vand.u32 2147483647, %v4888_v15  ;;  %v238_v21 = vld [vmem:[%s4578_s26 + $0x198] sm:$0xff] }
  0xc7   : > { %v2902_v46 = vand.u32 2147483647, %v4858_v43 }
  0xc8   : > { %v4839_v24 = vpop.f32.mrf.mxu2  ;;  %918 = vmatmul.f32.gmra.mxu0 %v4631_v31  ;;  %1652 = vxpose.xlu0.b32.cont [3/16] (narrow) %v1273_v23, 72  ;;  %v362_v23 = vld [vmem:[%s4578_s26 + $0x578] sm:$0xff] }
  0xc9   : > { %6573 = vst [vmem:[#allocation11_spill] sm:$0xff] %v4839_v24  ;;  %v1467_v25 = vpop.f32.mrf.mxu3  ;;  %3246 = vxpose.xlu1.b32.cont [6/16] (narrow) %v2900_v29, 32  ;;  %v4244_v24 = vld [vmem:[%s4578_s26 + $0x4c0] sm:$0xff] }
  0xca   : > { %v2977_v10 = vand.u32 2147483647, %v4244_v24 }
  0xcb   : > { %v4847_v32 = vpop.f32.mrf.mxu1 }
  0xcc   : > { %3182 = vxpose.xlu2.b32.cont [6/16] (narrow) %v2868_v35, 32  ;;  %v359_v35 = vld [vmem:[%s4578_s26 + $0x560] sm:$0xff] }
  0xcd   : > { %1110 = vmatmul.f32.gmra.mxu2 %v351_v28  ;;  %v874_v31 = vpop.f32.mrf.mxu0 }
  0xce   : > { %3983 = vmatmul.msk.f32.gmra.mxu1 %vm463_vm0, %v232_v33  ;;  %4045 = vmatmul.msk.f32.gmra.mxu3 %vm463_vm0, %v356_v34  ;;  %v1276_v37 = vadd.f32 %v4803_v52, %v874_v31  ;;  %v2870_v52 = vand.u32 2147483647, %v232_v33  ;;  %v4903_v34 = vld [vmem:[%s4578_s26 + $0x298] sm:$0xff] }
  0xcf   : > { %v2908_v31 = vand.u32 2147483647, %v4903_v34 }
  0xd0   : > { %v1063_v38 = vpop.f32.mrf.mxu2  ;;  %921 = vmatmul.f32.gmra.mxu0 %v4646_v41  ;;  %1653 = vxpose.xlu0.b32.cont [4/16] (narrow) %v1276_v37, 72 }
  0xd1   : > { %v4855_v40 = vadd.f32 %v1464_v11, %v1063_v38  ;;  %v1470_v42 = vpop.f32.mrf.mxu3  ;;  %3247 = vxpose.xlu1.b32.cont [7/16] (narrow) %v2902_v46, 32  ;;  %v240_v38 = vld [vmem:[%s4578_s26 + $0x1a8] sm:$0xff] }
  0xd3   : > { %6574 = vst [vmem:[#allocation12_spill] sm:$0xff] %v4855_v40  ;;  %v4862_v47 = vpop.f32.mrf.mxu1 }
  0xd4   : > { %3183 = vxpose.xlu2.b32.cont [7/16] (narrow) %v2870_v52, 32  ;;  %v4918_v52 = vld [vmem:[%s4578_s26 + $0x2a8] sm:$0xff] }
  0xd5   : > { %1113 = vmatmul.f32.gmra.mxu2 %v353_v44  ;;  %v877_v41 = vpop.f32.mrf.mxu0 }
  0xd6   : > { %3984 = vmatmul.msk.f32.gmra.mxu1 %vm463_vm0, %v234_v50  ;;  %4046 = vmatmul.msk.f32.gmra.mxu3 %vm463_vm0, %v358_v51  ;;  %v1279_v53 = vadd.f32 %v4819_v3, %v877_v41  ;;  %v2872_v3 = vand.u32 2147483647, %v234_v50  ;;  %v361_v41 = vld [vmem:[%s4578_s26 + $0x570] sm:$0xff] }
  0xd8   : > { %v1066_v55 = vpop.f32.mrf.mxu2  ;;  %924 = vmatmul.f32.gmra.mxu0 %v4661_v49  ;;  %1654 = vxpose.xlu0.b32.cont [5/16] (narrow) %v1279_v53, 72  ;;  %v2910_v53 = vand.u32 2147483647, %v4918_v52 }
  0xd9   : > { %v4870_v56 = vadd.f32 %v1467_v25, %v1066_v55  ;;  %v1473_v58 = vpop.f32.mrf.mxu3  ;;  %3248 = vxpose.xlu1.b32.cont [8/16] (narrow) %v2904_v2, 32 }
  0xdb   : > { %6575 = vst [vmem:[#allocation13_spill] sm:$0xff] %v4870_v56  ;;  %v4877_v4 = vpop.f32.mrf.mxu1 }
  0xdc   : > { %3184 = vxpose.xlu2.b32.cont [8/16] (narrow) %v2872_v3, 32 }
  0xdd   : > { %1116 = vmatmul.f32.gmra.mxu2 %v355_v0  ;;  %v880_v49 = vpop.f32.mrf.mxu0  ;;  %v366_v0 = vld [vmem:[%s4578_s26 + $0x598] sm:$0xff] }
  0xde   : > { %3985 = vmatmul.msk.f32.gmra.mxu1 %vm463_vm0, %v236_v5  ;;  %4047 = vmatmul.msk.f32.gmra.mxu3 %vm463_vm0, %v360_v6  ;;  %v1282_v12 = vadd.f32 %v4833_v16, %v880_v49  ;;  %v2874_v16 = vand.u32 2147483647, %v236_v5  ;;  %v4933_v49 = vld [vmem:[%s4578_s26 + $0x2b8] sm:$0xff] }
  0xe0   : > { %v1069_v7 = vpop.f32.mrf.mxu2  ;;  %927 = vmatmul.f32.gmra.mxu0 %v4671_v57  ;;  %1655 = vxpose.xlu0.b32.cont [6/16] (narrow) %v1282_v12, 72  ;;  %v363_v12 = vld [vmem:[%s4578_s26 + $0x580] sm:$0xff] }
  0xe1   : > { %v4885_v11 = vadd.f32 %v1470_v42, %v1069_v7  ;;  %v1476_v14 = vpop.f32.mrf.mxu3  ;;  %3249 = vxpose.xlu1.b32.cont [9/16] (narrow) %v2906_v20, 32  ;;  %v364_v42 = vld [vmem:[%s4578_s26 + $0x588] sm:$0xff]  ;;  %v2912_v7 = vand.u32 2147483647, %v4933_v49 }
  0xe2   : > { %v368_v20 = vld [vmem:[%s4578_s26 + $0x5a8] sm:$0xff] }
  0xe3   : > { %6576 = vst [vmem:[#allocation14_spill] sm:$0xff] %v4885_v11  ;;  %v4892_v22 = vpop.f32.mrf.mxu1  ;;  %v314_v11 = vld [vmem:[%s4578_s26 + $0x3f8] sm:$0xff] }
  0xe4   : > { %3185 = vxpose.xlu2.b32.cont [9/16] (narrow) %v2874_v16, 32 }
  0xe5   : > { %1119 = vmatmul.f32.gmra.mxu2 %v357_v17  ;;  %v883_v57 = vpop.f32.mrf.mxu0  ;;  %v244_v17 = vld [vmem:[%s4578_s26 + $0x1c8] sm:$0xff] }
  0xe6   : > { %3986 = vmatmul.msk.f32.gmra.mxu1 %vm463_vm0, %v238_v21  ;;  %4048 = vmatmul.msk.f32.gmra.mxu3 %vm463_vm0, %v362_v23  ;;  %v1285_v25 = vadd.f32 %v4847_v32, %v883_v57  ;;  %v2876_v32 = vand.u32 2147483647, %v238_v21 }
  0xe8   : > { %v1072_v28 = vpop.f32.mrf.mxu2  ;;  %930 = vmatmul.f32.gmra.mxu0 %v4681_v1  ;;  %1656 = vxpose.xlu0.b32.cont [7/16] (narrow) %v1285_v25, 72  ;;  %v4948_v25 = vld [vmem:[%s4578_s26 + $0x2c8] sm:$0xff] }
  0xe9   : > { %v4900_v29 = vadd.f32 %v1473_v58, %v1072_v28  ;;  %v1479_v33 = vpop.f32.mrf.mxu3  ;;  %3250 = vxpose.xlu1.b32.cont [10/16] (narrow) %v2908_v31, 32  ;;  %v242_v58 = vld [vmem:[%s4578_s26 + $0x1b8] sm:$0xff]  ;;  %v365_v28 = vld [vmem:[%s4578_s26 + $0x590] sm:$0xff] }
  0xea   : > { %v246_v31 = vld [vmem:[%s4578_s26 + $0x1d8] sm:$0xff] }
  0xeb   : > { %6577 = vst [vmem:[#allocation15_spill] sm:$0xff] %v4900_v29  ;;  %v4907_v37 = vpop.f32.mrf.mxu1 }
  0xec   : > { %3186 = vxpose.xlu2.b32.cont [10/16] (narrow) %v2876_v32, 32 }
  0xed   : > { %1122 = vmatmul.f32.gmra.mxu2 %v359_v35  ;;  %v886_v1 = vpop.f32.mrf.mxu0 }
  0xee   : > { %3987 = vmatmul.msk.f32.gmra.mxu1 %vm463_vm0, %v240_v38  ;;  %4049 = vmatmul.msk.f32.gmra.mxu3 %vm463_vm0, %v364_v42  ;;  %v1288_v44 = vadd.f32 %v4862_v47, %v886_v1  ;;  %v2878_v47 = vand.u32 2147483647, %v240_v38  ;;  %v370_v38 = vld [vmem:[%s4578_s26 + $0x5b8] sm:$0xff] }
  0xf0   : > { %v1075_v46 = vpop.f32.mrf.mxu2  ;;  %933 = vmatmul.f32.gmra.mxu0 %v4691_v9  ;;  %1657 = vxpose.xlu0.b32.cont [8/16] (narrow) %v1288_v44, 72 }
  0xf1   : > { %v4915_v50 = vadd.f32 %v1476_v14, %v1075_v46  ;;  %v1482_v51 = vpop.f32.mrf.mxu3  ;;  %3251 = vxpose.xlu1.b32.cont [11/16] (narrow) %v2910_v53, 32  ;;  %v4963_v46 = vld [vmem:[%s4578_s26 + $0x2d8] sm:$0xff] }
  0xf3   : > { %6578 = vst [vmem:[#allocation16_spill] sm:$0xff] %v4915_v50  ;;  %v4922_v55 = vpop.f32.mrf.mxu1 }
  0xf4   : > { %3187 = vxpose.xlu2.b32.cont [11/16] (narrow) %v2878_v47, 32 }
  0xf5   : > { %1125 = vmatmul.f32.gmra.mxu2 %v361_v41  ;;  %v889_v9 = vpop.f32.mrf.mxu0  ;;  %v2916_v41 = vand.u32 2147483647, %v4963_v46 }
  0xf6   : > { %3988 = vmatmul.msk.f32.gmra.mxu1 %vm463_vm0, %v242_v58  ;;  %4050 = vmatmul.msk.f32.gmra.mxu3 %vm463_vm0, %v366_v0  ;;  %v1291_v2 = vadd.f32 %v4877_v4, %v889_v9  ;;  %v2880_v4 = vand.u32 2147483647, %v242_v58  ;;  %v248_v58 = vld [vmem:[%s4578_s26 + $0x1e8] sm:$0xff] }
  0xf7   : > { %v372_v0 = vld [vmem:[%s4578_s26 + $0x5c8] sm:$0xff] }
  0xf8   : > { %v1078_v5 = vpop.f32.mrf.mxu2  ;;  %936 = vmatmul.f32.gmra.mxu0 %v4701_v18  ;;  %1658 = vxpose.xlu0.b32.cont [9/16] (narrow) %v1291_v2, 72 }
  0xf9   : > { %v4930_v6 = vadd.f32 %v1479_v33, %v1078_v5  ;;  %v1485_v3 = vpop.f32.mrf.mxu3  ;;  %3252 = vxpose.xlu1.b32.cont [12/16] (narrow) %v2912_v7, 32  ;;  %v2914_v33 = vand.u32 2147483647, %v4948_v25 }
  0xfb   : > { %6579 = vst [vmem:[#allocation17_spill] sm:$0xff] %v4930_v6  ;;  %v4937_v14 = vpop.f32.mrf.mxu1  ;;  %v4243_v6 = vld [vmem:[%s4578_s26 + $0x4b0] sm:$0xff] }
  0xfc   : > { %3188 = vxpose.xlu2.b32.cont [12/16] (narrow) %v2880_v4, 32 }
  0xfd   : > { %1128 = vmatmul.f32.gmra.mxu2 %v363_v12  ;;  %v892_v18 = vpop.f32.mrf.mxu0  ;;  %v369_v12 = vld [vmem:[%s4578_s26 + $0x5b0] sm:$0xff] }
  0xfe   : > { %3989 = vmatmul.msk.f32.gmra.mxu1 %vm463_vm0, %v244_v17  ;;  %4051 = vmatmul.msk.f32.gmra.mxu3 %vm463_vm0, %v368_v20  ;;  %v1294_v21 = vadd.f32 %v4892_v22, %v892_v18  ;;  %v2882_v22 = vand.u32 2147483647, %v244_v17  ;;  %v250_v20 = vld [vmem:[%s4578_s26 + $0x1f8] sm:$0xff] }
  0xff   : > { %v374_v18 = vld [vmem:[%s4578_s26 + $0x5d8] sm:$0xff] }
 0x100   : > { %v1081_v23 = vpop.f32.mrf.mxu2  ;;  %939 = vmatmul.f32.gmra.mxu0 %v4711_v27  ;;  %1659 = vxpose.xlu0.b32.cont [10/16] (narrow) %v1294_v21, 72 }
 0x101   : > { %v4945_v57 = vadd.f32 %v1482_v51, %v1081_v23  ;;  %v1488_v16 = vpop.f32.mrf.mxu3  ;;  %3253 = vxpose.xlu1.b32.cont [13/16] (narrow) %v2914_v33, 32  ;;  %v367_v51 = vld [vmem:[%s4578_s26 + $0x5a0] sm:$0xff] }
 0x102   : > { %v371_v33 = vld [vmem:[%s4578_s26 + $0x5c0] sm:$0xff] }
 0x103   : > { %6580 = vst [vmem:[#allocation18_spill] sm:$0xff] %v4945_v57  ;;  %v4952_v35 = vpop.f32.mrf.mxu1 }
 0x104   : > { %3189 = vxpose.xlu2.b32.cont [13/16] (narrow) %v2882_v22, 32  ;;  %v2888_v22 = vand.u32 2147483647, %v250_v20 }
 0x105   : > { %1131 = vmatmul.f32.gmra.mxu2 %v365_v28  ;;  %v895_v27 = vpop.f32.mrf.mxu0  ;;  %v4989_v28 = vld [vmem:[%s4578_s26 + $0x2f8] sm:$0xff] }
 0x106   : > { %3990 = vmatmul.msk.f32.gmra.mxu1 %vm463_vm0, %v246_v31  ;;  %4052 = vmatmul.msk.f32.gmra.mxu3 %vm463_vm0, %v370_v38  ;;  %v1297_v42 = vadd.f32 %v4907_v37, %v895_v27  ;;  %v376_v27 = vld [vmem:[%s4578_s26 + $0x5e8] sm:$0xff] }
 0x108   : > { %v1084_v1 = vpop.f32.mrf.mxu2  ;;  %942 = vmatmul.f32.gmra.mxu0 %v4721_v36  ;;  %1660 = vxpose.xlu0.b32.cont [11/16] (narrow) %v1297_v42, 72  ;;  %v2884_v36 = vand.u32 2147483647, %v246_v31  ;;  %v2920_v31 = vand.u32 2147483647, %v4989_v28 }
 0x109   : > { %v4960_v32 = vadd.f32 %v1485_v3, %v1084_v1  ;;  %v1491_v44 = vpop.f32.mrf.mxu3  ;;  %3254 = vxpose.xlu1.b32.cont [14/16] (narrow) %v2916_v41, 32  ;;  %v4976_v3 = vld [vmem:[%s4578_s26 + $0x2e8] sm:$0xff] }
 0x10a   : > { %v2918_v7 = vand.u32 2147483647, %v4976_v3 }
 0x10b   : > { %6581 = vst [vmem:[#allocation19_spill] sm:$0xff] %v4960_v32  ;;  %v1308_v53 = vpop.f32.mrf.mxu1 }
 0x10c   : > { %3190 = vxpose.xlu2.b32.cont [14/16] (narrow) %v2884_v36, 32  ;;  %v375_v36 = vld [vmem:[%s4578_s26 + $0x5e0] sm:$0xff] }
 0x10d   : > { %1134 = vmatmul.f32.gmra.mxu2 %v367_v51  ;;  %v898_v37 = vpop.f32.mrf.mxu0  ;;  %v373_v51 = vld [vmem:[%s4578_s26 + $0x5d0] sm:$0xff] }
 0x10e   : > { %3991 = vmatmul.msk.f32.gmra.mxu1 %vm463_vm0, %v248_v58  ;;  %4053 = vmatmul.msk.f32.gmra.mxu3 %vm463_vm0, %v372_v0  ;;  %v1300_v9 = vadd.f32 %v4922_v55, %v898_v37 }
 0x110   : > { %v1087_v47 = vpop.f32.mrf.mxu2  ;;  %945 = vmatmul.f32.gmra.mxu0 %v4731_v45  ;;  %1661 = vxpose.xlu0.b32.cont [12/16] (narrow) %v1300_v9, 72  ;;  %v2886_v45 = vand.u32 2147483647, %v248_v58  ;;  %v378_v58 = vld [vmem:[%s4578_s26 + $0x5f8] sm:$0xff] }
 0x111   : > { %v4973_v2 = vadd.f32 %v1488_v16, %v1087_v47  ;;  %v1494_v5 = vpop.f32.mrf.mxu3  ;;  %3255 = vxpose.xlu1.b32.cont [15/16] (narrow) %v2918_v7, 32  ;;  %v380_v47 = vld [vmem:[%s4578_s26 + $0x608] sm:$0xff]  ;;  %v251_v7 = vld [vmem:[%s4578_s26 + $0x200] sm:$0xff] }
 0x113   : > { %6582 = vst [vmem:[#allocation20_spill] sm:$0xff] %v4973_v2  ;;  %v1311_v17 = vpop.f32.mrf.mxu1 }
 0x114   : > { %3191 = vxpose.xlu2.b32.cont [15/16] (narrow) %v2886_v45, 32  ;;  %v2889_v45 = vand.u32 2147483647, %v251_v7 }
 0x115   : > { %1137 = vmatmul.f32.gmra.mxu2 %v369_v12  ;;  %v901_v55 = vpop.f32.mrf.mxu0 }
 0x116   : > { %3992 = vmatmul.msk.f32.gmra.mxu1 %vm463_vm0, %v250_v20  ;;  %4054 = vmatmul.msk.f32.gmra.mxu3 %vm463_vm0, %v374_v18  ;;  %v1303_v4 = vadd.f32 %v4937_v14, %v901_v55  ;;  %v377_v20 = vld [vmem:[%s4578_s26 + $0x5f0] sm:$0xff]  ;;  %v382_v55 = vld [vmem:[%s4578_s26 + $0x618] sm:$0xff] }
 0x118   : > { %v1090_v21 = vpop.f32.mrf.mxu2  ;;  %948 = vmatmul.f32.gmra.mxu0 %v4741_v54  ;;  %1662 = vxpose.xlu0.b32.cont [13/16] (narrow) %v1303_v4, 72 }
 0x119   : > { %v4986_v23 = vadd.f32 %v1491_v44, %v1090_v21  ;;  %v1497_v16 = vpop.f32.mrf.mxu3  ;;  %3256 = vxpose.xlu1.b32.end [16/16] (narrow) %v2920_v31, 32 }
 0x11b   : > { %6583 = vst [vmem:[#allocation21_spill] sm:$0xff] %v4986_v23  ;;  %v1314_v38 = vpop.f32.mrf.mxu1  ;;  %v4242_v23 = vld [vmem:[%s4578_s26 + $0x4a0] sm:$0xff] }
 0x11c   : > { %3192 = vxpose.xlu2.b32.end [16/16] (narrow) %v2888_v22, 32  ;;  %v2973_v2 = vand.u32 2147483647, %v4242_v23 }
 0x11d   : > { %1140 = vmatmul.f32.gmra.mxu2 %v371_v33  ;;  %v904_v14 = vpop.f32.mrf.mxu0  ;;  %v379_v33 = vld [vmem:[%s4578_s26 + $0x600] sm:$0xff] }
 0x11e   : > { %3993 = vmatmul.msk.f32.gmra.mxu1 %vm463_vm0, %v4781_v30  ;;  %4055 = vmatmul.msk.f32.gmra.mxu3 %vm463_vm0, %v376_v27  ;;  %v1306_v54 = vadd.f32 %v4952_v35, %v904_v14  ;;  %v384_v27 = vld [vmem:[%s4578_s26 + $0x628] sm:$0xff] }
 0x120   : > { %v1093_v42 = vpop.f32.mrf.mxu2  ;;  %951 = vmatmul.f32.gmra.mxu0 %v4751_v63  ;;  %1663 = vxpose.xlu0.b32.cont [14/16] (narrow) %v1306_v54, 72 }
 0x121   : > { %v4999_v1 = vadd.f32 %v1494_v5, %v1093_v42  ;;  %v1500_v44 = vpop.f32.mrf.mxu3 }
 0x123   : > { %6584 = vst [vmem:[#allocation22_spill] sm:$0xff] %v4999_v1  ;;  %v1317_v41 = vpop.f32.mrf.mxu1 }
 0x125   : > { %1143 = vmatmul.f32.gmra.mxu2 %v373_v51  ;;  %v907_v0 = vpop.f32.mrf.mxu0  ;;  %v381_v51 = vld [vmem:[%s4578_s26 + $0x610] sm:$0xff] }
 0x126   : > { %3994 = vmatmul.msk.f32.gmra.mxu1 %vm463_vm0, %v4790_v39  ;;  %4056 = vmatmul.msk.f32.gmra.mxu3 %vm463_vm0, %v378_v58  ;;  %v1309_v30 = vadd.f32 %v1308_v53, %v907_v0  ;;  %v386_v0 = vld [vmem:[%s4578_s26 + $0x638] sm:$0xff] }
 0x128   : > { %v1096_v35 = vpop.f32.mrf.mxu2  ;;  %954 = vmatmul.f32.gmra.mxu0 %v4761_v8  ;;  %1664 = vxpose.xlu0.b32.cont [15/16] (narrow) %v1309_v30, 72 }
 0x129   : > { %v5007_v63 = vadd.f32 %v1497_v16, %v1096_v35  ;;  %v1503_v37 = vpop.f32.mrf.mxu3  ;;  %v253_v16 = vld [vmem:[%s4578_s26 + $0x210] sm:$0xff] }
 0x12a   : > { %v2891_v14 = vand.u32 2147483647, %v253_v16 }
 0x12b   : > { %6585 = vst [vmem:[#allocation23_spill] sm:$0xff] %v5007_v63  ;;  %v1320_v9 = vpop.f32.mrf.mxu1 }
 0x12d   : > { %1146 = vmatmul.f32.gmra.mxu2 %v375_v36  ;;  %v910_v5 = vpop.f32.mrf.mxu0 }
 0x12e   : > { %3995 = vmatmul.msk.f32.gmra.mxu1 %vm463_vm0, %v4799_v48  ;;  %4057 = vmatmul.msk.f32.gmra.mxu3 %vm463_vm0, %v380_v47  ;;  %v1312_v39 = vadd.f32 %v1311_v17, %v910_v5  ;;  %v257_v47 = vld [vmem:[%s4578_s26 + $0x230] sm:$0xff]  ;;  %v383_v5 = vld [vmem:[%s4578_s26 + $0x620] sm:$0xff] }
 0x130   : > { %v1099_v53 = vpop.f32.mrf.mxu2  ;;  %957 = vmatmul.f32.gmra.mxu0 %v4771_v19  ;;  %1665 = vxpose.xlu0.b32.end [16/16] (narrow) %v1312_v39, 72 }
 0x131   : > { %v5015_v8 = vadd.f32 %v1500_v44, %v1099_v53  ;;  %v1506_v12 = vpop.f32.mrf.mxu3  ;;  %v255_v44 = vld [vmem:[%s4578_s26 + $0x220] sm:$0xff]  ;;  %v388_v53 = vld [vmem:[%s4578_s26 + $0x648] sm:$0xff] }
 0x132   : > { %v2893_v30 = vand.u32 2147483647, %v255_v44 }
 0x133   : > { %6586 = vst [vmem:[#allocation24_spill] sm:$0xff] %v5015_v8  ;;  %v1323_v18 = vpop.f32.mrf.mxu1 }
 0x135   : > { %1149 = vmatmul.f32.gmra.mxu2 %v377_v20  ;;  %v913_v48 = vpop.f32.mrf.mxu0 }
 0x136   : > { %3996 = vmatmul.msk.f32.gmra.mxu1 %vm463_vm0, %v4815_v62  ;;  %4058 = vmatmul.msk.f32.gmra.mxu3 %vm463_vm0, %v382_v55  ;;  %v1315_v19 = vadd.f32 %v1314_v38, %v913_v48  ;;  %v385_v48 = vld [vmem:[%s4578_s26 + $0x630] sm:$0xff] }
 0x138   : > { %v1102_v17 = vpop.f32.mrf.mxu2  ;;  %960 = vmatmul.f32.gmra.mxu0 %v251_v7  ;;  %3209 = vxpose.xlu0.b32.start [1/16] %v2889_v45, 128  ;;  %v259_v45 = vld [vmem:[%s4578_s26 + $0x240] sm:$0xff] }
 0x139   : > { %v5023_v4 = vadd.f32 %v1503_v37, %v1102_v17  ;;  %v1509_v21 = vpop.f32.mrf.mxu3  ;;  %1682 = vxpose.xlu1.b32.start [1/16] (narrow) %v1315_v19, 72  ;;  %v390_v17 = vld [vmem:[%s4578_s26 + $0x658] sm:$0xff] }
 0x13b   : > { %6587 = vst [vmem:[#allocation25_spill] sm:$0xff] %v5023_v4  ;;  %v1326_v31 = vpop.f32.mrf.mxu1 }
 0x13d   : > { %1152 = vmatmul.f32.gmra.mxu2 %v379_v33  ;;  %v916_v62 = vpop.f32.mrf.mxu0 }
 0x13e   : > { %3997 = vmatmul.msk.f32.gmra.mxu1 %vm463_vm0, %v4829_v13  ;;  %4059 = vmatmul.msk.f32.gmra.mxu3 %vm463_vm0, %v384_v27  ;;  %v1318_v38 = vadd.f32 %v1317_v41, %v916_v62  ;;  %v387_v62 = vld [vmem:[%s4578_s26 + $0x640] sm:$0xff] }
 0x140   : > { %v1105_v22 = vpop.f32.mrf.mxu2  ;;  %963 = vmatmul.f32.gmra.mxu0 %v253_v16  ;;  %3210 = vxpose.xlu0.b32.cont [2/16] %v2891_v14, 128  ;;  %v261_v14 = vld [vmem:[%s4578_s26 + $0x250] sm:$0xff] }
 0x141   : > { %v1512_v54 = vpop.f32.mrf.mxu3  ;;  %v1507_v42 = vadd.f32 %v1506_v12, %v1105_v22  ;;  %1683 = vxpose.xlu1.b32.cont [2/16] (narrow) %v1318_v38, 72  ;;  %v2895_v12 = vand.u32 2147483647, %v257_v47  ;;  %v392_v22 = vld [vmem:[%s4578_s26 + $0x668] sm:$0xff] }
 0x143   : > { %v1329_v58 = vpop.f32.mrf.mxu1  ;;  %1810 = vxpose.xlu2.b32.start [1/16] (narrow) %v1507_v42, 72 }
 0x145   : > { %1155 = vmatmul.f32.gmra.mxu2 %v381_v51  ;;  %v919_v13 = vpop.f32.mrf.mxu0 }
 0x146   : > { %3998 = vmatmul.msk.f32.gmra.mxu1 %vm463_vm0, %v4843_v26  ;;  %4060 = vmatmul.msk.f32.gmra.mxu3 %vm463_vm0, %v386_v0  ;;  %v1321_v41 = vadd.f32 %v1320_v9, %v919_v13  ;;  %v263_v0 = vld [vmem:[%s4578_s26 + $0x260] sm:$0xff] }
 0x148   : > { %v1108_v35 = vpop.f32.mrf.mxu2  ;;  %966 = vmatmul.f32.gmra.mxu0 %v255_v44  ;;  %3211 = vxpose.xlu0.b32.cont [3/16] %v2893_v30, 128  ;;  %v389_v30 = vld [vmem:[%s4578_s26 + $0x650] sm:$0xff] }
 0x149   : > { %v1510_v37 = vadd.f32 %v1509_v21, %v1108_v35  ;;  %v1515_v36 = vpop.f32.mrf.mxu3  ;;  %1684 = vxpose.xlu1.b32.cont [3/16] (narrow) %v1321_v41, 72  ;;  %v2897_v21 = vand.u32 2147483647, %v259_v45  ;;  %v394_v41 = vld [vmem:[%s4578_s26 + $0x678] sm:$0xff]  ;;  %v2901_v35 = vand.u32 2147483647, %v263_v0 }
 0x14b   : > { %v1332_v39 = vpop.f32.mrf.mxu1  ;;  %1811 = vxpose.xlu2.b32.cont [2/16] (narrow) %v1510_v37, 72 }
 0x14d   : > { %1158 = vmatmul.f32.gmra.mxu2 %v383_v5  ;;  %v922_v26 = vpop.f32.mrf.mxu0  ;;  %v265_v5 = vld [vmem:[%s4578_s26 + $0x270] sm:$0xff] }
 0x14e   : > { %3999 = vmatmul.msk.f32.gmra.mxu1 %vm463_vm0, %v4858_v43  ;;  %4061 = vmatmul.msk.f32.gmra.mxu3 %vm463_vm0, %v388_v53  ;;  %v1324_v9 = vadd.f32 %v1323_v18, %v922_v26  ;;  %v391_v53 = vld [vmem:[%s4578_s26 + $0x660] sm:$0xff]  ;;  %v396_v26 = vld [vmem:[%s4578_s26 + $0x688] sm:$0xff] }
 0x150   : > { %v1111_v7 = vpop.f32.mrf.mxu2  ;;  %969 = vmatmul.f32.gmra.mxu0 %v257_v47  ;;  %3212 = vxpose.xlu0.b32.cont [4/16] %v2895_v12, 128 }
 0x151   : > { %v1513_v20 = vadd.f32 %v1512_v54, %v1111_v7  ;;  %v1518_v55 = vpop.f32.mrf.mxu3  ;;  %1685 = vxpose.xlu1.b32.cont [4/16] (narrow) %v1324_v9, 72  ;;  %v2899_v54 = vand.u32 2147483647, %v261_v14  ;;  %v2903_v9 = vand.u32 2147483647, %v265_v5 }
 0x153   : > { %v1335_v19 = vpop.f32.mrf.mxu1  ;;  %1812 = vxpose.xlu2.b32.cont [3/16] (narrow) %v1513_v20, 72 }
 0x155   : > { %1161 = vmatmul.f32.gmra.mxu2 %v385_v48  ;;  %v925_v43 = vpop.f32.mrf.mxu0  ;;  %v393_v48 = vld [vmem:[%s4578_s26 + $0x670] sm:$0xff] }
 0x156   : > { %4000 = vmatmul.msk.f32.gmra.mxu1 %vm463_vm0, %v4873_v59  ;;  %4062 = vmatmul.msk.f32.gmra.mxu3 %vm463_vm0, %v390_v17  ;;  %v1327_v18 = vadd.f32 %v1326_v31, %v925_v43 }
 0x158   : > { %v1114_v16 = vpop.f32.mrf.mxu2  ;;  %972 = vmatmul.f32.gmra.mxu0 %v259_v45  ;;  %3213 = vxpose.xlu0.b32.cont [5/16] %v2897_v21, 128  ;;  %v267_v45 = vld [vmem:[%s4578_s26 + $0x280] sm:$0xff]  ;;  %v398_v21 = vld [vmem:[%s4578_s26 + $0x698] sm:$0xff] }
 0x159   : > { %v1516_v33 = vadd.f32 %v1515_v36, %v1114_v16  ;;  %v1521_v27 = vpop.f32.mrf.mxu3  ;;  %1686 = vxpose.xlu1.b32.cont [5/16] (narrow) %v1327_v18, 72  ;;  %v2905_v43 = vand.u32 2147483647, %v267_v45 }
 0x15b   : > { %v1338_v38 = vpop.f32.mrf.mxu1  ;;  %1813 = vxpose.xlu2.b32.cont [4/16] (narrow) %v1516_v33, 72 }
 0x15d   : > { %1164 = vmatmul.f32.gmra.mxu2 %v387_v62  ;;  %v928_v59 = vpop.f32.mrf.mxu0 }
 0x15e   : > { %4001 = vmatmul.msk.f32.gmra.mxu1 %vm463_vm0, %v4888_v15  ;;  %4063 = vmatmul.msk.f32.gmra.mxu3 %vm463_vm0, %v392_v22  ;;  %v1330_v31 = vadd.f32 %v1329_v58, %v928_v59  ;;  %v400_v22 = vld [vmem:[%s4578_s26 + $0x6a8] sm:$0xff] }
 0x160   : > { %v1117_v42 = vpop.f32.mrf.mxu2  ;;  %975 = vmatmul.f32.gmra.mxu0 %v261_v14  ;;  %3214 = vxpose.xlu0.b32.cont [6/16] %v2899_v54, 128  ;;  %v395_v14 = vld [vmem:[%s4578_s26 + $0x680] sm:$0xff] }
 0x161   : > { %v1519_v44 = vadd.f32 %v1518_v55, %v1117_v42  ;;  %v1524_v51 = vpop.f32.mrf.mxu3  ;;  %1687 = vxpose.xlu1.b32.cont [6/16] (narrow) %v1330_v31, 72 }
 0x163   : > { %v1341_v13 = vpop.f32.mrf.mxu1  ;;  %1814 = vxpose.xlu2.b32.cont [5/16] (narrow) %v1519_v44, 72  ;;  %v271_v44 = vld [vmem:[%s4578_s26 + $0x2a0] sm:$0xff] }
 0x165   : > { %1167 = vmatmul.f32.gmra.mxu2 %v389_v30  ;;  %v931_v15 = vpop.f32.mrf.mxu0  ;;  %v402_v30 = vld [vmem:[%s4578_s26 + $0x6b8] sm:$0xff] }
 0x166   : > { %4002 = vmatmul.msk.f32.gmra.mxu1 %vm463_vm0, %v4903_v34  ;;  %4064 = vmatmul.msk.f32.gmra.mxu3 %vm463_vm0, %v394_v41  ;;  %v1333_v58 = vadd.f32 %v1332_v39, %v931_v15  ;;  %v2909_v41 = vand.u32 2147483647, %v271_v44 }
 0x168   : > { %v1120_v37 = vpop.f32.mrf.mxu2  ;;  %978 = vmatmul.f32.gmra.mxu0 %v263_v0  ;;  %3215 = vxpose.xlu0.b32.cont [7/16] %v2901_v35, 128 }
 0x169   : > { %v1522_v36 = vadd.f32 %v1521_v27, %v1120_v37  ;;  %v1527_v47 = vpop.f32.mrf.mxu3  ;;  %1688 = vxpose.xlu1.b32.cont [7/16] (narrow) %v1333_v58, 72  ;;  %v269_v27 = vld [vmem:[%s4578_s26 + $0x290] sm:$0xff] }
 0x16a   : > { %v2907_v54 = vand.u32 2147483647, %v269_v27  ;;  %v273_v37 = vld [vmem:[%s4578_s26 + $0x2b0] sm:$0xff] }
 0x16b   : > { %v1344_v12 = vpop.f32.mrf.mxu1  ;;  %1815 = vxpose.xlu2.b32.cont [6/16] (narrow) %v1522_v36, 72  ;;  %v3097_v36 = vpop.trf.xlu2 }
 0x16d   : > { %1170 = vmatmul.f32.gmra.mxu2 %v391_v53  ;;  %v934_v34 = vpop.f32.mrf.mxu0  ;;  %v404_v53 = vld [vmem:[%s4578_s26 + $0x6c8] sm:$0xff] }
 0x16e   : > { %4003 = vmatmul.msk.f32.gmra.mxu1 %vm463_vm0, %v4918_v52  ;;  %4065 = vmatmul.msk.f32.gmra.mxu3 %vm463_vm0, %v396_v26  ;;  %v1336_v39 = vadd.f32 %v1335_v19, %v934_v34  ;;  %v2911_v26 = vand.u32 2147483647, %v273_v37 }
 0x170   : > { %v1123_v7 = vpop.f32.mrf.mxu2  ;;  %3216 = vxpose.xlu0.b32.cont [8/16] %v2903_v9, 128  ;;  %981 = vmatmul.f32.gmra.mxu0 %v265_v5 }
 0x171   : > { %v1525_v20 = vadd.f32 %v1524_v51, %v1123_v7  ;;  %v1530_v55 = vpop.f32.mrf.mxu3  ;;  %1689 = vxpose.xlu1.b32.cont [8/16] (narrow) %v1336_v39, 72  ;;  %v397_v51 = vld [vmem:[%s4578_s26 + $0x690] sm:$0xff]  ;;  %v275_v7 = vld [vmem:[%s4578_s26 + $0x2c0] sm:$0xff] }
 0x173   : > { %v1347_v17 = vpop.f32.mrf.mxu1  ;;  %1816 = vxpose.xlu2.b32.cont [7/16] (narrow) %v1525_v20, 72  ;;  %v3098_v20 = vpop.trf.xlu2 }
 0x175   : > { %1173 = vmatmul.f32.gmra.mxu2 %v393_v48  ;;  %v937_v52 = vpop.f32.mrf.mxu0 }
 0x176   : > { %4004 = vmatmul.msk.f32.gmra.mxu1 %vm463_vm0, %v4933_v49  ;;  %4066 = vmatmul.msk.f32.gmra.mxu3 %vm463_vm0, %v398_v21  ;;  %v1339_v19 = vadd.f32 %v1338_v38, %v937_v52  ;;  %v406_v21 = vld [vmem:[%s4578_s26 + $0x6d8] sm:$0xff]  ;;  %v3161_v52 = vpop.trf.xlu1 }
 0x178   : > { %v1126_v18 = vpop.f32.mrf.mxu2  ;;  %3217 = vxpose.xlu0.b32.cont [9/16] %v2905_v43, 128  ;;  %984 = vmatmul.f32.gmra.mxu0 %v267_v45  ;;  %v3593_v45 = vadd.f32 %v3098_v20, %v3097_v36  ;;  %v2913_v43 = vand.u32 2147483647, %v275_v7  ;;  %v410_v36 = vld [vmem:[%s4578_s26 + $0x6f8] sm:$0xff]  ;;  %v281_v20 = vld [vmem:[%s4578_s26 + $0x2f0] sm:$0xff] }
 0x179   : > { %v1528_v16 = vadd.f32 %v1527_v47, %v1126_v18  ;;  %v1533_v33 = vpop.f32.mrf.mxu3  ;;  %1690 = vxpose.xlu1.b32.cont [9/16] (narrow) %v1339_v19, 72  ;;  %v399_v47 = vld [vmem:[%s4578_s26 + $0x6a0] sm:$0xff]  ;;  %v5103_v19 = vpop.trf.xlu0 }
 0x17b   : > { %v1350_v62 = vpop.f32.mrf.mxu1  ;;  %1817 = vxpose.xlu2.b32.cont [8/16] (narrow) %v1528_v16, 72 }
 0x17d   : > { %1176 = vmatmul.f32.gmra.mxu2 %v395_v14  ;;  %v940_v49 = vpop.f32.mrf.mxu0  ;;  %v3099_v14 = vpop.trf.xlu2 }
 0x17e   : > { %4005 = vmatmul.msk.f32.gmra.mxu1 %vm463_vm0, %v4948_v25  ;;  %4067 = vmatmul.msk.f32.gmra.mxu3 %vm463_vm0, %v400_v22  ;;  %v1342_v38 = vadd.f32 %v1341_v13, %v940_v49  ;;  %v403_v22 = vld [vmem:[%s4578_s26 + $0x6c0] sm:$0xff] }
 0x180   : > { %v1129_v59 = vpop.f32.mrf.mxu2  ;;  %3218 = vxpose.xlu0.b32.cont [10/16] %v2907_v54, 128  ;;  %987 = vmatmul.f32.gmra.mxu0 %v269_v27  ;;  %v277_v27 = vld [vmem:[%s4578_s26 + $0x2d0] sm:$0xff]  ;;  %v3594_v54 = vadd.f32 %v3593_v45, %v3099_v14  ;;  %v407_v45 = vld [vmem:[%s4578_s26 + $0x6e0] sm:$0xff] }
 0x181   : > { %v1531_v31 = vadd.f32 %v1530_v55, %v1129_v59  ;;  %v1536_v42 = vpop.f32.mrf.mxu3  ;;  %1691 = vxpose.xlu1.b32.cont [10/16] (narrow) %v1342_v38, 72  ;;  %v401_v55 = vld [vmem:[%s4578_s26 + $0x6b0] sm:$0xff]  ;;  %v408_v38 = vld [vmem:[%s4578_s26 + $0x6e8] sm:$0xff] }
 0x183   : > { %v5081_v0 = vpop.f32.mrf.mxu1  ;;  %1818 = vxpose.xlu2.b32.cont [9/16] (narrow) %v1531_v31, 72 }
 0x185   : > { %1179 = vmatmul.f32.gmra.mxu2 %v397_v51  ;;  %v943_v25 = vpop.f32.mrf.mxu0 }
 0x186   : > { %4006 = vmatmul.msk.f32.gmra.mxu1 %vm463_vm0, %v4963_v46  ;;  %4068 = vmatmul.msk.f32.gmra.mxu3 %vm463_vm0, %v402_v30  ;;  %v1345_v13 = vadd.f32 %v1344_v12, %v943_v25 }
 0x188   : > { %v1132_v35 = vpop.f32.mrf.mxu2  ;;  %3219 = vxpose.xlu0.b32.cont [11/16] %v2909_v41, 128  ;;  %990 = vmatmul.f32.gmra.mxu0 %v271_v44  ;;  %v5114_v44 = vpop.trf.xlu0 }
 0x189   : > { %v1534_v15 = vadd.f32 %v1533_v33, %v1132_v35  ;;  %v1539_v58 = vpop.f32.mrf.mxu3  ;;  %1692 = vxpose.xlu1.b32.cont [11/16] (narrow) %v1345_v13, 72  ;;  %v279_v13 = vld [vmem:[%s4578_s26 + $0x2e0] sm:$0xff]  ;;  %v3100_v35 = vpop.trf.xlu2 }
 0x18b   : > { %v5089_v5 = vpop.f32.mrf.mxu1  ;;  %1819 = vxpose.xlu2.b32.cont [10/16] (narrow) %v1534_v15, 72  ;;  %v405_v15 = vld [vmem:[%s4578_s26 + $0x6d0] sm:$0xff] }
 0x18d   : > { %1182 = vmatmul.f32.gmra.mxu2 %v399_v47  ;;  %v946_v46 = vpop.f32.mrf.mxu0  ;;  %v2917_v47 = vand.u32 2147483647, %v279_v13 }
 0x18e   : > { %4007 = vmatmul.msk.f32.gmra.mxu1 %vm463_vm0, %v4976_v3  ;;  %4069 = vmatmul.msk.f32.gmra.mxu3 %vm463_vm0, %v404_v53  ;;  %v1348_v12 = vadd.f32 %v1347_v17, %v946_v46 }
 0x190   : > { %v1135_v9 = vpop.f32.mrf.mxu2  ;;  %3220 = vxpose.xlu0.b32.cont [12/16] %v2911_v26, 128  ;;  %993 = vmatmul.f32.gmra.mxu0 %v273_v37 }
 0x191   : > { %v1537_v34 = vadd.f32 %v1536_v42, %v1135_v9  ;;  %v1542_v39 = vpop.f32.mrf.mxu3  ;;  %1693 = vxpose.xlu1.b32.cont [12/16] (narrow) %v1348_v12, 72  ;;  %v3162_v42 = vpop.trf.xlu1 }
 0x192   : > { %v3618_v51 = vadd.f32 %v3162_v42, %v3161_v52  ;;  %v5125_v12 = vpop.trf.xlu0 }
 0x193   : > { %v5097_v48 = vpop.f32.mrf.mxu1  ;;  %1820 = vxpose.xlu2.b32.cont [11/16] (narrow) %v1537_v34, 72 }
 0x195   : > { %1185 = vmatmul.f32.gmra.mxu2 %v401_v55  ;;  %v949_v3 = vpop.f32.mrf.mxu0  ;;  %v3101_v55 = vpop.trf.xlu2 }
 0x196   : > { %4008 = vmatmul.msk.f32.gmra.mxu1 %vm463_vm0, %v4989_v28  ;;  %4070 = vmatmul.msk.f32.gmra.mxu3 %vm463_vm0, %v406_v21  ;;  %v1351_v17 = vadd.f32 %v1350_v62, %v949_v3  ;;  %v284_v28 = vld [vmem:[%s4578_s26 + $0x308] sm:$0xff]  ;;  %v2915_v62 = vand.u32 2147483647, %v277_v27 }
 0x197   : > { %v412_v3 = vld [vmem:[%s4578_s26 + $0x708] sm:$0xff] }
 0x198   : > { %v1138_v18 = vpop.f32.mrf.mxu2  ;;  %3221 = vxpose.xlu0.b32.cont [13/16] %v2913_v43, 128  ;;  %996 = vmatmul.f32.gmra.mxu0 %v275_v7  ;;  %v288_v43 = vld [vmem:[%s4578_s26 + $0x328] sm:$0xff] }
 0x199   : > { %v1540_v16 = vadd.f32 %v1539_v58, %v1138_v18  ;;  %v1545_v33 = vpop.f32.mrf.mxu3  ;;  %1694 = vxpose.xlu1.b32.cont [13/16] (narrow) %v1351_v17, 72  ;;  %v3595_v58 = vadd.f32 %v3594_v54, %v3100_v35  ;;  %v3163_v46 = vpop.trf.xlu1 }
 0x19a   : > { %v3619_v9 = vadd.f32 %v3618_v51, %v3163_v46  ;;  %v5144_v51 = vld [vmem:[%s4578_s26 + $0x300] sm:$0xff]  ;;  %v416_v46 = vld [vmem:[%s4578_s26 + $0x728] sm:$0xff] }
 0x19b   : > { %v5107_v49 = vpop.f32.mrf.mxu1  ;;  %1821 = vxpose.xlu2.b32.cont [12/16] (narrow) %v1540_v16, 72  ;;  %v3596_v18 = vadd.f32 %v3595_v58, %v3101_v55  ;;  %v5159_v55 = vld [vmem:[%s4578_s26 + $0x310] sm:$0xff] }
 0x19d   : > { %1188 = vmatmul.f32.gmra.mxu2 %v403_v22  ;;  %v952_v59 = vpop.f32.mrf.mxu0 }
 0x19e   : > { %4009 = vmatmul.msk.f32.gmra.mxu1 %vm463_vm0, %v284_v28  ;;  %4071 = vmatmul.msk.f32.gmra.mxu3 %vm463_vm0, %v408_v38  ;;  %v1354_v31 = vadd.f32 %v5081_v0, %v952_v59  ;;  %v286_v0 = vld [vmem:[%s4578_s26 + $0x318] sm:$0xff]  ;;  %v3102_v28 = vpop.trf.xlu2  ;;  %v409_v38 = vld [vmem:[%s4578_s26 + $0x6f0] sm:$0xff] }
 0x1a0   : > { %v1141_v30 = vpop.f32.mrf.mxu2  ;;  %3222 = vxpose.xlu0.b32.cont [14/16] %v2915_v62, 128  ;;  %999 = vmatmul.f32.gmra.mxu0 %v277_v27  ;;  %v3597_v62 = vadd.f32 %v3596_v18, %v3102_v28  ;;  %v418_v28 = vld [vmem:[%s4578_s26 + $0x738] sm:$0xff] }
 0x1a1   : > { %v1543_v41 = vadd.f32 %v1542_v39, %v1141_v30  ;;  %v1548_v25 = vpop.f32.mrf.mxu3  ;;  %1695 = vxpose.xlu1.b32.cont [14/16] (narrow) %v1354_v31, 72  ;;  %v3164_v16 = vpop.trf.xlu1  ;;  %v414_v31 = vld [vmem:[%s4578_s26 + $0x718] sm:$0xff]  ;;  %v4232_v30 = vld [vmem:[%s4578_s26 + $0x400] sm:$0xff] }
 0x1a2   : > { %v3620_v27 = vadd.f32 %v3619_v9, %v3164_v16  ;;  %v413_v16 = vld [vmem:[%s4578_s26 + $0x710] sm:$0xff] }
 0x1a3   : > { %v5118_v37 = vpop.f32.mrf.mxu1  ;;  %1822 = vxpose.xlu2.b32.cont [13/16] (narrow) %v1543_v41, 72  ;;  %v2953_v41 = vand.u32 2147483647, %v4232_v30 }
 0x1a5   : > { %1191 = vmatmul.f32.gmra.mxu2 %v405_v15  ;;  %v955_v53 = vpop.f32.mrf.mxu0 }
 0x1a6   : > { %4010 = vmatmul.msk.f32.gmra.mxu1 %vm463_vm0, %v286_v0  ;;  %4072 = vmatmul.msk.f32.gmra.mxu3 %vm463_vm0, %v410_v36  ;;  %v1357_v26 = vadd.f32 %v5089_v5, %v955_v53  ;;  %v2919_v5 = vand.u32 2147483647, %v281_v20  ;;  %v3103_v0 = vpop.trf.xlu2  ;;  %v411_v36 = vld [vmem:[%s4578_s26 + $0x700] sm:$0xff] }
 0x1a8   : > { %v1144_v34 = vpop.f32.mrf.mxu2  ;;  %3223 = vxpose.xlu0.b32.cont [15/16] %v2917_v47, 128  ;;  %1002 = vmatmul.f32.gmra.mxu0 %v279_v13  ;;  %v3598_v47 = vadd.f32 %v3597_v62, %v3103_v0  ;;  %v415_v0 = vld [vmem:[%s4578_s26 + $0x720] sm:$0xff] }
 0x1a9   : > { %v1546_v39 = vadd.f32 %v1545_v33, %v1144_v34  ;;  %v1551_v7 = vpop.f32.mrf.mxu3  ;;  %1696 = vxpose.xlu1.b32.cont [15/16] (narrow) %v1357_v26, 72  ;;  %v5136_v33 = vpop.trf.xlu0  ;;  %v292_v26 = vld [vmem:[%s4578_s26 + $0x348] sm:$0xff]  ;;  %v4233_v34 = vld [vmem:[%s4578_s26 + $0x410] sm:$0xff] }
 0x1ab   : > { %v5129_v21 = vpop.f32.mrf.mxu1  ;;  %1823 = vxpose.xlu2.b32.cont [14/16] (narrow) %v1546_v39, 72  ;;  %v2955_v39 = vand.u32 2147483647, %v4233_v34 }
 0x1ad   : > { %1194 = vmatmul.f32.gmra.mxu2 %v407_v45  ;;  %v958_v17 = vpop.f32.mrf.mxu0 }
 0x1ae   : > { %4011 = vmatmul.msk.f32.gmra.mxu1 %vm463_vm0, %v288_v43  ;;  %4073 = vmatmul.msk.f32.gmra.mxu3 %vm463_vm0, %v412_v3  ;;  %v1360_v52 = vadd.f32 %v5097_v48, %v958_v17  ;;  %v290_v48 = vld [vmem:[%s4578_s26 + $0x338] sm:$0xff]  ;;  %v3104_v18 = vpop.trf.xlu2 }
 0x1b0   : > { %v1147_v14 = vpop.f32.mrf.mxu2  ;;  %3224 = vxpose.xlu0.b32.end [16/16] %v2919_v5, 128  ;;  %1005 = vmatmul.f32.gmra.mxu0 %v281_v20 }
 0x1b1   : > { %v1549_v22 = vadd.f32 %v1548_v25, %v1147_v14  ;;  %v1554_v54 = vpop.f32.mrf.mxu3  ;;  %1697 = vxpose.xlu1.b32.end [16/16] (narrow) %v1360_v52, 72  ;;  %v3165_v25 = vpop.trf.xlu1 }
 0x1b2   : > { %v5149_v13 = vpop.trf.xlu0  ;;  %v3621_v9 = vadd.f32 %v3620_v27, %v3165_v25  ;;  %v3599_v27 = vadd.f32 %v3598_v47, %v3104_v18  ;;  %v296_v47 = vld [vmem:[%s4578_s26 + $0x368] sm:$0xff] }
 0x1b3   : > { %v5139_v59 = vpop.f32.mrf.mxu1  ;;  %1824 = vxpose.xlu2.b32.cont [15/16] (narrow) %v1549_v22, 72  ;;  %v294_v22 = vld [vmem:[%s4578_s26 + $0x358] sm:$0xff] }
 0x1b5   : > { %1197 = vmatmul.f32.gmra.mxu2 %v409_v38  ;;  %v961_v42 = vpop.f32.mrf.mxu0  ;;  %v4234_v38 = vld [vmem:[%s4578_s26 + $0x420] sm:$0xff] }
 0x1b6   : > { %4012 = vmatmul.msk.f32.gmra.mxu1 %vm463_vm0, %v290_v48  ;;  %4074 = vmatmul.msk.f32.gmra.mxu3 %vm463_vm0, %v414_v31  ;;  %v1363_v43 = vadd.f32 %v5107_v49, %v961_v42  ;;  %v2957_v62 = vand.u32 2147483647, %v4234_v38  ;;  %v5174_v48 = vld [vmem:[%s4578_s26 + $0x320] sm:$0xff] }
 0x1b8   : > { %v1150_v35 = vpop.f32.mrf.mxu2  ;;  %1008 = vmatmul.f32.gmra.mxu0 %v5144_v51 }
 0x1b9   : > { %v1552_v15 = vadd.f32 %v1551_v7, %v1150_v35  ;;  %v1557_v58 = vpop.f32.mrf.mxu3  ;;  %3337 = vxpose.xlu1.b32.start [1/16] %v2953_v41, 128  ;;  %v3166_v7 = vpop.trf.xlu1 }
 0x1ba   : > { %v5163_v45 = vpop.trf.xlu0  ;;  %v3622_v3 = vadd.f32 %v3621_v9, %v3166_v7 }
 0x1bb   : > { %v5153_v53 = vpop.f32.mrf.mxu1  ;;  %1825 = vxpose.xlu2.b32.end [16/16] (narrow) %v1552_v15, 72  ;;  %v3105_v15 = vpop.trf.xlu2 }
 0x1bd   : > { %1200 = vmatmul.f32.gmra.mxu2 %v411_v36  ;;  %v964_v20 = vpop.f32.mrf.mxu0 }
 0x1be   : > { %4013 = vmatmul.msk.f32.gmra.mxu1 %vm463_vm0, %v292_v26  ;;  %4075 = vmatmul.msk.f32.gmra.mxu3 %vm463_vm0, %v416_v46  ;;  %v1366_v42 = vadd.f32 %v5118_v37, %v964_v20  ;;  %v420_v26 = vld [vmem:[%s4578_s26 + $0x748] sm:$0xff]  ;;  %v2067_v46 = vmax.f32 %v5149_v13, %v5163_v45  ;;  %v4235_v37 = vld [vmem:[%s4578_s26 + $0x430] sm:$0xff] }
 0x1bf   : > { %v2959_v9 = vand.u32 2147483647, %v4235_v37 }
 0x1c0   : > { %v1153_v5 = vpop.f32.mrf.mxu2  ;;  %1011 = vmatmul.f32.gmra.mxu0 %v5159_v55 }
 0x1c1   : > { %v1560_v17 = vpop.f32.mrf.mxu3  ;;  %v1555_v52 = vadd.f32 %v1554_v54, %v1153_v5  ;;  %3338 = vxpose.xlu1.b32.cont [2/16] %v2955_v39, 128  ;;  %v3167_v54 = vpop.trf.xlu1  ;;  %v5191_v39 = vld [vmem:[%s4578_s26 + $0x330] sm:$0xff] }
 0x1c2   : > { %v5178_v31 = vpop.trf.xlu0  ;;  %v3623_v30 = vadd.f32 %v3622_v3, %v3167_v54  ;;  %v4236_v54 = vld [vmem:[%s4578_s26 + $0x440] sm:$0xff] }
 0x1c3   : > { %v5168_v14 = vpop.f32.mrf.mxu1  ;;  %1842 = vxpose.xlu0.b32.start [1/16] (narrow) %v1555_v52, 72  ;;  %1714 = vxpose.xlu2.b32.start [1/16] (narrow) %v1363_v43, 72  ;;  %v2068_v3 = vmax.f32 %v2067_v46, %v5178_v31 }
 0x1c5   : > { %1203 = vmatmul.f32.gmra.mxu2 %v413_v16  ;;  %v967_v49 = vpop.f32.mrf.mxu0 }
 0x1c6   : > { %4014 = vmatmul.msk.f32.gmra.mxu1 %vm463_vm0, %v294_v22  ;;  %4076 = vmatmul.msk.f32.gmra.mxu3 %vm463_vm0, %v418_v28  ;;  %v1369_v43 = vadd.f32 %v5129_v21, %v967_v49  ;;  %v3106_v22 = vpop.trf.xlu2  ;;  %v422_v21 = vld [vmem:[%s4578_s26 + $0x758] sm:$0xff] }
 0x1c8   : > { %v1156_v41 = vpop.f32.mrf.mxu2  ;;  %1014 = vmatmul.f32.gmra.mxu0 %v5174_v48 }
 0x1c9   : > { %v1558_v25 = vadd.f32 %v1557_v58, %v1156_v41  ;;  %v1563_v35 = vpop.f32.mrf.mxu3  ;;  %3339 = vxpose.xlu1.b32.cont [3/16] %v2957_v62, 128  ;;  %v3600_v58 = vadd.f32 %v3599_v27, %v3105_v15  ;;  %v3168_v20 = vpop.trf.xlu1  ;;  %v417_v27 = vld [vmem:[%s4578_s26 + $0x730] sm:$0xff]  ;;  %v298_v62 = vld [vmem:[%s4578_s26 + $0x378] sm:$0xff] }
 0x1ca   : > { %v5195_v7 = vpop.trf.xlu0  ;;  %v3624_v5 = vadd.f32 %v3623_v30, %v3168_v20 }
 0x1cb   : > { %v5183_v36 = vpop.f32.mrf.mxu1  ;;  %1843 = vxpose.xlu0.b32.cont [2/16] (narrow) %v1558_v25, 72  ;;  %1715 = vxpose.xlu2.b32.cont [2/16] (narrow) %v1366_v42, 72  ;;  %v3601_v28 = vadd.f32 %v3600_v58, %v3106_v22  ;;  %v2069_v49 = vmax.f32 %v2068_v3, %v5195_v7  ;;  %v2961_v42 = vand.u32 2147483647, %v4236_v54  ;;  %v419_v58 = vld [vmem:[%s4578_s26 + $0x740] sm:$0xff]  ;;  %v300_v3 = vld [vmem:[%s4578_s26 + $0x388] sm:$0xff] }
 0x1cd   : > { %1206 = vmatmul.f32.gmra.mxu2 %v415_v0  ;;  %v970_v34 = vpop.f32.mrf.mxu0 }
 0x1ce   : > { %4015 = vmatmul.msk.f32.gmra.mxu1 %vm463_vm0, %v296_v47  ;;  %4077 = vmatmul.msk.f32.gmra.mxu3 %vm463_vm0, %v420_v26  ;;  %v1372_v15 = vadd.f32 %v5139_v59, %v970_v34  ;;  %v424_v59 = vld [vmem:[%s4578_s26 + $0x768] sm:$0xff]  ;;  %v4237_v34 = vld [vmem:[%s4578_s26 + $0x450] sm:$0xff] }
 0x1d0   : > { %v1159_v52 = vpop.f32.mrf.mxu2  ;;  %1017 = vmatmul.f32.gmra.mxu0 %v5191_v39 }
 0x1d1   : > { %v1561_v18 = vadd.f32 %v1560_v17, %v1159_v52  ;;  %v1566_v16 = vpop.f32.mrf.mxu3  ;;  %3340 = vxpose.xlu1.b32.cont [4/16] %v2959_v9, 128  ;;  %v5208_v17 = vld [vmem:[%s4578_s26 + $0x340] sm:$0xff]  ;;  %v3169_v41 = vpop.trf.xlu1 }
 0x1d2   : > { %v5212_v25 = vpop.trf.xlu0  ;;  %v3625_v0 = vadd.f32 %v3624_v5, %v3169_v41  ;;  %v3107_v9 = vpop.trf.xlu2  ;;  %v2963_v5 = vand.u32 2147483647, %v4237_v34  ;;  %v421_v41 = vld [vmem:[%s4578_s26 + $0x750] sm:$0xff] }
 0x1d3   : > { %v5201_v38 = vpop.f32.mrf.mxu1  ;;  %1844 = vxpose.xlu0.b32.cont [3/16] (narrow) %v1561_v18, 72  ;;  %1716 = vxpose.xlu2.b32.cont [3/16] (narrow) %v1369_v43, 72  ;;  %v2070_v47 = vmax.f32 %v2069_v49, %v5212_v25  ;;  %v3602_v20 = vadd.f32 %v3601_v28, %v3107_v9  ;;  %v5224_v18 = vld [vmem:[%s4578_s26 + $0x350] sm:$0xff]  ;;  %v5240_v9 = vld [vmem:[%s4578_s26 + $0x360] sm:$0xff] }
 0x1d5   : > { %1209 = vmatmul.f32.gmra.mxu2 %v417_v27  ;;  %v973_v30 = vpop.f32.mrf.mxu0 }
 0x1d6   : > { %4016 = vmatmul.msk.f32.gmra.mxu1 %vm463_vm0, %v298_v62  ;;  %4078 = vmatmul.msk.f32.gmra.mxu3 %vm463_vm0, %v422_v21  ;;  %v1375_v27 = vadd.f32 %v5153_v53, %v973_v30  ;;  %v426_v53 = vld [vmem:[%s4578_s26 + $0x778] sm:$0xff]  ;;  %v4238_v30 = vld [vmem:[%s4578_s26 + $0x460] sm:$0xff] }
 0x1d8   : > { %v1162_v26 = vpop.f32.mrf.mxu2  ;;  %1020 = vmatmul.f32.gmra.mxu0 %v5208_v17 }
 0x1d9   : > { %v1564_v46 = vadd.f32 %v1563_v35, %v1162_v26  ;;  %v1569_v37 = vpop.f32.mrf.mxu3  ;;  %3341 = vxpose.xlu1.b32.cont [5/16] %v2961_v42, 128  ;;  %v3170_v35 = vpop.trf.xlu1 }
 0x1da   : > { %v5228_v22 = vpop.trf.xlu0  ;;  %v3626_v28 = vadd.f32 %v3625_v0, %v3170_v35  ;;  %v3108_v42 = vpop.trf.xlu2  ;;  %v2965_v0 = vand.u32 2147483647, %v4238_v30 }
 0x1db   : > { %v5218_v43 = vpop.f32.mrf.mxu1  ;;  %1845 = vxpose.xlu0.b32.cont [4/16] (narrow) %v1564_v46, 72  ;;  %1717 = vxpose.xlu2.b32.cont [4/16] (narrow) %v1372_v15, 72  ;;  %v2071_v62 = vmax.f32 %v2070_v47, %v5228_v22  ;;  %v3603_v15 = vadd.f32 %v3602_v20, %v3108_v42  ;;  %v302_v46 = vld [vmem:[%s4578_s26 + $0x398] sm:$0xff] }
 0x1dd   : > { %1212 = vmatmul.f32.gmra.mxu2 %v419_v58  ;;  %v976_v52 = vpop.f32.mrf.mxu0 }
 0x1de   : > { %4017 = vmatmul.msk.f32.gmra.mxu1 %vm463_vm0, %v300_v3  ;;  %4079 = vmatmul.msk.f32.gmra.mxu3 %vm463_vm0, %v424_v59  ;;  %v1378_v20 = vadd.f32 %v5168_v14, %v976_v52  ;;  %v304_v14 = vld [vmem:[%s4578_s26 + $0x3a8] sm:$0xff] }
 0x1df   : > { %v428_v52 = vld [vmem:[%s4578_s26 + $0x788] sm:$0xff] }
 0x1e0   : > { %v1165_v21 = vpop.f32.mrf.mxu2  ;;  %1023 = vmatmul.f32.gmra.mxu0 %v5224_v18 }
 0x1e1   : > { %v1567_v49 = vadd.f32 %v1566_v16, %v1165_v21  ;;  %v1572_v54 = vpop.f32.mrf.mxu3  ;;  %3342 = vxpose.xlu1.b32.cont [6/16] %v2963_v5, 128  ;;  %v3171_v16 = vpop.trf.xlu1  ;;  %v423_v21 = vld [vmem:[%s4578_s26 + $0x760] sm:$0xff] }
 0x1e2   : > { %v5244_v58 = vpop.trf.xlu0  ;;  %v3627_v3 = vadd.f32 %v3626_v28, %v3171_v16  ;;  %v4239_v28 = vld [vmem:[%s4578_s26 + $0x470] sm:$0xff] }
 0x1e3   : > { %v5234_v26 = vpop.f32.mrf.mxu1  ;;  %1846 = vxpose.xlu0.b32.cont [5/16] (narrow) %v1567_v49, 72  ;;  %1718 = vxpose.xlu2.b32.cont [5/16] (narrow) %v1375_v27, 72  ;;  %v5248_v59 = vmax.f32 %v2071_v62, %v5244_v58  ;;  %v3109_v27 = vpop.trf.xlu2 }
 0x1e4   : > { %v3604_v49 = vadd.f32 %v3603_v15, %v3109_v27  ;;  %v425_v27 = vld [vmem:[%s4578_s26 + $0x770] sm:$0xff] }
 0x1e5   : > { %1215 = vmatmul.f32.gmra.mxu2 %v421_v41  ;;  %v979_v47 = vpop.f32.mrf.mxu0  ;;  %v2967_v41 = vand.u32 2147483647, %v4239_v28  ;;  %v5277_v28 = vld [vmem:[%s4578_s26 + $0x380] sm:$0xff] }
 0x1e6   : > { %4018 = vmatmul.msk.f32.gmra.mxu1 %vm463_vm0, %v302_v46  ;;  %4080 = vmatmul.msk.f32.gmra.mxu3 %vm463_vm0, %v426_v53  ;;  %v5258_v46 = vld [vmem:[%s4578_s26 + $0x370] sm:$0xff]  ;;  %v1381_v53 = vadd.f32 %v5183_v36, %v979_v47  ;;  %v306_v36 = vld [vmem:[%s4578_s26 + $0x3b8] sm:$0xff] }
 0x1e7   : > { %v430_v47 = vld [vmem:[%s4578_s26 + $0x798] sm:$0xff] }
 0x1e8   : > { %v1168_v34 = vpop.f32.mrf.mxu2  ;;  %1026 = vmatmul.f32.gmra.mxu0 %v5240_v9 }
 0x1e9   : > { %v1570_v5 = vadd.f32 %v1569_v37, %v1168_v34  ;;  %v1575_v35 = vpop.f32.mrf.mxu3  ;;  %3343 = vxpose.xlu1.b32.cont [7/16] %v2965_v0, 128  ;;  %v3172_v37 = vpop.trf.xlu1 }
 0x1ea   : > { %v5262_v15 = vpop.trf.xlu0  ;;  %v3628_v30 = vadd.f32 %v3627_v3, %v3172_v37  ;;  %v4240_v3 = vld [vmem:[%s4578_s26 + $0x480] sm:$0xff] }
 0x1eb   : > { %v5252_v42 = vpop.f32.mrf.mxu1  ;;  %1847 = vxpose.xlu0.b32.cont [6/16] (narrow) %v1570_v5, 72  ;;  %1719 = vxpose.xlu2.b32.cont [6/16] (narrow) %v1378_v20, 72  ;;  %v2073_v0 = vmax.f32 %v5248_v59, %v5262_v15  ;;  %v3110_v5 = vpop.trf.xlu2 }
 0x1ed   : > { %1218 = vmatmul.f32.gmra.mxu2 %v423_v21  ;;  %v982_v62 = vpop.f32.mrf.mxu0  ;;  %v5269_v21 = vadd.f32 %v3604_v49, %v3110_v5  ;;  %v1906_v49 = vlaneseq }
 0x1ee   : > { %4019 = vmatmul.msk.f32.gmra.mxu1 %vm463_vm0, %v304_v14  ;;  %4081 = vmatmul.msk.f32.gmra.mxu3 %vm463_vm0, %v428_v52  ;;  %v2969_v52 = vand.u32 2147483647, %v4240_v3 }
 0x1f0   : > { %v1171_v16 = vpop.f32.mrf.mxu2  ;;  %1029 = vmatmul.f32.gmra.mxu0 %v5258_v46 }
 0x1f1   : > { %v1573_v20 = vadd.f32 %v1572_v54, %v1171_v16  ;;  %v1578_v34 = vpop.f32.mrf.mxu3  ;;  %3344 = vxpose.xlu1.b32.cont [8/16] %v2967_v41, 128  ;;  %v3173_v54 = vpop.trf.xlu1  ;;  %v1384_v41 = vadd.f32 %v5201_v38, %v982_v62  ;;  %v308_v38 = vld [vmem:[%s4578_s26 + $0x3c8] sm:$0xff] }
 0x1f2   : > { %v5282_v37 = vadd.f32 %v3628_v30, %v3173_v54  ;;  %v432_v62 = vld [vmem:[%s4578_s26 + $0x7a8] sm:$0xff]  ;;  %v4241_v54 = vld [vmem:[%s4578_s26 + $0x490] sm:$0xff] }
 0x1f3   : > { %v5271_v14 = vpop.f32.mrf.mxu1  ;;  %1848 = vxpose.xlu0.b32.cont [7/16] (narrow) %v1573_v20, 72  ;;  %1720 = vxpose.xlu2.b32.cont [7/16] (narrow) %v1381_v53, 72  ;;  %v1674_v53 = vpop.trf.xlu0  ;;  %v5285_v20 = vshrl.u32 %v1906_v49, 7  ;;  %v2971_v4 = vand.u32 2147483647, %v4241_v54 }
 0x1f5   : > { %1221 = vmatmul.f32.gmra.mxu2 %v425_v27  ;;  %v985_v59 = vpop.f32.mrf.mxu0  ;;  %v5295_v30 = vadd.s32 64, %v5285_v20 }
 0x1f6   : > { %4020 = vmatmul.msk.f32.gmra.mxu1 %vm463_vm0, %v306_v36  ;;  %4082 = vmatmul.msk.f32.gmra.mxu3 %vm463_vm0, %v430_v47  ;;  %v427_v36 = vld [vmem:[%s4578_s26 + $0x780] sm:$0xff]  ;;  %v5288_v47 = vpop.trf.xlu2 }
 0x1f7   : > { %vm1931_vm1 = vcmp.lt.s32.totalorder %v5295_v30, 69  ;;  %v3606_v40 = vadd.f32 %v5269_v21, %v5288_v47 }
 0x1f8   : > { %v1174_v16 = vpop.f32.mrf.mxu2  ;;  %1032 = vmatmul.f32.gmra.mxu0 %v5277_v28 }
 0x1f9   : > { %v1576_v5 = vadd.f32 %v1575_v35, %v1174_v16  ;;  %v1581_v27 = vpop.f32.mrf.mxu3  ;;  %3345 = vxpose.xlu1.b32.cont [9/16] %v2969_v52, 128  ;;  %v5299_v35 = vld [vmem:[%s4578_s26 + $0x390] sm:$0xff]  ;;  %v5306_v52 = vsel %vm1931_vm1, %v1674_v53, -inf }
 0x1fa   : > { %v2074_v16 = vmax.f32 %v2073_v0, %v5306_v52  ;;  %v429_v53 = vld [vmem:[%s4578_s26 + $0x790] sm:$0xff]  ;;  %v310_v0 = vld [vmem:[%s4578_s26 + $0x3d8] sm:$0xff] }
 0x1fb   : > { %v5290_v3 = vpop.f32.mrf.mxu1  ;;  %1849 = vxpose.xlu0.b32.cont [8/16] (narrow) %v1576_v5, 72  ;;  %1721 = vxpose.xlu2.b32.cont [8/16] (narrow) %v1384_v41, 72  ;;  %v1387_v41 = vadd.f32 %v5218_v43, %v985_v59  ;;  %v5313_v8 = vpop.trf.xlu0  ;;  %v434_v59 = vld [vmem:[%s4578_s26 + $0x7b8] sm:$0xff] }
 0x1fd   : > { %1224 = vmatmul.f32.gmra.mxu2 %v427_v36  ;;  %v988_v49 = vpop.f32.mrf.mxu0  ;;  %v5311_v36 = vpop.trf.xlu1 }
 0x1fe   : > { %4021 = vmatmul.msk.f32.gmra.mxu1 %vm463_vm0, %v308_v38  ;;  %4083 = vmatmul.msk.f32.gmra.mxu3 %vm463_vm0, %v432_v62  ;;  %v2082_v62 = vrot.slane %v2074_v16, 4  ;;  %v5316_v63 = vpop.trf.xlu2  ;;  %v1390_v32 = vadd.f32 %v5234_v26, %v988_v49  ;;  %v436_v49 = vld [vmem:[%s4578_s26 + $0x7c8] sm:$0xff] }
 0x1ff   : > { %v3607_v47 = vadd.f32 %v3606_v40, %v5316_v63 }
 0x200   : > { %v1177_v5 = vpop.f32.mrf.mxu2  ;;  %1035 = vmatmul.f32.gmra.mxu0 %v5299_v35  ;;  %v2083_v1 = vmax.f32 %v2074_v16, %v2082_v62 }
 0x201   : > { %v1579_v54 = vadd.f32 %v1578_v34, %v1177_v5  ;;  %v1584_v38 = vpop.f32.mrf.mxu3  ;;  %3346 = vxpose.xlu1.b32.cont [10/16] %v2971_v4, 128  ;;  %v5324_v5 = vld [vmem:[%s4578_s26 + $0x3a0] sm:$0xff]  ;;  %v3608_v40 = vadd.f32 %v3607_v47, %v5103_v19 }
 0x202   : > { %v2084_v4 = vrot.slane %v2083_v1, 2 }
 0x203   : > { %v5318_v43 = vpop.f32.mrf.mxu1  ;;  %1850 = vxpose.xlu0.b32.cont [9/16] (narrow) %v1579_v54, 72  ;;  %1722 = vxpose.xlu2.b32.cont [9/16] (narrow) %v1387_v41, 72  ;;  %v5334_v57 = vpop.trf.xlu0 }
 0x204   : > { %v2085_v41 = vmax.f32 %v2083_v1, %v2084_v4  ;;  %v312_v1 = vld [vmem:[%s4578_s26 + $0x3e8] sm:$0xff] }
 0x205   : > { %1227 = vmatmul.f32.gmra.mxu2 %v429_v53  ;;  %v991_v34 = vpop.f32.mrf.mxu0  ;;  %v5330_v23 = vpop.trf.xlu1 }
 0x206   : > { %4022 = vmatmul.msk.f32.gmra.mxu1 %vm463_vm0, %v310_v0  ;;  %4084 = vmatmul.msk.f32.gmra.mxu3 %vm463_vm0, %v434_v59  ;;  %v2086_v53 = vrot.slane %v2085_v41, 1  ;;  %v431_v0 = vld [vmem:[%s4578_s26 + $0x7a0] sm:$0xff]  ;;  %v5337_v59 = vpop.trf.xlu2 }
 0x208   : > { %v1180_v54 = vpop.f32.mrf.mxu2  ;;  %1038 = vmatmul.f32.gmra.mxu0 %v5324_v5  ;;  %v5343_v4 = vmax.f32 %v2085_v41, %v2086_v53 }
 0x209   : > { %v1582_v16 = vadd.f32 %v1581_v27, %v1180_v54  ;;  %v5332_v62 = vpop.f32.mrf.mxu3  ;;  %3347 = vxpose.xlu1.b32.cont [11/16] %v2973_v2, 128  ;;  %v2975_v27 = vand.u32 2147483647, %v4243_v6  ;;  %v5353_v54 = vld [vmem:[%s4578_s26 + $0x3b0] sm:$0xff]  ;;  %v1393_v6 = vadd.f32 %v5252_v42, %v991_v34 }
 0x20a   : > { %vm2235_vm2 = vcmp.eq.f32.partialorder %v5149_v13, %v5343_v4  ;;  %vm2243_vm3 = vcmp.eq.f32.partialorder %v5163_v45, %v5343_v4  ;;  %vm2259_vm4 = vcmp.eq.f32.partialorder %v5195_v7, %v5343_v4  ;;  %vm2267_vm5 = vcmp.eq.f32.partialorder %v5212_v25, %v5343_v4 }
 0x20b   : > { %v5339_v26 = vpop.f32.mrf.mxu1  ;;  %1851 = vxpose.xlu0.b32.cont [10/16] (narrow) %v1582_v16, 72  ;;  %1723 = vxpose.xlu2.b32.cont [10/16] (narrow) %v1390_v32, 72  ;;  %v5358_v32 = vadd.s32 8, %v5285_v20  ;;  %vm2275_vm6 = vcmp.eq.f32.partialorder %v5228_v22, %v5343_v4  ;;  %vm2283_vm7 = vcmp.eq.f32.partialorder %v5244_v58, %v5343_v4  ;;  %vm2251_vm8 = vcmp.eq.f32.partialorder %v5178_v31, %v5343_v4 }
 0x20c   : > { %vm2291_vm9 = vcmp.eq.f32.partialorder %v5262_v15, %v5343_v4  ;;  %vm2299_vm10 = vcmp.eq.f32.partialorder %v5306_v52, %v5343_v4  ;;  %v5374_v16 = vadd.s32 16, %v5285_v20  ;;  %v2363_v53 = vsel %vm2235_vm2, %v5285_v20, 69 }
 0x20d   : > { %1230 = vmatmul.f32.gmra.mxu2 %v431_v0  ;;  %v994_v2 = vpop.f32.mrf.mxu0  ;;  %v2371_v31 = vsel %vm2243_vm3, %v5358_v32, 69  ;;  %v3176_v42 = vpop.trf.xlu1  ;;  %v5389_v13 = vadd.s32 24, %v5285_v20  ;;  %v5416_v7 = vadd.s32 40, %v5285_v20  ;;  %vm4089_vm2 = vcmp.eq.f32.partialorder %v5343_v4, -inf }
 0x20e   : > { %4023 = vmatmul.msk.f32.gmra.mxu1 %vm463_vm0, %v312_v1  ;;  %4085 = vmatmul.msk.f32.gmra.mxu3 %vm463_vm0, %v436_v49  ;;  %v3227_v1 = vpop.trf.xlu0  ;;  %v433_v49 = vld [vmem:[%s4578_s26 + $0x7b0] sm:$0xff]  ;;  %v2379_v50 = vsel %vm2251_vm8, %v5374_v16, 69  ;;  %v5392_v29 = vpop.trf.xlu2  ;;  %vm2491_vm11 = vcmp.lt.s32.totalorder %v2363_v53, %v2371_v31  ;;  %v2427_v15 = vsel %vm2299_vm10, %v5295_v30, 69 }
 0x20f   : > { %v2492_v56 = vsel %vm2491_vm11, %v2363_v53, %v2371_v31  ;;  %v5428_v53 = vadd.s32 48, %v5285_v20  ;;  %v2403_v25 = vsel %vm2275_vm6, %v5416_v7, 69 }
 0x210   : > { %v1183_v41 = vpop.f32.mrf.mxu2  ;;  %1041 = vmatmul.f32.gmra.mxu0 %v5353_v54  ;;  %vm2493_vm12 = vcmp.lt.s32.totalorder %v2492_v56, %v2379_v50 }
 0x211   : > { %v1585_v34 = vadd.f32 %v1584_v38, %v1183_v41  ;;  %v5385_v0 = vpop.f32.mrf.mxu3  ;;  %3348 = vxpose.xlu1.b32.cont [12/16] %v2975_v27, 128  ;;  %v438_v38 = vld [vmem:[%s4578_s26 + $0x7d8] sm:$0xff]  ;;  %v5399_v27 = vadd.s32 32, %v5285_v20  ;;  %v2387_v41 = vsel %vm2259_vm4, %v5389_v13, 69  ;;  %v2494_v21 = vsel %vm2493_vm12, %v2492_v56, %v2379_v50 }
 0x212   : > { %vm2495_vm13 = vcmp.lt.s32.totalorder %v2494_v21, %v2387_v41  ;;  %v2411_v19 = vsel %vm2283_vm7, %v5428_v53, 69  ;;  %vm2810_vm12 = vcmask 1040384  }
 0x213   : > { %v5394_v45 = vpop.f32.mrf.mxu1  ;;  %1852 = vxpose.xlu0.b32.cont [11/16] (narrow) %v1585_v34, 72  ;;  %1724 = vxpose.xlu2.b32.cont [11/16] (narrow) %v1393_v6, 72  ;;  %v3630_v6 = vadd.f32 %v5282_v37, %v5311_v36  ;;  %v2395_v24 = vsel %vm2267_vm5, %v5399_v27, 69  ;;  %v1396_v37 = vadd.f32 %v5271_v14, %v994_v2  ;;  %v2496_v56 = vsel %vm2495_vm13, %v2494_v21, %v2387_v41 }
 0x214   : > { %vm2497_vm14 = vcmp.lt.s32.totalorder %v2496_v56, %v2395_v24  ;;  %v5442_v2 = vadd.s32 56, %v5285_v20 }
 0x215   : > { %1233 = vmatmul.f32.gmra.mxu2 %v433_v49  ;;  %v997_v34 = vpop.f32.mrf.mxu0  ;;  %v3631_v36 = vadd.f32 %v3630_v6, %v5330_v23  ;;  %v5436_v63 = vpop.trf.xlu1  ;;  %v2498_v31 = vsel %vm2497_vm14, %v2496_v56, %v2395_v24  ;;  %v435_v49 = vld [vmem:[%s4578_s26 + $0x7c0] sm:$0xff] }
 0x216   : > { %4024 = vmatmul.msk.f32.gmra.mxu1 %vm463_vm0, %v314_v11  ;;  %4086 = vmatmul.msk.f32.gmra.mxu3 %vm463_vm0, %v438_v38  ;;  %v3643_v11 = vadd.f32 %v5334_v57, %v5313_v8  ;;  %6589 = vst [vmem:[#allocation27_spill] sm:$0xff] %v5436_v63  ;;  %v3228_v23 = vpop.trf.xlu0  ;;  %v3195_v38 = vpop.trf.xlu2  ;;  %vm2499_vm15 = vcmp.lt.s32.totalorder %v2498_v31, %v2403_v25  ;;  %v2419_v58 = vsel %vm2291_vm9, %v5442_v2, 69 }
 0x217   : > { %v3632_v14 = vadd.f32 %v3631_v36, %v3176_v42  ;;  %v5453_v42 = vld [vmem:[%s4578_s26 + $0x408] sm:$0xff]  ;;  %v2500_v24 = vsel %vm2499_vm15, %v2498_v31, %v2403_v25  ;;  %v1399_v56 = vadd.f32 %v5290_v3, %v997_v34 }
 0x218   : > { %v1186_v50 = vpop.f32.mrf.mxu2  ;;  %1044 = vmatmul.f32.gmra.mxu0 %v5411_v61  ;;  %v3644_v22 = vadd.f32 %v3643_v11, %v3227_v1  ;;  %6590 = vst [vmem:[#allocation28_spill] sm:$0xff] %v5453_v42  ;;  %v440_v1 = vld [vmem:[%s4578_s26 + $0x7e8] sm:$0xff]  ;;  %vm2501_vm3 = vcmp.lt.s32.totalorder %v2500_v24, %v2411_v19 }
 0x219   : > { %v1588_v57 = vadd.f32 %v5332_v62, %v1186_v50  ;;  %v5439_v8 = vpop.f32.mrf.mxu3  ;;  %3349 = vxpose.xlu1.b32.cont [13/16] %v2977_v10, 128  ;;  %v3609_v62 = vadd.f32 %v3608_v40, %v5114_v44  ;;  %v3633_v41 = vadd.f32 %v3632_v14, %v5337_v59  ;;  %v4245_v44 = vld [vmem:[%s4578_s26 + $0x4d0] sm:$0xff]  ;;  %v5468_v59 = vadd.s32 72, %v5285_v20 }
 0x21a   : > { %v3645_v6 = vadd.f32 %v3644_v22, %v3228_v23  ;;  %v2979_v21 = vand.u32 2147483647, %v4245_v44  ;;  %v2502_v11 = vsel %vm2501_vm3, %v2500_v24, %v2411_v19  ;;  %v5480_v50 = vadd.s32 80, %v5285_v20  ;;  %v4246_v44 = vld [vmem:[%s4578_s26 + $0x4e0] sm:$0xff] }
 0x21b   : > { %v5450_v10 = vpop.f32.mrf.mxu1  ;;  %1853 = vxpose.xlu0.b32.cont [12/16] (narrow) %v1588_v57, 72  ;;  %1725 = vxpose.xlu2.b32.cont [12/16] (narrow) %v1396_v37, 72  ;;  %v5464_v37 = vld [vmem:[%s4578_s26 + $0x3d0] sm:$0xff]  ;;  %v3634_v36 = vadd.f32 %v3633_v41, %v5392_v29  ;;  %v3610_v25 = vadd.f32 %v3609_v62, %v5125_v12  ;;  %vm2503_vm4 = vcmp.lt.s32.totalorder %v2502_v11, %v2419_v58  ;;  %v2435_v52 = vsel %vm4089_vm2, %v5468_v59, 69 }
 0x21c   : > { %6591 = vst [vmem:[#allocation29_spill] sm:$0xff] %v5464_v37  ;;  %v2504_v40 = vsel %vm2503_vm4, %v2502_v11, %v2419_v58  ;;  %v5492_v22 = vadd.s32 88, %v5285_v20  ;;  %v2443_v23 = vsel %vm4089_vm2, %v5480_v50, 69  ;;  %v5504_v41 = vadd.s32 96, %v5285_v20  ;;  %v5516_v11 = vld [vmem:[%s4578_s26 + $0x3e0] sm:$0xff] }
 0x21d   : > { %1236 = vmatmul.f32.gmra.mxu2 %v435_v49  ;;  %v1000_v47 = vpop.f32.mrf.mxu0  ;;  %v3635_v29 = vadd.f32 %v3634_v36, %v3195_v38  ;;  %v5486_v14 = vpop.trf.xlu1  ;;  %vm2505_vm5 = vcmp.lt.s32.totalorder %v2504_v40, %v2427_v15  ;;  %v3611_v31 = vadd.f32 %v3610_v25, %v5136_v33  ;;  %v437_v49 = vld [vmem:[%s4578_s26 + $0x7d0] sm:$0xff]  ;;  %v442_v38 = vld [vmem:[%s4578_s26 + $0x7f8] sm:$0xff]  ;;  %v2981_v33 = vand.u32 2147483647, %v4246_v44  ;;  %6594 = vst [vmem:[#allocation32_spill] sm:$0xff] %v5516_v11 }
 0x21e   : > { %4025 = vmatmul.msk.f32.gmra.mxu1 %vm463_vm0, %v5453_v42  ;;  %4087 = vmatmul.msk.f32.gmra.mxu3 %vm463_vm0, %v440_v1  ;;  %6592 = vst [vmem:[#allocation30_spill] sm:$0xff] %v5486_v14  ;;  %v3229_v34 = vpop.trf.xlu0  ;;  %v2506_v19 = vsel %vm2505_vm5, %v2504_v40, %v2427_v15  ;;  %v3196_v62 = vpop.trf.xlu2  ;;  %v2451_v58 = vsel %vm4089_vm2, %v5492_v22, 69  ;;  %v4247_v14 = vld [vmem:[%s4578_s26 + $0x4f0] sm:$0xff] }
 0x21f   : > { %vm2507_vm6 = vcmp.lt.s32.totalorder %v2506_v19, %v2435_v52  ;;  %v3636_v1 = vadd.f32 %v3635_v29, %v3196_v62  ;;  %v3612_v40 = vrot.slane %v3611_v31, 4  ;;  %v2983_v63 = vand.u32 2147483647, %v4247_v14 }
 0x220   : > { %v1189_v57 = vpop.f32.mrf.mxu2  ;;  %1047 = vmatmul.f32.gmra.mxu0 %v5464_v37  ;;  %v2508_v24 = vsel %vm2507_vm6, %v2506_v19, %v2435_v52  ;;  %v3646_v52 = vadd.f32 %v3645_v6, %v3229_v34  ;;  %v5526_v19 = vadd.s32 112, %v5285_v20  ;;  %v5535_v6 = vadd.s32 120, %v5285_v20 }
 0x221   : > { %v1591_v12 = vadd.f32 %v5385_v0, %v1189_v57  ;;  %v5489_v3 = vpop.f32.mrf.mxu3  ;;  %3350 = vxpose.xlu1.b32.cont [14/16] %v2979_v21, 128  ;;  %v5500_v0 = vld [vmem:[%s4578_s26 + $0x418] sm:$0xff]  ;;  %v5511_v21 = vadd.s32 104, %v5285_v20  ;;  %vm2509_vm7 = vcmp.lt.s32.totalorder %v2508_v24, %v2443_v23  ;;  %v3637_v25 = vrot.slane %v3636_v1, 4 }
 0x222   : > { %6593 = vst [vmem:[#allocation31_spill] sm:$0xff] %v5500_v0  ;;  %v2510_v29 = vsel %vm2509_vm7, %v2508_v24, %v2443_v23  ;;  %v1402_v57 = vadd.f32 %v5318_v43, %v1000_v47  ;;  %v3613_v44 = vadd.f32 %v3612_v40, %v3611_v31 }
 0x223   : > { %1854 = vxpose.xlu0.b32.cont [13/16] (narrow) %v1591_v12, 72  ;;  %1726 = vxpose.xlu2.b32.cont [13/16] (narrow) %v1399_v56, 72  ;;  %v5513_v36 = vpop.f32.mrf.mxu1  ;;  %v2459_v56 = vsel %vm4089_vm2, %v5504_v41, 69  ;;  %vm2511_vm8 = vcmp.lt.s32.totalorder %v2510_v29, %v2451_v58  ;;  %v3638_v12 = vadd.f32 %v3637_v25, %v3636_v1  ;;  %6596 = vst [vmem:[#allocation34_spill] sm:$0xff] %v5535_v6  ;;  %v2475_v1 = vsel %vm4089_vm2, %v5526_v19, 69  ;;  %v439_v25 = vld [vmem:[%s4578_s26 + $0x7e0] sm:$0xff] }
 0x224   : > { %v2512_v23 = vsel %vm2511_vm8, %v2510_v29, %v2451_v58  ;;  %v3614_v40 = vrot.slane %v3613_v44, 2 }
 0x225   : > { %1239 = vmatmul.f32.gmra.mxu2 %v437_v49  ;;  %v1003_v15 = vpop.f32.mrf.mxu0  ;;  %v2467_v49 = vsel %vm4089_vm2, %v5511_v21, 69  ;;  %v5532_v24 = vpop.trf.xlu1  ;;  %v3639_v34 = vrot.slane %v3638_v12, 2 }
 0x226   : > { %4026 = vmatmul.msk.f32.gmra.mxu1 %vm463_vm0, %v5500_v0  ;;  %4088 = vmatmul.msk.f32.gmra.mxu3 %vm463_vm0, %v442_v38  ;;  %6595 = vst [vmem:[#allocation33_spill] sm:$0xff] %v5532_v24  ;;  %vm2513_vm0 = vcmp.lt.s32.totalorder %v2512_v23, %v2459_v56  ;;  %v3230_v38 = vpop.trf.xlu0  ;;  %v1405_v4 = vadd.f32 %v5339_v26, %v1003_v15 }
 0x227   : > { %v2514_v58 = vsel %vm2513_vm0, %v2512_v23, %v2459_v56  ;;  %v3647_v29 = vadd.f32 %v3646_v52, %v3230_v38  ;;  %v3640_v24 = vadd.f32 %v3639_v34, %v3638_v12  ;;  %v3615_v34 = vadd.f32 %v3614_v40, %v3613_v44 }
 0x228   : > { %v1192_v62 = vpop.f32.mrf.mxu2  ;;  %1050 = vmatmul.f32.gmra.mxu0 %v5516_v11  ;;  %vm2515_vm9 = vcmp.lt.s32.totalorder %v2514_v58, %v2467_v49 }
 0x229   : > { %v1594_v43 = vadd.f32 %v5439_v8, %v1192_v62  ;;  %v1599_v47 = vpop.f32.mrf.mxu3  ;;  %3351 = vxpose.xlu1.b32.cont [15/16] %v2981_v33, 128  ;;  %v5545_v8 = vsel %vm4089_vm2, %v5535_v6, 69  ;;  %v2516_v33 = vsel %vm2515_vm9, %v2514_v58, %v2467_v49  ;;  %v5547_v62 = vpop.trf.xlu2  ;;  %v3641_v52 = vrot.slane %v3640_v24, 1 }
 0x22a   : > { %6597 = vst [vmem:[#allocation35_spill] sm:$0xff] %v5545_v8  ;;  %vm2517_vm10 = vcmp.lt.s32.totalorder %v2516_v33, %v2475_v1 }
 0x22b   : > { %1855 = vxpose.xlu0.b32.cont [14/16] (narrow) %v1594_v43, 72  ;;  %1727 = vxpose.xlu2.b32.cont [14/16] (narrow) %v1402_v57, 72  ;;  %v5550_v31 = vsel %vm2517_vm10, %v2516_v33, %v2475_v1  ;;  %v5554_v57 = vpop.f32.mrf.mxu1  ;;  %v3642_v38 = vadd.f32 %v3641_v52, %v3640_v24  ;;  %v3616_v33 = vrot.slane %v3615_v34, 1 }
 0x22c   : > { %6598 = vst [vmem:[#allocation36_spill] sm:$0xff] %v5550_v31  ;;  %vm2519_vm11 = vcmp.lt.s32.totalorder %v5550_v31, %v5545_v8 }
 0x22d   : > { %1242 = vmatmul.f32.gmra.mxu2 %v439_v25  ;;  %v1006_v56 = vpop.f32.mrf.mxu0  ;;  %v5557_v49 = vpop.trf.xlu1  ;;  %v3794_v31 = vmul.f32 0.00625, %v3642_v38  ;;  %v3617_v44 = vadd.f32 %v3616_v33, %v3615_v34 }
 0x22e   : > { %6599 = vst [vmem:[#allocation37_spill] sm:$0xff] %v5557_v49  ;;  %v3231_v43 = vpop.trf.xlu0  ;;  %v1408_v26 = vadd.f32 %v5394_v45, %v1006_v56 }
 0x22f   : > { %v3648_v1 = vadd.f32 %v3647_v29, %v3231_v43  ;;  %v3793_v40 = vmul.f32 0.00625, %v3617_v44 }
 0x230   : > { %v1195_v12 = vpop.f32.mrf.mxu2 }
 0x231   : > { %v1597_v23 = vadd.f32 %v5489_v3, %v1195_v12  ;;  %v1602_v14 = vpop.f32.mrf.mxu3  ;;  %3352 = vxpose.xlu1.b32.end [16/16] %v2983_v63, 128  ;;  %v5560_v58 = vpop.trf.xlu2  ;;  %v3809_v63 = vrot.slane %v3794_v31, 7 }
 0x233   : > { %1856 = vxpose.xlu0.b32.cont [15/16] (narrow) %v1597_v23, 72  ;;  %1728 = vxpose.xlu2.b32.cont [15/16] (narrow) %v1405_v4, 72  ;;  %v1419_v24 = vpop.f32.mrf.mxu1  ;;  %v2172_v4 = vmax.f32 %v5547_v62, %v5560_v58  ;;  %v5570_v45 = vsel %vm2810_vm12, %v3793_v40, %v3809_v63 }
 0x234   : > { %6600 = vst [vmem:[#allocation38_spill] sm:$0xff] %v5570_v45 }
 0x235   : > { %v1009_v25 = vpop.f32.mrf.mxu0  ;;  %v5563_v8 = vpop.trf.xlu1 }
 0x236   : > { %v3232_v12 = vpop.trf.xlu0  ;;  %v1411_v56 = vadd.f32 %v5450_v10, %v1009_v25  ;;  %v2923_v10 = vand.u32 2147483647, %v5159_v55 }
 0x237   : > { %v3649_v0 = vadd.f32 %v3648_v1, %v3232_v12 }
 0x238   : > { %v1198_v15 = vpop.f32.mrf.mxu2 }
 0x239   : > { %v1600_v49 = vadd.f32 %v1599_v47, %v1198_v15  ;;  %v1605_v3 = vpop.f32.mrf.mxu3  ;;  %v5565_v29 = vpop.trf.xlu2  ;;  %v2921_v47 = vand.u32 2147483647, %v5144_v51 }
 0x23a   : > { %v2173_v34 = vmax.f32 %v2172_v4, %v5565_v29 }
 0x23b   : > { %1857 = vxpose.xlu0.b32.end [16/16] (narrow) %v1600_v49, 72  ;;  %1729 = vxpose.xlu2.b32.end [16/16] (narrow) %v1408_v26, 72  ;;  %v1422_v33 = vpop.f32.mrf.mxu1 }
 0x23d   : > { %v1012_v52 = vpop.f32.mrf.mxu0  ;;  %v5574_v23 = vpop.trf.xlu1 }
 0x23e   : > { %v3233_v38 = vpop.trf.xlu0  ;;  %v1414_v25 = vadd.f32 %v5513_v36, %v1012_v52 }
 0x23f   : > { %v3650_v51 = vadd.f32 %v3649_v0, %v3233_v38 }
 0x240   : > { %v1201_v31 = vpop.f32.mrf.mxu2 }
 0x241   : > { %v1603_v49 = vadd.f32 %v1602_v14, %v1201_v31  ;;  %v1608_v43 = vpop.f32.mrf.mxu3  ;;  %v5577_v1 = vpop.trf.xlu2  ;;  %v2925_v31 = vand.u32 2147483647, %v5174_v48 }
 0x242   : > { %v2174_v15 = vmax.f32 %v2173_v34, %v5577_v1 }
 0x243   : > { %1874 = vxpose.xlu1.b32.start [1/16] (narrow) %v1603_v49, 72  ;;  %3273 = vxpose.xlu2.b32.start [1/16] %v2921_v47, 128  ;;  %v1425_v0 = vpop.f32.mrf.mxu1 }
 0x244   : > { %1746 = vxpose.xlu0.b32.start [1/16] (narrow) %v1411_v56, 72 }
 0x245   : > { %v1015_v26 = vpop.f32.mrf.mxu0  ;;  %v5582_v14 = vpop.trf.xlu1 }
 0x246   : > { %v3234_v40 = vpop.trf.xlu0  ;;  %v1417_v55 = vadd.f32 %v5554_v57, %v1015_v26 }
 0x247   : > { %v3651_v4 = vadd.f32 %v3650_v51, %v3234_v40 }
 0x248   : > { %v1204_v12 = vpop.f32.mrf.mxu2 }
 0x249   : > { %v1606_v63 = vadd.f32 %v1605_v3, %v1204_v12  ;;  %v1611_v44 = vpop.f32.mrf.mxu3  ;;  %v5584_v47 = vpop.trf.xlu2  ;;  %v2088_v3 = vmax.f32 %v5563_v8, %v5574_v23 }
 0x24a   : > { %v2175_v38 = vmax.f32 %v2174_v15, %v5584_v47 }
 0x24b   : > { %1875 = vxpose.xlu1.b32.cont [2/16] (narrow) %v1606_v63, 72  ;;  %3274 = vxpose.xlu2.b32.cont [2/16] %v2923_v10, 128  ;;  %v2089_v57 = vmax.f32 %v2088_v3, %v5582_v14 }
 0x24c   : > { %1747 = vxpose.xlu0.b32.cont [2/16] (narrow) %v1414_v25, 72 }
 0x24d   : > { %v1018_v56 = vpop.f32.mrf.mxu0  ;;  %v5588_v36 = vpop.trf.xlu1 }
 0x24e   : > { %v3235_v51 = vpop.trf.xlu0  ;;  %v1420_v12 = vadd.f32 %v1419_v24, %v1018_v56  ;;  %v2929_v24 = vand.u32 2147483647, %v5208_v17  ;;  %v2931_v17 = vand.u32 2147483647, %v5224_v18 }
 0x24f   : > { %v3652_v10 = vadd.f32 %v3651_v4, %v3235_v51  ;;  %v2090_v4 = vmax.f32 %v2089_v57, %v5588_v36 }
 0x250   : > { %v1207_v49 = vpop.f32.mrf.mxu2 }
 0x251   : > { %v1609_v52 = vadd.f32 %v1608_v43, %v1207_v49  ;;  %v1614_v34 = vpop.f32.mrf.mxu3  ;;  %v5593_v25 = vpop.trf.xlu2  ;;  %v2927_v43 = vand.u32 2147483647, %v5191_v39 }
 0x252   : > { %v2176_v26 = vmax.f32 %v2175_v38, %v5593_v25 }
 0x253   : > { %1876 = vxpose.xlu1.b32.cont [3/16] (narrow) %v1609_v52, 72  ;;  %3275 = vxpose.xlu2.b32.cont [3/16] %v2925_v31, 128 }
 0x254   : > { %1748 = vxpose.xlu0.b32.cont [3/16] (narrow) %v1417_v55, 72  ;;  %v1428_v55 = vpop.f32.mrf.mxu1 }
 0x255   : > { %v1021_v48 = vpop.f32.mrf.mxu0  ;;  %v5598_v40 = vpop.trf.xlu1 }
 0x256   : > { %v3236_v52 = vpop.trf.xlu0  ;;  %v2091_v38 = vmax.f32 %v2090_v4, %v5598_v40  ;;  %v1423_v56 = vadd.f32 %v1422_v33, %v1021_v48 }
 0x257   : > { %v3653_v31 = vadd.f32 %v3652_v10, %v3236_v52 }
 0x258   : > { %v1210_v63 = vpop.f32.mrf.mxu2 }
 0x259   : > { %v1612_v49 = vadd.f32 %v1611_v44, %v1210_v63  ;;  %v1617_v15 = vpop.f32.mrf.mxu3  ;;  %v5601_v51 = vpop.trf.xlu2 }
 0x25a   : > { %v2177_v39 = vmax.f32 %v2176_v26, %v5601_v51 }
 0x25b   : > { %1877 = vxpose.xlu1.b32.cont [4/16] (narrow) %v1612_v49, 72  ;;  %3276 = vxpose.xlu2.b32.cont [4/16] %v2927_v43, 128 }
 0x25c   : > { %1749 = vxpose.xlu0.b32.cont [4/16] (narrow) %v1420_v12, 72  ;;  %v1431_v4 = vpop.f32.mrf.mxu1 }
 0x25d   : > { %v1024_v3 = vpop.f32.mrf.mxu0  ;;  %v5606_v63 = vpop.trf.xlu1 }
 0x25e   : > { %v3237_v10 = vpop.trf.xlu0  ;;  %v2092_v49 = vmax.f32 %v2091_v38, %v5606_v63  ;;  %v1426_v33 = vadd.f32 %v1425_v0, %v1024_v3  ;;  %v2933_v0 = vand.u32 2147483647, %v5240_v9  ;;  %v2935_v9 = vand.u32 2147483647, %v5258_v46 }
 0x25f   : > { %v3654_v43 = vadd.f32 %v3653_v31, %v3237_v10 }
 0x260   : > { %v1213_v44 = vpop.f32.mrf.mxu2 }
 0x261   : > { %v1615_v57 = vadd.f32 %v1614_v34, %v1213_v44  ;;  %v1620_v45 = vpop.f32.mrf.mxu3  ;;  %v5609_v12 = vpop.trf.xlu2 }
 0x262   : > { %v2178_v26 = vmax.f32 %v2177_v39, %v5609_v12 }
 0x263   : > { %1878 = vxpose.xlu1.b32.cont [5/16] (narrow) %v1615_v57, 72  ;;  %3277 = vxpose.xlu2.b32.cont [5/16] %v2929_v24, 128 }
 0x264   : > { %1750 = vxpose.xlu0.b32.cont [5/16] (narrow) %v1423_v56, 72 }
 0x265   : > { %v1027_v52 = vpop.f32.mrf.mxu0  ;;  %v5613_v42 = vpop.trf.xlu1 }
 0x266   : > { %v3238_v60 = vpop.trf.xlu0  ;;  %v5616_v31 = vmax.f32 %v2092_v49, %v5613_v42  ;;  %v1429_v3 = vadd.f32 %v1428_v55, %v1027_v52 }
 0x267   : > { %v3655_v38 = vadd.f32 %v3654_v43, %v3238_v60 }
 0x268   : > { %v1216_v48 = vpop.f32.mrf.mxu2 }
 0x269   : > { %v1618_v34 = vadd.f32 %v1617_v15, %v1216_v48  ;;  %v1623_v44 = vpop.f32.mrf.mxu3  ;;  %v1834_v24 = vpop.trf.xlu2 }
 0x26a   : > { %v5620_v39 = vsel %vm1931_vm1, %v1834_v24, -inf  ;;  %v1434_v15 = vpop.f32.mrf.mxu1 }
 0x26b   : > { %1879 = vxpose.xlu1.b32.cont [6/16] (narrow) %v1618_v34, 72  ;;  %3278 = vxpose.xlu2.b32.cont [6/16] %v2931_v17, 128  ;;  %v2179_v18 = vmax.f32 %v2178_v26, %v5620_v39 }
 0x26c   : > { %1751 = vxpose.xlu0.b32.cont [6/16] (narrow) %v1426_v33, 72 }
 0x26d   : > { %v1030_v56 = vpop.f32.mrf.mxu0  ;;  %v2187_v10 = vrot.slane %v2179_v18, 4  ;;  %v5624_v49 = vpop.trf.xlu1 }
 0x26e   : > { %v3239_v43 = vpop.trf.xlu0  ;;  %v1432_v26 = vadd.f32 %v1431_v4, %v1030_v56 }
 0x26f   : > { %v2188_v17 = vmax.f32 %v2179_v18, %v2187_v10 }
 0x270   : > { %v1219_v57 = vpop.f32.mrf.mxu2 }
 0x271   : > { %v1621_v60 = vadd.f32 %v1620_v45, %v1219_v57  ;;  %v1626_v33 = vpop.f32.mrf.mxu3  ;;  %v2189_v48 = vrot.slane %v2188_v17, 2  ;;  %v5626_v11 = vpop.trf.xlu2 }
 0x272   : > { %v1437_v37 = vpop.f32.mrf.mxu1 }
 0x273   : > { %1880 = vxpose.xlu1.b32.cont [7/16] (narrow) %v1621_v60, 72  ;;  %3279 = vxpose.xlu2.b32.cont [7/16] %v2933_v0, 128  ;;  %v2190_v24 = vmax.f32 %v2188_v17, %v2189_v48 }
 0x274   : > { %1752 = vxpose.xlu0.b32.cont [7/16] (narrow) %v1429_v3, 72 }
 0x275   : > { %v1033_v34 = vpop.f32.mrf.mxu0  ;;  %v2191_v52 = vrot.slane %v2190_v24, 1  ;;  %v1706_v18 = vpop.trf.xlu1 }
 0x276   : > { %v3240_v6 = vpop.trf.xlu0  ;;  %v5660_v60 = vsel %vm1931_vm1, %v1706_v18, -inf }
 0x277   : > { %v5629_v45 = vmax.f32 %v2190_v24, %v2191_v52 }
 0x278   : > { %v1222_v55 = vpop.f32.mrf.mxu2 }
 0x279   : > { %v1624_v61 = vadd.f32 %v1623_v44, %v1222_v55  ;;  %vm2240_vm13 = vcmp.eq.f32.partialorder %v5547_v62, %v5629_v45  ;;  %vm2256_vm14 = vcmp.eq.f32.partialorder %v5565_v29, %v5629_v45  ;;  %vm2264_vm15 = vcmp.eq.f32.partialorder %v5577_v1, %v5629_v45  ;;  %v1629_v46 = vpop.f32.mrf.mxu3  ;;  %v5648_v3 = vpop.trf.xlu2 }
 0x27a   : > { %vm2248_vm2 = vcmp.eq.f32.partialorder %v5560_v58, %v5629_v45  ;;  %vm2280_vm3 = vcmp.eq.f32.partialorder %v5593_v25, %v5629_v45  ;;  %vm2288_vm4 = vcmp.eq.f32.partialorder %v5601_v51, %v5629_v45  ;;  %vm2296_vm5 = vcmp.eq.f32.partialorder %v5609_v12, %v5629_v45  ;;  %v1440_v10 = vpop.f32.mrf.mxu1 }
 0x27b   : > { %1881 = vxpose.xlu1.b32.cont [8/16] (narrow) %v1624_v61, 72  ;;  %3280 = vxpose.xlu2.b32.cont [8/16] %v2935_v9, 128  ;;  %v2937_v61 = vand.u32 2147483647, %v5277_v28  ;;  %v1435_v62 = vadd.f32 %v1434_v15, %v1033_v34  ;;  %v2368_v56 = vsel %vm2240_vm13, %v5285_v20, 69  ;;  %v2376_v0 = vsel %vm2248_vm2, %v5358_v32, 69 }
 0x27c   : > { %1753 = vxpose.xlu0.b32.cont [8/16] (narrow) %v1432_v26, 72  ;;  %vm2272_vm6 = vcmp.eq.f32.partialorder %v5584_v47, %v5629_v45  ;;  %v2384_v57 = vsel %vm2256_vm14, %v5374_v16, 69  ;;  %vm2686_vm7 = vcmp.lt.s32.totalorder %v2368_v56, %v2376_v0  ;;  %v3656_v28 = vadd.f32 %v3655_v38, %v3239_v43 }
 0x27d   : > { %v1036_v4 = vpop.f32.mrf.mxu0  ;;  %v2094_v15 = vmax.f32 %v5616_v31, %v5624_v49  ;;  %v2392_v29 = vsel %vm2264_vm15, %v5389_v13, 69  ;;  %v5668_v48 = vpop.trf.xlu1  ;;  %v2400_v34 = vsel %vm2272_vm6, %v5399_v27, 69  ;;  %v2939_v9 = vand.u32 2147483647, %v5299_v35 }
 0x27e   : > { %v5662_v17 = vpop.trf.xlu0  ;;  %v5670_v43 = vadd.f32 %v3656_v28, %v3240_v6  ;;  %v1438_v55 = vadd.f32 %v1437_v37, %v1036_v4  ;;  %v2408_v6 = vsel %vm2280_vm3, %v5416_v7, 69  ;;  %v2416_v35 = vsel %vm2288_vm4, %v5428_v53, 69 }
 0x27f   : > { %v2095_v31 = vmax.f32 %v2094_v15, %v5660_v60  ;;  %vm2304_vm10 = vcmp.eq.f32.partialorder %v5620_v39, %v5629_v45  ;;  %vm4094_vm14 = vcmp.eq.f32.partialorder %v5629_v45, -inf  ;;  %v2109_v45 = vmax.f32 %v5626_v11, %v5648_v3 }
 0x280   : > { %v1225_v44 = vpop.f32.mrf.mxu2  ;;  %v2432_v39 = vsel %vm2304_vm10, %v5295_v30, 69  ;;  %v2440_v12 = vsel %vm4094_vm14, %v5468_v59, 69 }
 0x281   : > { %v1627_v58 = vadd.f32 %v1626_v33, %v1225_v44  ;;  %v2687_v33 = vsel %vm2686_vm7, %v2368_v56, %v2376_v0  ;;  %v1632_v26 = vpop.f32.mrf.mxu3  ;;  %v2103_v1 = vrot.slane %v2095_v31, 4 }
 0x282   : > { %vm2688_vm8 = vcmp.lt.s32.totalorder %v2687_v33, %v2384_v57  ;;  %v1443_v51 = vpop.f32.mrf.mxu1 }
 0x283   : > { %1882 = vxpose.xlu1.b32.cont [9/16] (narrow) %v1627_v58, 72  ;;  %3281 = vxpose.xlu2.b32.cont [9/16] %v2937_v61, 128  ;;  %v2689_v24 = vsel %vm2688_vm8, %v2687_v33, %v2384_v57  ;;  %v5682_v61 = vpop.trf.xlu2  ;;  %v2104_v47 = vmax.f32 %v2095_v31, %v2103_v1  ;;  %v2941_v57 = vand.u32 2147483647, %v5324_v5  ;;  %v2448_v1 = vsel %vm4094_vm14, %v5480_v50, 69 }
 0x284   : > { %1754 = vxpose.xlu0.b32.cont [9/16] (narrow) %v1435_v62, 72  ;;  %vm2690_vm0 = vcmp.lt.s32.totalorder %v2689_v24, %v2392_v29 }
 0x285   : > { %v1039_v38 = vpop.f32.mrf.mxu0  ;;  %v2691_v18 = vsel %vm2690_vm0, %v2689_v24, %v2392_v29  ;;  %v2105_v37 = vrot.slane %v2104_v47, 2  ;;  %v5696_v56 = vpop.trf.xlu1 }
 0x286   : > { %vm2692_vm9 = vcmp.lt.s32.totalorder %v2691_v18, %v2400_v34  ;;  %v5690_v25 = vpop.trf.xlu0  ;;  %v1441_v33 = vadd.f32 %v1440_v10, %v1039_v38  ;;  %v2456_v10 = vsel %vm4094_vm14, %v5492_v22, 69 }
 0x287   : > { %v2693_v44 = vsel %vm2692_vm9, %v2691_v18, %v2400_v34  ;;  %v2106_v0 = vmax.f32 %v2104_v47, %v2105_v37 }
 0x288   : > { %v1228_v52 = vpop.f32.mrf.mxu2  ;;  %vm2694_vm13 = vcmp.lt.s32.totalorder %v2693_v44, %v2408_v6 }
 0x289   : > { %v1630_v62 = vadd.f32 %v1629_v46, %v1228_v52  ;;  %v2424_v46 = vsel %vm2296_vm5, %v5442_v2, 69  ;;  %v2695_v4 = vsel %vm2694_vm13, %v2693_v44, %v2408_v6  ;;  %v2107_v28 = vrot.slane %v2106_v0, 1  ;;  %v1635_v24 = vpop.f32.mrf.mxu3 }
 0x28a   : > { %vm2696_vm15 = vcmp.lt.s32.totalorder %v2695_v4, %v2416_v35  ;;  %v1446_v47 = vpop.f32.mrf.mxu1 }
 0x28b   : > { %1883 = vxpose.xlu1.b32.cont [10/16] (narrow) %v1630_v62, 72  ;;  %3282 = vxpose.xlu2.b32.cont [10/16] %v2939_v9, 128  ;;  %v2697_v58 = vsel %vm2696_vm15, %v2695_v4, %v2416_v35  ;;  %v5704_v34 = vpop.trf.xlu2  ;;  %v2943_v62 = vand.u32 2147483647, %v5353_v54  ;;  %v2472_v35 = vsel %vm4094_vm14, %v5511_v21, 69 }
 0x28c   : > { %1755 = vxpose.xlu0.b32.cont [10/16] (narrow) %v1438_v55, 72  ;;  %vm2698_vm2 = vcmp.lt.s32.totalorder %v2697_v58, %v2424_v46  ;;  %v5709_v55 = vmax.f32 %v2106_v0, %v2107_v28 }
 0x28d   : > { %v1042_v15 = vpop.f32.mrf.mxu0  ;;  %v2699_v29 = vsel %vm2698_vm2, %v2697_v58, %v2424_v46  ;;  %v3355_v6 = vpop.trf.xlu1 }
 0x28e   : > { %vm2700_vm3 = vcmp.lt.s32.totalorder %v2699_v29, %v2432_v39  ;;  %v5711_v52 = vpop.trf.xlu0  ;;  %vm2268_vm6 = vcmp.eq.f32.partialorder %v5598_v40, %v5709_v55  ;;  %vm2276_vm7 = vcmp.eq.f32.partialorder %v5606_v63, %v5709_v55  ;;  %vm2284_vm8 = vcmp.eq.f32.partialorder %v5613_v42, %v5709_v55 }
 0x28f   : > { %v2701_v5 = vsel %vm2700_vm3, %v2699_v29, %v2432_v39  ;;  %vm2292_vm0 = vcmp.eq.f32.partialorder %v5624_v49, %v5709_v55  ;;  %vm2300_vm9 = vcmp.eq.f32.partialorder %v5660_v60, %v5709_v55  ;;  %vm2236_vm13 = vcmp.eq.f32.partialorder %v5563_v8, %v5709_v55  ;;  %v6602_v29 = vld [vmem:[#allocation26_spill] sm:$0xff] }
 0x290   : > { %v1231_v31 = vpop.f32.mrf.mxu2  ;;  %vm2702_vm4 = vcmp.lt.s32.totalorder %v2701_v5, %v2440_v12  ;;  %vm2244_vm15 = vcmp.eq.f32.partialorder %v5574_v23, %v5709_v55  ;;  %v1444_v37 = vadd.f32 %v1443_v51, %v1042_v15  ;;  %vm2252_vm3 = vcmp.eq.f32.partialorder %v5582_v14, %v5709_v55 }
 0x291   : > { %v1633_v9 = vadd.f32 %v1632_v26, %v1231_v31  ;;  %v2703_v38 = vsel %vm2702_vm4, %v2701_v5, %v2440_v12  ;;  %v2464_v26 = vsel %vm4094_vm14, %v5504_v41, 69  ;;  %v2480_v8 = vsel %vm4094_vm14, %v5526_v19, 69  ;;  %v1638_v58 = vpop.f32.mrf.mxu3 }
 0x292   : > { %vm2704_vm5 = vcmp.lt.s32.totalorder %v2703_v38, %v2448_v1  ;;  %v2364_v23 = vsel %vm2236_vm13, %v5285_v20, 69  ;;  %v2372_v39 = vsel %vm2244_vm15, %v5358_v32, 69  ;;  %v2380_v15 = vsel %vm2252_vm3, %v5374_v16, 69 }
 0x293   : > { %1884 = vxpose.xlu1.b32.cont [11/16] (narrow) %v1633_v9, 72  ;;  %3283 = vxpose.xlu2.b32.cont [11/16] %v2941_v57, 128  ;;  %v2705_v18 = vsel %vm2704_vm5, %v2703_v38, %v2448_v1  ;;  %v5737_v4 = vpop.trf.xlu2  ;;  %vm2260_vm5 = vcmp.eq.f32.partialorder %v5588_v36, %v5709_v55  ;;  %v6601_v57 = vld [vmem:[#allocation34_spill] sm:$0xff]  ;;  %vm2530_vm13 = vcmp.lt.s32.totalorder %v2364_v23, %v2372_v39  ;;  %v2428_v42 = vsel %vm2300_vm9, %v5295_v30, 69 }
 0x294   : > { %1756 = vxpose.xlu0.b32.cont [11/16] (narrow) %v1441_v33, 72  ;;  %vm2706_vm10 = vcmp.lt.s32.totalorder %v2705_v18, %v2456_v10  ;;  %v5753_v14 = vsel %vm4094_vm14, %v6601_v57, 69  ;;  %v2945_v33 = vand.u32 2147483647, %v6602_v29  ;;  %v2388_v36 = vsel %vm2260_vm5, %v5389_v13, 69  ;;  %v6603_v29 = vld [vmem:[#allocation29_spill] sm:$0xff] }
 0x295   : > { %v2707_v44 = vsel %vm2706_vm10, %v2705_v18, %v2456_v10  ;;  %v1045_v54 = vpop.f32.mrf.mxu0  ;;  %v3356_v12 = vpop.trf.xlu1  ;;  %v2531_v1 = vsel %vm2530_vm13, %v2364_v23, %v2372_v39  ;;  %v2193_v5 = vmax.f32 %v5662_v17, %v5690_v25  ;;  %v3693_v10 = vadd.f32 %v5696_v56, %v5668_v48 }
 0x296   : > { %vm2708_vm2 = vcmp.lt.s32.totalorder %v2707_v44, %v2464_v26  ;;  %v5748_v51 = vpop.trf.xlu0  ;;  %vm2532_vm15 = vcmp.lt.s32.totalorder %v2531_v1, %v2380_v15  ;;  %v2404_v48 = vsel %vm2276_vm7, %v5416_v7, 69  ;;  %vm4090_vm7 = vcmp.eq.f32.partialorder %v5709_v55, -inf }
 0x297   : > { %v2709_v0 = vsel %vm2708_vm2, %v2707_v44, %v2464_v26  ;;  %v2533_v38 = vsel %vm2532_vm15, %v2531_v1, %v2380_v15  ;;  %v1447_v26 = vadd.f32 %v1446_v47, %v1045_v54  ;;  %v3694_v44 = vadd.f32 %v3693_v10, %v3355_v6 }
 0x298   : > { %v1234_v46 = vpop.f32.mrf.mxu2  ;;  %vm2710_vm4 = vcmp.lt.s32.totalorder %v2709_v0, %v2472_v35  ;;  %vm2534_vm2 = vcmp.lt.s32.totalorder %v2533_v38, %v2388_v36  ;;  %v2412_v6 = vsel %vm2284_vm8, %v5428_v53, 69 }
 0x299   : > { %v2711_v28 = vsel %vm2710_vm4, %v2709_v0, %v2472_v35  ;;  %v1636_v31 = vadd.f32 %v1635_v24, %v1234_v46  ;;  %v2396_v24 = vsel %vm2268_vm6, %v5399_v27, 69  ;;  %v2194_v35 = vmax.f32 %v2193_v5, %v5711_v52  ;;  %v1641_v39 = vpop.f32.mrf.mxu3 }
 0x29a   : > { %vm2712_vm10 = vcmp.lt.s32.totalorder %v2711_v28, %v2480_v8  ;;  %v2535_v56 = vsel %vm2534_vm2, %v2533_v38, %v2388_v36  ;;  %v2110_v46 = vmax.f32 %v2109_v45, %v5682_v61  ;;  %v2436_v5 = vsel %vm4090_vm7, %v5468_v59, 69 }
 0x29b   : > { %3284 = vxpose.xlu2.b32.cont [12/16] %v2943_v62, 128  ;;  %v5757_v9 = vsel %vm2712_vm10, %v2711_v28, %v2480_v8  ;;  %1885 = vxpose.xlu1.b32.cont [12/16] (narrow) %v1636_v31, 72  ;;  %v5772_v62 = vpop.trf.xlu2  ;;  %vm2536_vm3 = vcmp.lt.s32.totalorder %v2535_v56, %v2396_v24  ;;  %v2195_v54 = vmax.f32 %v2194_v35, %v5748_v51 }
 0x29c   : > { %1757 = vxpose.xlu0.b32.cont [12/16] (narrow) %v1444_v37, 72  ;;  %vm2714_vm14 = vcmp.lt.s32.totalorder %v5757_v9, %v5753_v14  ;;  %v1449_v37 = vpop.f32.mrf.mxu1  ;;  %v3695_v8 = vadd.f32 %v3694_v44, %v3356_v12  ;;  %v2537_v23 = vsel %vm2536_vm3, %v2535_v56, %v2396_v24  ;;  %v2111_v12 = vmax.f32 %v2110_v46, %v5704_v34 }
 0x29d   : > { %v1048_v47 = vpop.f32.mrf.mxu0  ;;  %v3357_v63 = vpop.trf.xlu1  ;;  %vm2538_vm6 = vcmp.lt.s32.totalorder %v2537_v23, %v2404_v48  ;;  %v2452_v46 = vsel %vm4090_vm7, %v5492_v22, 69 }
 0x29e   : > { %v5781_v0 = vpop.trf.xlu0  ;;  %v2539_v15 = vsel %vm2538_vm6, %v2537_v23, %v2404_v48  ;;  %v1450_v36 = vadd.f32 %v1449_v37, %v1048_v47  ;;  %v3696_v49 = vadd.f32 %v3695_v8, %v3357_v63  ;;  %v2112_v24 = vmax.f32 %v2111_v12, %v5737_v4 }
 0x29f   : > { %v2196_v28 = vmax.f32 %v2195_v54, %v5781_v0  ;;  %vm2540_vm8 = vcmp.lt.s32.totalorder %v2539_v15, %v2412_v6  ;;  %v6604_v54 = vld [vmem:[#allocation32_spill] sm:$0xff]  ;;  %v2460_v23 = vsel %vm4090_vm7, %v5504_v41, 69 }
 0x2a0   : > { %v1237_v18 = vpop.f32.mrf.mxu2  ;;  %v2541_v31 = vsel %vm2540_vm8, %v2539_v15, %v2412_v6  ;;  %v2113_v47 = vmax.f32 %v2112_v24, %v5772_v62  ;;  %v2949_v8 = vand.u32 2147483647, %v6604_v54  ;;  %v2468_v15 = vsel %vm4090_vm7, %v5511_v21, 69 }
 0x2a1   : > { %v1639_v40 = vadd.f32 %v1638_v58, %v1237_v18  ;;  %v2420_v58 = vsel %vm2292_vm0, %v5442_v2, 69  ;;  %v2444_v18 = vsel %vm4090_vm7, %v5480_v50, 69  ;;  %v1644_v6 = vpop.f32.mrf.mxu3  ;;  %v2484_v24 = vsel %vm4090_vm7, %v6601_v57, 69 }
 0x2a2   : > { %vm2542_vm0 = vcmp.lt.s32.totalorder %v2541_v31, %v2420_v58 }
 0x2a3   : > { %3285 = vxpose.xlu2.b32.cont [13/16] %v2945_v33, 128  ;;  %v2947_v33 = vand.u32 2147483647, %v6603_v29  ;;  %1886 = vxpose.xlu1.b32.cont [13/16] (narrow) %v1639_v40, 72  ;;  %v5799_v45 = vpop.trf.xlu2  ;;  %v2543_v10 = vsel %vm2542_vm0, %v2541_v31, %v2420_v58  ;;  %v2476_v31 = vsel %vm4090_vm7, %v5526_v19, 69 }
 0x2a4   : > { %1758 = vxpose.xlu0.b32.cont [13/16] (narrow) %v1447_v26, 72  ;;  %vm2544_vm4 = vcmp.lt.s32.totalorder %v2543_v10, %v2428_v42  ;;  %v1452_v60 = vpop.f32.mrf.mxu1  ;;  %v2114_v29 = vmax.f32 %v2113_v47, %v5799_v45 }
 0x2a5   : > { %v2545_v35 = vsel %vm2544_vm4, %v2543_v10, %v2428_v42  ;;  %v3358_v37 = vpop.trf.xlu1  ;;  %v1051_v48 = vpop.f32.mrf.mxu0 }
 0x2a6   : > { %v5805_v26 = vpop.trf.xlu0  ;;  %vm2546_vm9 = vcmp.lt.s32.totalorder %v2545_v35, %v2436_v5  ;;  %v3697_v56 = vadd.f32 %v3696_v49, %v3358_v37 }
 0x2a7   : > { %v2197_v44 = vmax.f32 %v2196_v28, %v5805_v26  ;;  %v2547_v40 = vsel %vm2546_vm9, %v2545_v35, %v2436_v5 }
 0x2a8   : > { %v1240_v1 = vpop.f32.mrf.mxu2  ;;  %vm2548_vm5 = vcmp.lt.s32.totalorder %v2547_v40, %v2444_v18 }
 0x2a9   : > { %v1642_v38 = vadd.f32 %v1641_v39, %v1240_v1  ;;  %v2549_v63 = vsel %vm2548_vm5, %v2547_v40, %v2444_v18  ;;  %v1453_v39 = vadd.f32 %v1452_v60, %v1051_v48  ;;  %v4248_v18 = vld [vmem:[%s4578_s26 + $0x3f0] sm:$0xff]  ;;  %v1647_v40 = vpop.f32.mrf.mxu3 }
 0x2aa   : > { %vm2550_vm10 = vcmp.lt.s32.totalorder %v2549_v63, %v2452_v46  ;;  %v2951_v35 = vand.u32 2147483647, %v4248_v18 }
 0x2ab   : > { %3286 = vxpose.xlu2.b32.cont [14/16] %v2947_v33, 128  ;;  %1887 = vxpose.xlu1.b32.cont [14/16] (narrow) %v1642_v38, 72  ;;  %v5819_v58 = vpop.trf.xlu2  ;;  %v2551_v12 = vsel %vm2550_vm10, %v2549_v63, %v2452_v46  ;;  %v6607_v63 = vld [vmem:[#allocation28_spill] sm:$0xff] }
 0x2ac   : > { %1759 = vxpose.xlu0.b32.cont [14/16] (narrow) %v1450_v36, 72  ;;  %vm2552_vm13 = vcmp.lt.s32.totalorder %v2551_v12, %v2460_v23  ;;  %v1455_v10 = vpop.f32.mrf.mxu1  ;;  %v2115_v60 = vmax.f32 %v2114_v29, %v5819_v58 }
 0x2ad   : > { %v2553_v36 = vsel %vm2552_vm13, %v2551_v12, %v2460_v23  ;;  %v3359_v49 = vpop.trf.xlu1 }
 0x2ae   : > { %v5825_v42 = vpop.trf.xlu0  ;;  %vm2554_vm15 = vcmp.lt.s32.totalorder %v2553_v36, %v2468_v15  ;;  %v5833_v5 = vadd.f32 %v3697_v56, %v3359_v49  ;;  %v6605_v56 = vld [vmem:[#allocation8_spill] sm:$0xff] }
 0x2af   : > { %v5831_v1 = vmax.f32 %v2197_v44, %v5825_v42  ;;  %v2555_v38 = vsel %vm2554_vm15, %v2553_v36, %v2468_v15  ;;  %v1456_v46 = vadd.f32 %v1455_v10, %v6605_v56  ;;  %v4249_v15 = vld [vmem:[%s4578_s26 + $0x308] sm:$0xff]  ;;  %v6608_v10 = vld [vmem:[#allocation10_spill] sm:$0xff]  ;;  %v6610_v56 = vld [vmem:[#allocation35_spill] sm:$0xff] }
 0x2b0   : > { %v1243_v28 = vpop.f32.mrf.mxu2  ;;  %vm2556_vm2 = vcmp.lt.s32.totalorder %v2555_v38, %v2476_v31  ;;  %v2922_v12 = vand.u32 2147483647, %v4249_v15 }
 0x2b1   : > { %v1645_v33 = vadd.f32 %v1644_v6, %v1243_v28  ;;  %v2557_v37 = vsel %vm2556_vm2, %v2555_v38, %v2476_v31 }
 0x2b2   : > { %vm2558_vm3 = vcmp.lt.s32.totalorder %v2557_v37, %v2484_v24 }
 0x2b3   : > { %3287 = vxpose.xlu2.b32.cont [15/16] %v2949_v8, 128  ;;  %1888 = vxpose.xlu1.b32.cont [15/16] (narrow) %v1645_v33, 72  ;;  %v1738_v44 = vpop.trf.xlu2  ;;  %v6606_v8 = vld [vmem:[#allocation9_spill] sm:$0xff] }
 0x2b4   : > { %1760 = vxpose.xlu0.b32.cont [15/16] (narrow) %v1453_v39, 72  ;;  %v5842_v48 = vsel %vm1931_vm1, %v1738_v44, -inf  ;;  %v1648_v6 = vadd.f32 %v1647_v40, %v6606_v8  ;;  %v2954_v39 = vand.u32 2147483647, %v6607_v63  ;;  %v1458_v28 = vpop.f32.mrf.mxu1  ;;  %v6612_v63 = vld [vmem:[#allocation11_spill] sm:$0xff] }
 0x2b5   : > { %v2116_v55 = vmax.f32 %v2115_v60, %v5842_v48  ;;  %v3360_v54 = vpop.trf.xlu1  ;;  %v1459_v38 = vadd.f32 %v1458_v28, %v6608_v10  ;;  %v2559_v60 = vsel %vm2558_vm3, %v2557_v37, %v2484_v24  ;;  %v4251_v28 = vld [vmem:[%s4578_s26 + $0x428] sm:$0xff] }
 0x2b6   : > { %v5849_v36 = vpop.trf.xlu0 }
 0x2b7   : > { %v2124_v47 = vrot.slane %v2116_v55, 4  ;;  %v2199_v15 = vmax.f32 %v5831_v1, %v5849_v36 }
 0x2b9   : > { %v2125_v23 = vmax.f32 %v2116_v55, %v2124_v47  ;;  %v4250_v55 = vld [vmem:[%s4578_s26 + $0x318] sm:$0xff] }
 0x2ba   : > { %v2924_v47 = vand.u32 2147483647, %v4250_v55 }
 0x2bb   : > { %3288 = vxpose.xlu2.b32.end [16/16] %v2951_v35, 128  ;;  %1889 = vxpose.xlu1.b32.end [16/16] (narrow) %v1648_v6, 72  ;;  %v2126_v29 = vrot.slane %v2125_v23, 2  ;;  %v6609_v35 = vld [vmem:[#allocation31_spill] sm:$0xff] }
 0x2bc   : > { %1761 = vxpose.xlu0.b32.end [16/16] (narrow) %v1456_v46, 72  ;;  %v2956_v44 = vand.u32 2147483647, %v6609_v35  ;;  %v6611_v46 = vld [vmem:[#allocation36_spill] sm:$0xff]  ;;  %v1461_v24 = vpop.f32.mrf.mxu1 }
 0x2bd   : > { %v2127_v33 = vmax.f32 %v2125_v23, %v2126_v29  ;;  %v5851_v49 = vpop.trf.xlu1  ;;  %v2520_v40 = vsel %vm2519_vm11, %v6611_v46, %v6610_v56  ;;  %v2560_v23 = vrot.slane %v2559_v60, 4 }
 0x2be   : > { %v2521_v35 = vrot.slane %v2520_v40, 4 }
 0x2bf   : > { %v2128_v31 = vrot.slane %v2127_v33, 1  ;;  %vm2561_vm4 = vcmp.lt.s32.totalorder %v2559_v60, %v2560_v23 }
 0x2c0   : > { %v2562_v1 = vsel %vm2561_vm4, %v2559_v60, %v2560_v23  ;;  %vm2522_vm9 = vcmp.lt.s32.totalorder %v2520_v40, %v2521_v35  ;;  %v4254_v23 = vld [vmem:[%s4578_s26 + $0x338] sm:$0xff] }
 0x2c1   : > { %v5855_v18 = vmax.f32 %v2127_v33, %v2128_v31  ;;  %v5881_v31 = vadd.f32 %v5833_v5, %v3360_v54  ;;  %v2563_v46 = vrot.slane %v2562_v1, 2  ;;  %v2523_v5 = vsel %vm2522_vm9, %v2520_v40, %v2521_v35 }
 0x2c3   : > { %3369 = vxpose.xlu2.b32.start [1/16] (narrow) %v2954_v39, 32  ;;  %1778 = vxpose.xlu1.b32.start [1/16] (narrow) %v1459_v38, 72  ;;  %vm2237_vm6 = vcmp.eq.f32.partialorder %v5626_v11, %v5855_v18  ;;  %vm2245_vm7 = vcmp.eq.f32.partialorder %v5648_v3, %v5855_v18  ;;  %vm2253_vm8 = vcmp.eq.f32.partialorder %v5682_v61, %v5855_v18  ;;  %v2958_v3 = vand.u32 2147483647, %v4251_v28  ;;  %v1866_v61 = vpop.trf.xlu0 }
 0x2c4   : > { %3305 = vxpose.xlu0.b32.start [1/16] (narrow) %v2922_v12, 32  ;;  %v2365_v37 = vsel %vm2237_vm6, %v5285_v20, 69  ;;  %v2373_v8 = vsel %vm2245_vm7, %v5358_v32, 69  ;;  %v1462_v39 = vadd.f32 %v1461_v24, %v6612_v63  ;;  %v2381_v11 = vsel %vm2253_vm8, %v5374_v16, 69  ;;  %v4252_v12 = vld [vmem:[%s4578_s26 + $0x328] sm:$0xff]  ;;  %v4253_v63 = vld [vmem:[%s4578_s26 + $0x438] sm:$0xff] }
 0x2c5   : > { %v5872_v6 = vpop.trf.xlu1  ;;  %vm2569_vm11 = vcmp.lt.s32.totalorder %v2365_v37, %v2373_v8  ;;  %v2926_v29 = vand.u32 2147483647, %v4252_v12  ;;  %v5885_v10 = vsel %vm1931_vm1, %v1866_v61, -inf  ;;  %vm2564_vm5 = vcmp.lt.s32.totalorder %v2562_v1, %v2563_v46 }
 0x2c6   : > { %v2570_v33 = vsel %vm2569_vm11, %v2365_v37, %v2373_v8  ;;  %v2200_v38 = vmax.f32 %v2199_v15, %v5885_v10  ;;  %v2565_v24 = vsel %vm2564_vm5, %v2562_v1, %v2563_v46  ;;  %v2928_v28 = vand.u32 2147483647, %v4254_v23  ;;  %v6615_v23 = vld [vmem:[#allocation14_spill] sm:$0xff] }
 0x2c7   : > { %vm2571_vm0 = vcmp.lt.s32.totalorder %v2570_v33, %v2381_v11  ;;  %v2566_v8 = vrot.slane %v2565_v24, 1 }
 0x2c8   : > { %v2208_v56 = vrot.slane %v2200_v38, 4 }
 0x2c9   : > { %vm2567_vm13 = vcmp.lt.s32.totalorder %v2565_v24, %v2566_v8 }
 0x2ca   : > { %v2209_v54 = vmax.f32 %v2200_v38, %v2208_v56  ;;  %v2568_v15 = vsel %vm2567_vm13, %v2565_v24, %v2566_v8  ;;  %v4255_v56 = vld [vmem:[%s4578_s26 + $0x448] sm:$0xff] }
 0x2cb   : > { %3370 = vxpose.xlu2.b32.cont [2/16] (narrow) %v2956_v44, 32  ;;  %1779 = vxpose.xlu1.b32.cont [2/16] (narrow) %v1462_v39, 72  ;;  %v5888_v44 = vsel %vm2571_vm0, %v2570_v33, %v2381_v11  ;;  %v2960_v39 = vand.u32 2147483647, %v4253_v63  ;;  %v6613_v11 = vld [vmem:[#allocation12_spill] sm:$0xff]  ;;  %v2803_v12 = vrot.slane %v2568_v15, 7 }
 0x2cc   : > { %3306 = vxpose.xlu0.b32.cont [2/16] (narrow) %v2924_v47, 32  ;;  %v2524_v47 = vrot.slane %v2523_v5, 2  ;;  %v2210_v37 = vrot.slane %v2209_v54, 2  ;;  %v2962_v46 = vand.u32 2147483647, %v4255_v56  ;;  %v4257_v63 = vld [vmem:[%s4578_s26 + $0x458] sm:$0xff] }
 0x2cd   : > { %v5890_v55 = vpop.trf.xlu1 }
 0x2ce   : > { %vm2525_vm10 = vcmp.lt.s32.totalorder %v2523_v5, %v2524_v47 }
 0x2cf   : > { %v2526_v60 = vsel %vm2525_vm10, %v2523_v5, %v2524_v47  ;;  %v4256_v5 = vld [vmem:[%s4578_s26 + $0x348] sm:$0xff] }
 0x2d0   : > { %v2527_v40 = vrot.slane %v2526_v60, 1  ;;  %v6614_v47 = vld [vmem:[#allocation13_spill] sm:$0xff] }
 0x2d2   : > { %vm2528_vm15 = vcmp.lt.s32.totalorder %v2526_v60, %v2527_v40 }
 0x2d3   : > { %3371 = vxpose.xlu2.b32.cont [3/16] (narrow) %v2958_v3, 32  ;;  %1780 = vxpose.xlu1.b32.cont [3/16] (narrow) %v6613_v11, 72  ;;  %v2211_v3 = vmax.f32 %v2209_v54, %v2210_v37  ;;  %v2930_v54 = vand.u32 2147483647, %v4256_v5 }
 0x2d4   : > { %3307 = vxpose.xlu0.b32.cont [3/16] (narrow) %v2926_v29, 32  ;;  %v2529_v29 = vsel %vm2528_vm15, %v2526_v60, %v2527_v40  ;;  %v3700_v60 = vadd.f32 %v5881_v31, %v5851_v49  ;;  %v4258_v40 = vld [vmem:[%s4578_s26 + $0x358] sm:$0xff] }
 0x2d5   : > { %v2212_v61 = vrot.slane %v2211_v3, 1  ;;  %v3364_v35 = vpop.trf.xlu1  ;;  %v5898_v1 = vsel %vm2810_vm12, %v2529_v29, %v2803_v12  ;;  %v2932_v15 = vand.u32 2147483647, %v4258_v40  ;;  %v4261_v40 = vld [vmem:[%s4578_s26 + $0x478] sm:$0xff] }
 0x2d7   : > { %v5895_v38 = vmax.f32 %v2211_v3, %v2212_v61 }
 0x2d9   : > { %vm2241_vm2 = vcmp.eq.f32.partialorder %v5662_v17, %v5895_v38  ;;  %vm2265_vm3 = vcmp.eq.f32.partialorder %v5748_v51, %v5895_v38  ;;  %vm2273_vm6 = vcmp.eq.f32.partialorder %v5781_v0, %v5895_v38  ;;  %vm2281_vm12 = vcmp.eq.f32.partialorder %v5805_v26, %v5895_v38  ;;  %v4259_v26 = vld [vmem:[%s4578_s26 + $0x468] sm:$0xff] }
 0x2da   : > { %vm2249_vm7 = vcmp.eq.f32.partialorder %v5690_v25, %v5895_v38  ;;  %vm2289_vm8 = vcmp.eq.f32.partialorder %v5825_v42, %v5895_v38  ;;  %vm2297_vm11 = vcmp.eq.f32.partialorder %v5849_v36, %v5895_v38  ;;  %vm2305_vm0 = vcmp.eq.f32.partialorder %v5885_v10, %v5895_v38 }
 0x2db   : > { %3372 = vxpose.xlu2.b32.cont [4/16] (narrow) %v2960_v39, 32  ;;  %1781 = vxpose.xlu1.b32.cont [4/16] (narrow) %v6614_v47, 72  ;;  %vm2257_vm4 = vcmp.eq.f32.partialorder %v5711_v52, %v5895_v38  ;;  %v2369_v17 = vsel %vm2241_vm2, %v5285_v20, 69  ;;  %v2377_v24 = vsel %vm2249_vm7, %v5358_v32, 69  ;;  %v2964_v39 = vand.u32 2147483647, %v4257_v63 }
 0x2dc   : > { %3308 = vxpose.xlu0.b32.cont [4/16] (narrow) %v2928_v28, 32  ;;  %v3289_v33 = vpop.trf.xlu2  ;;  %v2385_v8 = vsel %vm2257_vm4, %v5374_v16, 69  ;;  %vm2725_vm9 = vcmp.lt.s32.totalorder %v2369_v17, %v2377_v24  ;;  %v2393_v11 = vsel %vm2265_vm3, %v5389_v13, 69  ;;  %v2401_v61 = vsel %vm2273_vm6, %v5399_v27, 69 }
 0x2dd   : > { %v3365_v37 = vpop.trf.xlu1  ;;  %v2726_v52 = vsel %vm2725_vm9, %v2369_v17, %v2377_v24  ;;  %v3701_v51 = vadd.f32 %v3700_v60, %v5872_v6  ;;  %v2409_v49 = vsel %vm2281_vm12, %v5416_v7, 69  ;;  %v2417_v6 = vsel %vm2289_vm8, %v5428_v53, 69  ;;  %v6616_v17 = vld [vmem:[#allocation15_spill] sm:$0xff] }
 0x2de   : > { %vm2727_vm5 = vcmp.lt.s32.totalorder %v2726_v52, %v2385_v8  ;;  %vm4095_vm2 = vcmp.eq.f32.partialorder %v5895_v38, -inf  ;;  %vm2261_vm7 = vcmp.eq.f32.partialorder %v5704_v34, %v5855_v18  ;;  %vm2269_vm4 = vcmp.eq.f32.partialorder %v5737_v4, %v5855_v18 }
 0x2df   : > { %v2728_v12 = vsel %vm2727_vm5, %v2726_v52, %v2385_v8  ;;  %v3702_v29 = vadd.f32 %v3701_v51, %v5890_v55  ;;  %v2425_v55 = vsel %vm2297_vm11, %v5442_v2, 69  ;;  %v2449_v10 = vsel %vm4095_vm2, %v5480_v50, 69  ;;  %v6617_v51 = vld [vmem:[#allocation16_spill] sm:$0xff] }
 0x2e0   : > { %vm2729_vm10 = vcmp.lt.s32.totalorder %v2728_v12, %v2393_v11  ;;  %v2465_v34 = vsel %vm4095_vm2, %v5504_v41, 69  ;;  %v2397_v4 = vsel %vm2269_vm4, %v5399_v27, 69 }
 0x2e1   : > { %v2730_v31 = vsel %vm2729_vm10, %v2728_v12, %v2393_v11  ;;  %v3703_v5 = vadd.f32 %v3702_v29, %v3364_v35  ;;  %v2433_v35 = vsel %vm2305_vm0, %v5295_v30, 69 }
 0x2e2   : > { %vm2731_vm13 = vcmp.lt.s32.totalorder %v2730_v31, %v2401_v61 }
 0x2e3   : > { %3373 = vxpose.xlu2.b32.cont [5/16] (narrow) %v2962_v46, 32  ;;  %1782 = vxpose.xlu1.b32.cont [5/16] (narrow) %v6615_v23, 72  ;;  %v2732_v56 = vsel %vm2731_vm13, %v2730_v31, %v2401_v61  ;;  %v3704_v24 = vadd.f32 %v3703_v5, %v3365_v37  ;;  %v2441_v37 = vsel %vm4095_vm2, %v5468_v59, 69  ;;  %v2457_v61 = vsel %vm4095_vm2, %v5492_v22, 69  ;;  %v4262_v31 = vld [vmem:[%s4578_s26 + $0x378] sm:$0xff] }
 0x2e4   : > { %3309 = vxpose.xlu0.b32.cont [5/16] (narrow) %v2930_v54, 32  ;;  %v3290_v25 = vpop.trf.xlu2  ;;  %vm2733_vm15 = vcmp.lt.s32.totalorder %v2732_v56, %v2409_v49  ;;  %v2966_v54 = vand.u32 2147483647, %v4259_v26  ;;  %v2936_v29 = vand.u32 2147483647, %v4262_v31  ;;  %v2481_v26 = vsel %vm4095_vm2, %v5526_v19, 69 }
 0x2e5   : > { %v3668_v28 = vadd.f32 %v3290_v25, %v3289_v33  ;;  %v3366_v0 = vpop.trf.xlu1  ;;  %v2734_v47 = vsel %vm2733_vm15, %v2732_v56, %v2409_v49  ;;  %v4260_v25 = vld [vmem:[%s4578_s26 + $0x368] sm:$0xff]  ;;  %vm2277_vm15 = vcmp.eq.f32.partialorder %v5772_v62, %v5855_v18 }
 0x2e6   : > { %vm2735_vm3 = vcmp.lt.s32.totalorder %v2734_v47, %v2417_v6  ;;  %v2934_v8 = vand.u32 2147483647, %v4260_v25  ;;  %v3705_v36 = vadd.f32 %v3704_v24, %v3366_v0 }
 0x2e7   : > { %v2736_v63 = vsel %vm2735_vm3, %v2734_v47, %v2417_v6  ;;  %v2473_v6 = vsel %vm4095_vm2, %v5511_v21, 69 }
 0x2e8   : > { %v5932_v3 = vpop.trf.xlu0  ;;  %vm2737_vm6 = vcmp.lt.s32.totalorder %v2736_v63, %v2425_v55 }
 0x2eb   : > { %3374 = vxpose.xlu2.b32.cont [6/16] (narrow) %v2964_v39, 32  ;;  %1783 = vxpose.xlu1.b32.cont [6/16] (narrow) %v6616_v17, 72  ;;  %v2738_v39 = vsel %vm2737_vm6, %v2736_v63, %v2425_v55  ;;  %v4263_v17 = vld [vmem:[%s4578_s26 + $0x488] sm:$0xff]  ;;  %vm2285_vm6 = vcmp.eq.f32.partialorder %v5799_v45, %v5855_v18 }
 0x2ec   : > { %3310 = vxpose.xlu0.b32.cont [6/16] (narrow) %v2932_v15, 32  ;;  %v3291_v33 = vpop.trf.xlu2  ;;  %vm2739_vm12 = vcmp.lt.s32.totalorder %v2738_v39, %v2433_v35  ;;  %v2968_v15 = vand.u32 2147483647, %v4261_v40  ;;  %v2970_v24 = vand.u32 2147483647, %v4263_v17  ;;  %v6618_v63 = vld [vmem:[#allocation17_spill] sm:$0xff] }
 0x2ed   : > { %v3669_v46 = vadd.f32 %v3668_v28, %v3291_v33  ;;  %v3367_v52 = vpop.trf.xlu1  ;;  %v2740_v60 = vsel %vm2739_vm12, %v2738_v39, %v2433_v35  ;;  %v2389_v33 = vsel %vm2261_vm7, %v5389_v13, 69  ;;  %v6619_v40 = vld [vmem:[#allocation18_spill] sm:$0xff]  ;;  %vm2293_vm7 = vcmp.eq.f32.partialorder %v5819_v58, %v5855_v18 }
 0x2ee   : > { %v3706_v28 = vadd.f32 %v3705_v36, %v3367_v52  ;;  %vm2741_vm8 = vcmp.lt.s32.totalorder %v2740_v60, %v2441_v37  ;;  %vm2573_vm9 = vcmp.lt.s32.totalorder %v5888_v44, %v2389_v33  ;;  %v2405_v52 = vsel %vm2277_vm15, %v5416_v7, 69 }
 0x2ef   : > { %v2742_v12 = vsel %vm2741_vm8, %v2740_v60, %v2441_v37  ;;  %v2574_v25 = vsel %vm2573_vm9, %v5888_v44, %v2389_v33  ;;  %v4264_v37 = vld [vmem:[%s4578_s26 + $0x388] sm:$0xff]  ;;  %v6040_v58 = vsel %vm2714_vm14, %v5757_v9, %v5753_v14  ;;  %vm4091_vm14 = vcmp.eq.f32.partialorder %v5855_v18, -inf }
 0x2f0   : > { %v5956_v42 = vpop.trf.xlu0  ;;  %vm2743_vm11 = vcmp.lt.s32.totalorder %v2742_v12, %v2449_v10  ;;  %v2938_v39 = vand.u32 2147483647, %v4264_v37  ;;  %vm2575_vm3 = vcmp.lt.s32.totalorder %v2574_v25, %v2397_v4  ;;  %v6621_v37 = vld [vmem:[#allocation20_spill] sm:$0xff] }
 0x2f1   : > { %v2744_v0 = vsel %vm2743_vm11, %v2742_v12, %v2449_v10  ;;  %v2576_v10 = vsel %vm2575_vm3, %v2574_v25, %v2397_v4  ;;  %v2413_v12 = vsel %vm2285_vm6, %v5428_v53, 69  ;;  %v2130_v45 = vmax.f32 %v5932_v3, %v5956_v42 }
 0x2f2   : > { %vm2745_vm0 = vcmp.lt.s32.totalorder %v2744_v0, %v2457_v61  ;;  %vm2577_vm12 = vcmp.lt.s32.totalorder %v2576_v10, %v2405_v52  ;;  %vm2301_vm11 = vcmp.eq.f32.partialorder %v5842_v48, %v5855_v18 }
 0x2f3   : > { %3375 = vxpose.xlu2.b32.cont [7/16] (narrow) %v2966_v54, 32  ;;  %1784 = vxpose.xlu1.b32.cont [7/16] (narrow) %v6617_v51, 72  ;;  %v2746_v56 = vsel %vm2745_vm0, %v2744_v0, %v2457_v61  ;;  %v2578_v51 = vsel %vm2577_vm12, %v2576_v10, %v2405_v52  ;;  %v2429_v14 = vsel %vm2301_vm11, %v5295_v30, 69 }
 0x2f4   : > { %3311 = vxpose.xlu0.b32.cont [7/16] (narrow) %v2934_v8, 32  ;;  %v3292_v11 = vpop.trf.xlu2  ;;  %vm2747_vm5 = vcmp.lt.s32.totalorder %v2746_v56, %v2465_v34  ;;  %v6000_v8 = vsel %vm4095_vm2, %v6601_v57, 69  ;;  %vm2579_vm8 = vcmp.lt.s32.totalorder %v2578_v51, %v2413_v12 }
 0x2f5   : > { %v3670_v23 = vadd.f32 %v3669_v46, %v3292_v11  ;;  %v3368_v5 = vpop.trf.xlu1  ;;  %v2748_v54 = vsel %vm2747_vm5, %v2746_v56, %v2465_v34  ;;  %v4267_v34 = vld [vmem:[%s4578_s26 + $0x4a8] sm:$0xff] }
 0x2f6   : > { %v5992_v47 = vadd.f32 %v3706_v28, %v3368_v5  ;;  %vm2749_vm10 = vcmp.lt.s32.totalorder %v2748_v54, %v2473_v6  ;;  %v2974_v0 = vand.u32 2147483647, %v4267_v34 }
 0x2f7   : > { %v2750_v35 = vsel %vm2749_vm10, %v2748_v54, %v2473_v6  ;;  %v6620_v6 = vld [vmem:[#allocation19_spill] sm:$0xff]  ;;  %v2580_v54 = vsel %vm2579_vm8, %v2578_v51, %v2413_v12  ;;  %v6622_v51 = vld [vmem:[#allocation21_spill] sm:$0xff] }
 0x2f8   : > { %v5976_v49 = vpop.trf.xlu0  ;;  %vm2751_vm13 = vcmp.lt.s32.totalorder %v2750_v35, %v2481_v26 }
 0x2f9   : > { %v6006_v11 = vsel %vm2751_vm13, %v2750_v35, %v2481_v26  ;;  %v2421_v26 = vsel %vm2293_vm7, %v5442_v2, 69  ;;  %v4269_v35 = vld [vmem:[%s4578_s26 + $0x4b8] sm:$0xff] }
 0x2fa   : > { %vm2753_vm2 = vcmp.lt.s32.totalorder %v6006_v11, %v6000_v8  ;;  %vm2581_vm0 = vcmp.lt.s32.totalorder %v2580_v54, %v2421_v26 }
 0x2fb   : > { %3376 = vxpose.xlu2.b32.cont [8/16] (narrow) %v2968_v15, 32  ;;  %1785 = vxpose.xlu1.b32.cont [8/16] (narrow) %v6618_v63, 72  ;;  %v4266_v15 = vld [vmem:[%s4578_s26 + $0x398] sm:$0xff]  ;;  %v2976_v63 = vand.u32 2147483647, %v4269_v35  ;;  %v2582_v9 = vsel %vm2581_vm0, %v2580_v54, %v2421_v26 }
 0x2fc   : > { %3312 = vxpose.xlu0.b32.cont [8/16] (narrow) %v2936_v29, 32  ;;  %v3293_v46 = vpop.trf.xlu2  ;;  %v2940_v61 = vand.u32 2147483647, %v4266_v15  ;;  %vm2583_vm4 = vcmp.lt.s32.totalorder %v2582_v9, %v2429_v14  ;;  %v4274_v35 = vld [vmem:[%s4578_s26 + $0x3d8] sm:$0xff] }
 0x2fd   : > { %v3671_v55 = vadd.f32 %v3670_v23, %v3293_v46  ;;  %v6012_v38 = vpop.trf.xlu1  ;;  %v4265_v23 = vld [vmem:[%s4578_s26 + $0x498] sm:$0xff]  ;;  %v4268_v46 = vld [vmem:[%s4578_s26 + $0x3a8] sm:$0xff] }
 0x2fe   : > { %v2972_v28 = vand.u32 2147483647, %v4265_v23  ;;  %v2942_v5 = vand.u32 2147483647, %v4268_v46  ;;  %v2437_v23 = vsel %vm4091_vm14, %v5468_v59, 69 }
 0x300   : > { %v6003_v36 = vpop.trf.xlu0 }
 0x303   : > { %3377 = vxpose.xlu2.b32.cont [9/16] (narrow) %v2970_v24, 32  ;;  %1786 = vxpose.xlu1.b32.cont [9/16] (narrow) %v6619_v40, 72 }
 0x304   : > { %3313 = vxpose.xlu0.b32.cont [9/16] (narrow) %v2938_v39, 32  ;;  %v3294_v44 = vpop.trf.xlu2 }
 0x305   : > { %v3672_v60 = vadd.f32 %v3671_v55, %v3294_v44  ;;  %v6023_v29 = vpop.trf.xlu1  ;;  %v2131_v55 = vmax.f32 %v2130_v45, %v5976_v49  ;;  %v4270_v44 = vld [vmem:[%s4578_s26 + $0x3b8] sm:$0xff] }
 0x306   : > { %v2944_v48 = vand.u32 2147483647, %v4270_v44 }
 0x307   : > { %v2132_v25 = vmax.f32 %v2131_v55, %v6003_v36  ;;  %v4273_v55 = vld [vmem:[%s4578_s26 + $0x4d8] sm:$0xff] }
 0x308   : > { %v6019_v62 = vpop.trf.xlu0 }
 0x309   : > { %v2133_v52 = vmax.f32 %v2132_v25, %v6019_v62 }
 0x30b   : > { %3378 = vxpose.xlu2.b32.cont [10/16] (narrow) %v2972_v28, 32  ;;  %1787 = vxpose.xlu1.b32.cont [10/16] (narrow) %v6620_v6, 72  ;;  %v2584_v28 = vsel %vm2583_vm4, %v2582_v9, %v2429_v14  ;;  %v2453_v14 = vsel %vm4091_vm14, %v5492_v22, 69 }
 0x30c   : > { %3314 = vxpose.xlu0.b32.cont [10/16] (narrow) %v2940_v61, 32  ;;  %v3295_v31 = vpop.trf.xlu2  ;;  %v4271_v61 = vld [vmem:[%s4578_s26 + $0x4c8] sm:$0xff]  ;;  %vm2585_vm9 = vcmp.lt.s32.totalorder %v2584_v28, %v2437_v23 }
 0x30d   : > { %v3673_v33 = vadd.f32 %v3672_v60, %v3295_v31  ;;  %v6045_v24 = vpop.trf.xlu1  ;;  %v2978_v12 = vand.u32 2147483647, %v4271_v61  ;;  %v2586_v6 = vsel %vm2585_vm9, %v2584_v28, %v2437_v23  ;;  %v4275_v28 = vld [vmem:[%s4578_s26 + $0x4e8] sm:$0xff] }
 0x310   : > { %v6031_v56 = vpop.trf.xlu0 }
 0x311   : > { %v2134_v15 = vmax.f32 %v2133_v52, %v6031_v56 }
 0x313   : > { %3379 = vxpose.xlu2.b32.cont [11/16] (narrow) %v2974_v0, 32  ;;  %1788 = vxpose.xlu1.b32.cont [11/16] (narrow) %v6621_v37, 72  ;;  %v2445_v0 = vsel %vm4091_vm14, %v5480_v50, 69 }
 0x314   : > { %3315 = vxpose.xlu0.b32.cont [11/16] (narrow) %v2942_v5, 32  ;;  %v3296_v17 = vpop.trf.xlu2  ;;  %vm2587_vm5 = vcmp.lt.s32.totalorder %v2586_v6, %v2445_v0 }
 0x315   : > { %v3674_v4 = vadd.f32 %v3673_v33, %v3296_v17  ;;  %v6056_v60 = vpop.trf.xlu1  ;;  %v4272_v33 = vld [vmem:[%s4578_s26 + $0x3c8] sm:$0xff]  ;;  %v2980_v17 = vand.u32 2147483647, %v4273_v55  ;;  %v2588_v9 = vsel %vm2587_vm5, %v2586_v6, %v2445_v0 }
 0x316   : > { %v2946_v45 = vand.u32 2147483647, %v4272_v33  ;;  %vm2589_vm10 = vcmp.lt.s32.totalorder %v2588_v9, %v2453_v14  ;;  %v4276_v33 = vld [vmem:[%s4578_s26 + $0x3e8] sm:$0xff] }
 0x317   : > { %v2590_v61 = vsel %vm2589_vm10, %v2588_v9, %v2453_v14  ;;  %v2477_v9 = vsel %vm4091_vm14, %v5526_v19, 69 }
 0x318   : > { %v6051_v39 = vpop.trf.xlu0 }
 0x319   : > { %v2135_v34 = vmax.f32 %v2134_v15, %v6051_v39  ;;  %v2461_v15 = vsel %vm4091_vm14, %v5504_v41, 69 }
 0x31a   : > { %vm2591_vm13 = vcmp.lt.s32.totalorder %v2590_v61, %v2461_v15 }
 0x31b   : > { %3380 = vxpose.xlu2.b32.cont [12/16] (narrow) %v2976_v63, 32  ;;  %1789 = vxpose.xlu1.b32.cont [12/16] (narrow) %v6622_v51, 72  ;;  %v2948_v63 = vand.u32 2147483647, %v4274_v35  ;;  %v2592_v55 = vsel %vm2591_vm13, %v2590_v61, %v2461_v15  ;;  %v6625_v35 = vld [vmem:[#allocation24_spill] sm:$0xff] }
 0x31c   : > { %3316 = vxpose.xlu0.b32.cont [12/16] (narrow) %v2944_v48, 32  ;;  %v3297_v10 = vpop.trf.xlu2 }
 0x31d   : > { %v3675_v40 = vadd.f32 %v3674_v4, %v3297_v10  ;;  %v6071_v5 = vpop.trf.xlu1  ;;  %v6623_v4 = vld [vmem:[#allocation22_spill] sm:$0xff] }
 0x320   : > { %v6064_v31 = vpop.trf.xlu0 }
 0x321   : > { %v2136_v54 = vmax.f32 %v2135_v34, %v6064_v31 }
 0x323   : > { %3381 = vxpose.xlu2.b32.cont [13/16] (narrow) %v2978_v12, 32  ;;  %1790 = vxpose.xlu1.b32.cont [13/16] (narrow) %v6623_v4, 72  ;;  %v6624_v12 = vld [vmem:[#allocation23_spill] sm:$0xff] }
 0x324   : > { %3317 = vxpose.xlu0.b32.cont [13/16] (narrow) %v2946_v45, 32  ;;  %v3298_v46 = vpop.trf.xlu2  ;;  %v2950_v45 = vand.u32 2147483647, %v4276_v33  ;;  %v4277_v4 = vld [vmem:[%s4578_s26 + $0x4f8] sm:$0xff] }
 0x325   : > { %v6073_v26 = vadd.f32 %v3675_v40, %v3298_v46  ;;  %v6087_v10 = vpop.trf.xlu1  ;;  %v2982_v40 = vand.u32 2147483647, %v4275_v28  ;;  %v4279_v28 = vld [vmem:[%s4578_s26 + $0x500] sm:$0xff] }
 0x328   : > { %v1770_v25 = vpop.trf.xlu0 }
 0x329   : > { %v6084_v37 = vsel %vm1931_vm1, %v1770_v25, -inf  ;;  %v2984_v25 = vand.u32 2147483647, %v4277_v4 }
 0x32a   : > { %v2137_v44 = vmax.f32 %v2136_v54, %v6084_v37  ;;  %v2469_v54 = vsel %vm4091_vm14, %v5511_v21, 69 }
 0x32b   : > { %3382 = vxpose.xlu2.b32.cont [14/16] (narrow) %v2980_v17, 32  ;;  %1791 = vxpose.xlu1.b32.cont [14/16] (narrow) %v6624_v12, 72  ;;  %vm2593_vm15 = vcmp.lt.s32.totalorder %v2592_v55, %v2469_v54  ;;  %v4280_v12 = vld [vmem:[%s4578_s26 + $0x600] sm:$0xff] }
 0x32c   : > { %v2145_v48 = vrot.slane %v2137_v44, 4  ;;  %3318 = vxpose.xlu0.b32.cont [14/16] (narrow) %v2948_v63, 32  ;;  %v3299_v52 = vpop.trf.xlu2  ;;  %v4278_v63 = vld [vmem:[%s4578_s26 + $0x3f8] sm:$0xff] }
 0x32d   : > { %v6095_v46 = vpop.trf.xlu1  ;;  %v2952_v14 = vand.u32 2147483647, %v4278_v63  ;;  %v3677_v61 = vadd.f32 %v6073_v26, %v3299_v52 }
 0x32e   : > { %v2146_v23 = vmax.f32 %v2137_v44, %v2145_v48  ;;  %v2594_v44 = vsel %vm2593_vm15, %v2592_v55, %v2469_v54  ;;  %v2214_v48 = vmax.f32 %v6012_v38, %v6023_v29 }
 0x32f   : > { %vm2595_vm8 = vcmp.lt.s32.totalorder %v2594_v44, %v2477_v9 }
 0x330   : > { %v2147_v51 = vrot.slane %v2146_v23, 2  ;;  %v2596_v26 = vsel %vm2595_vm8, %v2594_v44, %v2477_v9 }
 0x332   : > { %v2148_v34 = vmax.f32 %v2146_v23, %v2147_v51  ;;  %v3017_v51 = vand.u32 2147483647, %v4280_v12 }
 0x333   : > { %3383 = vxpose.xlu2.b32.cont [15/16] (narrow) %v2982_v40, 32  ;;  %1792 = vxpose.xlu1.b32.cont [15/16] (narrow) %v6625_v35, 72  ;;  %v2985_v40 = vand.u32 2147483647, %v4279_v28 }
 0x334   : > { %v2149_v0 = vrot.slane %v2148_v34, 1  ;;  %3319 = vxpose.xlu0.b32.cont [15/16] (narrow) %v2950_v45, 32  ;;  %v3300_v6 = vpop.trf.xlu2  ;;  %v2215_v45 = vmax.f32 %v2214_v48, %v6045_v24  ;;  %v4282_v48 = vld [vmem:[%s4578_s26 + $0x510] sm:$0xff] }
 0x336   : > { %v6100_v17 = vmax.f32 %v2148_v34, %v2149_v0  ;;  %v6626_v34 = vld [vmem:[#allocation25_spill] sm:$0xff]  ;;  %v2485_v0 = vsel %vm4091_vm14, %v6601_v57, 69  ;;  %v2216_v55 = vmax.f32 %v2215_v45, %v6056_v60 }
 0x337   : > { %vm2597_vm14 = vcmp.lt.s32.totalorder %v2596_v26, %v2485_v0 }
 0x338   : > { %vm2238_vm3 = vcmp.eq.f32.partialorder %v5932_v3, %v6100_v17  ;;  %vm2246_vm6 = vcmp.eq.f32.partialorder %v5956_v42, %v6100_v17  ;;  %vm2254_vm12 = vcmp.eq.f32.partialorder %v5976_v49, %v6100_v17  ;;  %vm2262_vm7 = vcmp.eq.f32.partialorder %v6003_v36, %v6100_v17  ;;  %v6122_v49 = vpop.trf.xlu1 }
 0x339   : > { %v2366_v23 = vsel %vm2238_vm3, %v5285_v20, 69  ;;  %v2374_v3 = vsel %vm2246_vm6, %v5358_v32, 69  ;;  %v2382_v15 = vsel %vm2254_vm12, %v5374_v16, 69  ;;  %vm2270_vm11 = vcmp.eq.f32.partialorder %v6019_v62, %v6100_v17 }
 0x33a   : > { %vm2608_vm0 = vcmp.lt.s32.totalorder %v2366_v23, %v2374_v3  ;;  %v2390_v36 = vsel %vm2262_vm7, %v5389_v13, 69  ;;  %vm2278_vm4 = vcmp.eq.f32.partialorder %v6031_v56, %v6100_v17  ;;  %v3678_v62 = vadd.f32 %v3677_v61, %v3300_v6 }
 0x33b   : > { %3384 = vxpose.xlu2.b32.end [16/16] (narrow) %v2984_v25, 32  ;;  %v2609_v33 = vsel %vm2608_vm0, %v2366_v23, %v2374_v3  ;;  %1793 = vxpose.xlu1.b32.end [16/16] (narrow) %v6626_v34, 72  ;;  %v2398_v52 = vsel %vm2270_vm11, %v5399_v27, 69  ;;  %vm2286_vm5 = vcmp.eq.f32.partialorder %v6051_v39, %v6100_v17  ;;  %v4281_v25 = vld [vmem:[%s4578_s26 + $0x508] sm:$0xff]  ;;  %v2406_v35 = vsel %vm2278_vm4, %v5416_v7, 69  ;;  %v4283_v3 = vld [vmem:[%s4578_s26 + $0x610] sm:$0xff] }
 0x33c   : > { %3320 = vxpose.xlu0.b32.end [16/16] (narrow) %v2952_v14, 32  ;;  %v3301_v42 = vpop.trf.xlu2  ;;  %vm2610_vm9 = vcmp.lt.s32.totalorder %v2609_v33, %v2382_v15  ;;  %v2986_v18 = vand.u32 2147483647, %v4281_v25  ;;  %v2217_v56 = vmax.f32 %v2216_v55, %v6071_v5  ;;  %vm2294_vm13 = vcmp.eq.f32.partialorder %v6064_v31, %v6100_v17 }
 0x33d   : > { %v2611_v54 = vsel %vm2610_vm9, %v2609_v33, %v2382_v15  ;;  %v3679_v4 = vadd.f32 %v3678_v62, %v3301_v42  ;;  %v2414_v39 = vsel %vm2286_vm5, %v5428_v53, 69  ;;  %v2987_v23 = vand.u32 2147483647, %v4282_v48  ;;  %v4284_v33 = vld [vmem:[%s4578_s26 + $0x518] sm:$0xff] }
 0x33e   : > { %vm2612_vm10 = vcmp.lt.s32.totalorder %v2611_v54, %v2390_v36  ;;  %v2218_v44 = vmax.f32 %v2217_v56, %v6087_v10  ;;  %vm2302_vm3 = vcmp.eq.f32.partialorder %v6084_v37, %v6100_v17  ;;  %v3019_v42 = vand.u32 2147483647, %v4283_v3  ;;  %v4287_v3 = vld [vmem:[%s4578_s26 + $0x528] sm:$0xff] }
 0x33f   : > { %v2613_v63 = vsel %vm2612_vm10, %v2611_v54, %v2390_v36  ;;  %v2422_v31 = vsel %vm2294_vm13, %v5442_v2, 69  ;;  %vm4092_vm12 = vcmp.eq.f32.partialorder %v6100_v17, -inf  ;;  %v2598_v37 = vsel %vm2597_vm14, %v2596_v26, %v2485_v0  ;;  %v4290_v17 = vld [vmem:[%s4578_s26 + $0x538] sm:$0xff] }
 0x340   : > { %vm2614_vm15 = vcmp.lt.s32.totalorder %v2613_v63, %v2398_v52  ;;  %v1898_v15 = vpop.trf.xlu1  ;;  %v2430_v12 = vsel %vm2302_vm3, %v5295_v30, 69  ;;  %v2988_v45 = vand.u32 2147483647, %v4284_v33  ;;  %v2438_v34 = vsel %vm4092_vm12, %v5468_v59, 69 }
 0x341   : > { %v2615_v14 = vsel %vm2614_vm15, %v2613_v63, %v2398_v52  ;;  %v6156_v61 = vsel %vm1931_vm1, %v1898_v15, -inf  ;;  %v2599_v54 = vrot.slane %v2598_v37, 4  ;;  %v2446_v26 = vsel %vm4092_vm12, %v5480_v50, 69 }
 0x342   : > { %vm2616_vm6 = vcmp.lt.s32.totalorder %v2615_v14, %v2406_v35  ;;  %v2454_v63 = vsel %vm4092_vm12, %v5492_v22, 69  ;;  %v2478_v15 = vsel %vm4092_vm12, %v5526_v19, 69 }
 0x343   : > { %3465 = vxpose.xlu2.b32.start [1/16] %v3017_v51, 128  ;;  %v2617_v28 = vsel %vm2616_vm6, %v2615_v14, %v2406_v35  ;;  %3433 = vxpose.xlu1.b32.start [1/16] (narrow) %v2986_v18, 32  ;;  %v4285_v18 = vld [vmem:[%s4578_s26 + $0x620] sm:$0xff]  ;;  %vm2600_vm4 = vcmp.lt.s32.totalorder %v2598_v37, %v2599_v54 }
 0x344   : > { %3401 = vxpose.xlu0.b32.start [1/16] %v2985_v40, 128  ;;  %v3302_v6 = vpop.trf.xlu2  ;;  %v2219_v40 = vmax.f32 %v2218_v44, %v6095_v46  ;;  %vm2618_vm7 = vcmp.lt.s32.totalorder %v2617_v28, %v2414_v39  ;;  %v3021_v35 = vand.u32 2147483647, %v4285_v18 }
 0x345   : > { %v3680_v9 = vadd.f32 %v3679_v4, %v3302_v6  ;;  %v2619_v51 = vsel %vm2618_vm7, %v2617_v28, %v2414_v39  ;;  %v4286_v39 = vld [vmem:[%s4578_s26 + $0x520] sm:$0xff] }
 0x346   : > { %v2220_v36 = vmax.f32 %v2219_v40, %v6122_v49  ;;  %vm2620_vm8 = vcmp.lt.s32.totalorder %v2619_v51, %v2422_v31  ;;  %v2989_v14 = vand.u32 2147483647, %v4286_v39 }
 0x347   : > { %v2621_v62 = vsel %vm2620_vm8, %v2619_v51, %v2422_v31  ;;  %v2470_v31 = vsel %vm4092_vm12, %v5511_v21, 69 }
 0x348   : > { %v2221_v52 = vmax.f32 %v2220_v36, %v6156_v61  ;;  %vm2622_vm11 = vcmp.lt.s32.totalorder %v2621_v62, %v2430_v12 }
 0x349   : > { %v2623_v55 = vsel %vm2622_vm11, %v2621_v62, %v2430_v12 }
 0x34a   : > { %v2229_v25 = vrot.slane %v2221_v52, 4  ;;  %vm2624_vm0 = vcmp.lt.s32.totalorder %v2623_v55, %v2438_v34 }
 0x34b   : > { %3466 = vxpose.xlu2.b32.cont [2/16] %v3019_v42, 128  ;;  %v2625_v56 = vsel %vm2624_vm0, %v2623_v55, %v2438_v34  ;;  %3434 = vxpose.xlu1.b32.cont [2/16] (narrow) %v2988_v45, 32  ;;  %v2990_v42 = vand.u32 2147483647, %v4287_v3  ;;  %v4288_v45 = vld [vmem:[%s4578_s26 + $0x630] sm:$0xff]  ;;  %v6627_v3 = vld [vmem:[#allocation27_spill] sm:$0xff] }
 0x34c   : > { %3402 = vxpose.xlu0.b32.cont [2/16] %v2987_v23, 128  ;;  %v3303_v0 = vpop.trf.xlu2  ;;  %v2230_v6 = vmax.f32 %v2221_v52, %v2229_v25  ;;  %vm2626_vm9 = vcmp.lt.s32.totalorder %v2625_v56, %v2446_v26  ;;  %v2601_v23 = vsel %vm2600_vm4, %v2598_v37, %v2599_v54  ;;  %v3023_v34 = vand.u32 2147483647, %v4288_v45  ;;  %v4289_v54 = vld [vmem:[%s4578_s26 + $0x530] sm:$0xff] }
 0x34d   : > { %v3681_v4 = vadd.f32 %v3680_v9, %v3303_v0  ;;  %v2462_v9 = vsel %vm4092_vm12, %v5504_v41, 69  ;;  %v2627_v44 = vsel %vm2626_vm9, %v2625_v56, %v2446_v26  ;;  %v2602_v33 = vrot.slane %v2601_v23, 2 }
 0x34e   : > { %v2231_v48 = vrot.slane %v2230_v6, 2  ;;  %vm2628_vm5 = vcmp.lt.s32.totalorder %v2627_v44, %v2454_v63  ;;  %v2991_v0 = vand.u32 2147483647, %v4289_v54  ;;  %v2486_v26 = vsel %vm4092_vm12, %v6601_v57, 69 }
 0x34f   : > { %v2629_v28 = vsel %vm2628_vm5, %v2627_v44, %v2454_v63  ;;  %vm2603_vm6 = vcmp.lt.s32.totalorder %v2601_v23, %v2602_v33 }
 0x350   : > { %v2232_v40 = vmax.f32 %v2230_v6, %v2231_v48  ;;  %vm2630_vm10 = vcmp.lt.s32.totalorder %v2629_v28, %v2462_v9  ;;  %v2604_v18 = vsel %vm2603_vm6, %v2601_v23, %v2602_v33  ;;  %v4291_v6 = vld [vmem:[%s4578_s26 + $0x640] sm:$0xff]  ;;  %v6630_v33 = vld [vmem:[#allocation30_spill] sm:$0xff] }
 0x351   : > { %v2631_v51 = vsel %vm2630_vm10, %v2629_v28, %v2462_v9  ;;  %v3025_v39 = vand.u32 2147483647, %v4291_v6  ;;  %v2605_v44 = vrot.slane %v2604_v18, 1 }
 0x352   : > { %v2233_v36 = vrot.slane %v2232_v40, 1  ;;  %vm2632_vm14 = vcmp.lt.s32.totalorder %v2631_v51, %v2470_v31 }
 0x353   : > { %3467 = vxpose.xlu2.b32.cont [3/16] %v3021_v35, 128  ;;  %v2633_v62 = vsel %vm2632_vm14, %v2631_v51, %v2470_v31  ;;  %3435 = vxpose.xlu1.b32.cont [3/16] (narrow) %v2990_v42, 32  ;;  %v3658_v42 = vadd.f32 %v5670_v43, %v6627_v3  ;;  %v4293_v31 = vld [vmem:[%s4578_s26 + $0x548] sm:$0xff] }
 0x354   : > { %3403 = vxpose.xlu0.b32.cont [3/16] %v2989_v14, 128  ;;  %v3304_v12 = vpop.trf.xlu2  ;;  %v6187_v52 = vmax.f32 %v2232_v40, %v2233_v36  ;;  %vm2634_vm13 = vcmp.lt.s32.totalorder %v2633_v62, %v2478_v15  ;;  %v2994_v28 = vand.u32 2147483647, %v4293_v31 }
 0x355   : > { %v6184_v37 = vadd.f32 %v3681_v4, %v3304_v12  ;;  %v2635_v55 = vsel %vm2634_vm13, %v2633_v62, %v2478_v15  ;;  %v2992_v4 = vand.u32 2147483647, %v4290_v17  ;;  %v3659_v45 = vadd.f32 %v3658_v42, %v6630_v33  ;;  %v4299_v33 = vld [vmem:[%s4578_s26 + $0x568] sm:$0xff] }
 0x356   : > { %vm2242_vm15 = vcmp.eq.f32.partialorder %v6012_v38, %v6187_v52  ;;  %vm2258_vm3 = vcmp.eq.f32.partialorder %v6045_v24, %v6187_v52  ;;  %vm2250_vm7 = vcmp.eq.f32.partialorder %v6023_v29, %v6187_v52  ;;  %vm2266_vm8 = vcmp.eq.f32.partialorder %v6056_v60, %v6187_v52 }
 0x357   : > { %vm2274_vm11 = vcmp.eq.f32.partialorder %v6071_v5, %v6187_v52  ;;  %vm2282_vm12 = vcmp.eq.f32.partialorder %v6087_v10, %v6187_v52  ;;  %vm2290_vm0 = vcmp.eq.f32.partialorder %v6095_v46, %v6187_v52  ;;  %vm2298_vm4 = vcmp.eq.f32.partialorder %v6122_v49, %v6187_v52 }
 0x358   : > { %vm2306_vm9 = vcmp.eq.f32.partialorder %v6156_v61, %v6187_v52  ;;  %vm2636_vm5 = vcmp.lt.s32.totalorder %v2635_v55, %v2486_v26  ;;  %v2370_v63 = vsel %vm2242_vm15, %v5285_v20, 69  ;;  %v2378_v56 = vsel %vm2250_vm7, %v5358_v32, 69 }
 0x359   : > { %v2386_v14 = vsel %vm2258_vm3, %v5374_v16, 69  ;;  %vm2764_vm10 = vcmp.lt.s32.totalorder %v2370_v63, %v2378_v56  ;;  %v2637_v38 = vsel %vm2636_vm5, %v2635_v55, %v2486_v26  ;;  %v2394_v29 = vsel %vm2266_vm8, %v5389_v13, 69  ;;  %v4295_v26 = vld [vmem:[%s4578_s26 + $0x550] sm:$0xff] }
 0x35a   : > { %v2765_v48 = vsel %vm2764_vm10, %v2370_v63, %v2378_v56  ;;  %v2638_v23 = vrot.slane %v2637_v38, 4  ;;  %v2402_v24 = vsel %vm2274_vm11, %v5399_v27, 69  ;;  %vm6238_vm3 = vcmp.lt.s32.totalorder %v2604_v18, %v2605_v44  ;;  %v4296_v56 = vld [vmem:[%s4578_s26 + $0x558] sm:$0xff] }
 0x35b   : > { %3468 = vxpose.xlu2.b32.cont [4/16] %v3023_v34, 128  ;;  %3436 = vxpose.xlu1.b32.cont [4/16] (narrow) %v2992_v4, 32  ;;  %vm2766_vm14 = vcmp.lt.s32.totalorder %v2765_v48, %v2386_v14  ;;  %v2410_v12 = vsel %vm2282_vm12, %v5416_v7, 69  ;;  %v4294_v34 = vld [vmem:[%s4578_s26 + $0x650] sm:$0xff]  ;;  %v2418_v54 = vsel %vm2290_vm0, %v5428_v53, 69  ;;  %v2995_v10 = vand.u32 2147483647, %v4295_v26 }
 0x35c   : > { %3404 = vxpose.xlu0.b32.cont [4/16] %v2991_v0, 128  ;;  %v3385_v25 = vpop.trf.xlu2  ;;  %v2767_v40 = vsel %vm2766_vm14, %v2765_v48, %v2386_v14  ;;  %vm2639_vm13 = vcmp.lt.s32.totalorder %v2637_v38, %v2638_v23  ;;  %v3027_v62 = vand.u32 2147483647, %v4294_v34  ;;  %v2607_v17 = vsel %vm6238_vm3, %v2604_v18, %v2605_v44 }
 0x35d   : > { %v3708_v35 = vadd.f32 %v5992_v47, %v3385_v25  ;;  %v4292_v47 = vld [vmem:[%s4578_s26 + $0x540] sm:$0xff]  ;;  %vm2768_vm15 = vcmp.lt.s32.totalorder %v2767_v40, %v2394_v29  ;;  %v2640_v43 = vsel %vm2639_vm13, %v2637_v38, %v2638_v23  ;;  %v2426_v25 = vsel %vm2298_vm4, %v5442_v2, 69 }
 0x35e   : > { %v2993_v9 = vand.u32 2147483647, %v4292_v47  ;;  %v2769_v5 = vsel %vm2768_vm15, %v2767_v40, %v2394_v29  ;;  %v2641_v36 = vrot.slane %v2640_v43, 2  ;;  %v2996_v6 = vand.u32 2147483647, %v4296_v56  ;;  %v4297_v23 = vld [vmem:[%s4578_s26 + $0x660] sm:$0xff] }
 0x35f   : > { %vm2770_vm6 = vcmp.lt.s32.totalorder %v2769_v5, %v2402_v24  ;;  %vm4096_vm11 = vcmp.eq.f32.partialorder %v6187_v52, -inf  ;;  %v2434_v18 = vsel %vm2306_vm9, %v5295_v30, 69  ;;  %vm2812_vm5 = vcmask 1042434   ;;  %v4304_v52 = vld [vmem:[%s4578_s26 + $0x580] sm:$0xff] }
 0x360   : > { %v2771_v0 = vsel %vm2770_vm6, %v2769_v5, %v2402_v24  ;;  %vm2642_vm7 = vcmp.lt.s32.totalorder %v2640_v43, %v2641_v36  ;;  %vm2814_vm10 = vcmask 1041408   ;;  %v2442_v38 = vsel %vm4096_vm11, %v5468_v59, 69  ;;  %v4298_v24 = vld [vmem:[%s4578_s26 + $0x560] sm:$0xff] }
 0x361   : > { %vm2772_vm8 = vcmp.lt.s32.totalorder %v2771_v0, %v2410_v12  ;;  %v2643_v4 = vsel %vm2642_vm7, %v2640_v43, %v2641_v36  ;;  %v3029_v3 = vand.u32 2147483647, %v4297_v23  ;;  %v2450_v42 = vsel %vm4096_vm11, %v5480_v50, 69 }
 0x362   : > { %v2644_v63 = vrot.slane %v2643_v4, 1  ;;  %v2997_v40 = vand.u32 2147483647, %v4298_v24  ;;  %v2458_v5 = vsel %vm4096_vm11, %v5492_v22, 69  ;;  %v2466_v34 = vsel %vm4096_vm11, %v5504_v41, 69 }
 0x363   : > { %3469 = vxpose.xlu2.b32.cont [5/16] %v3025_v39, 128  ;;  %3437 = vxpose.xlu1.b32.cont [5/16] (narrow) %v2994_v28, 32  ;;  %v6631_v39 = vld [vmem:[#allocation33_spill] sm:$0xff]  ;;  %v2490_v56 = vsel %vm4096_vm11, %v6601_v57, 69 }
 0x364   : > { %3405 = vxpose.xlu0.b32.cont [5/16] %v2993_v9, 128  ;;  %v3386_v60 = vpop.trf.xlu2  ;;  %v3660_v14 = vadd.f32 %v3659_v45, %v6631_v39  ;;  %vm2645_vm0 = vcmp.lt.s32.totalorder %v2643_v4, %v2644_v63  ;;  %v2998_v45 = vand.u32 2147483647, %v4299_v33 }
 0x365   : > { %v3709_v51 = vadd.f32 %v3708_v35, %v3386_v60  ;;  %v2773_v35 = vsel %vm2772_vm8, %v2771_v0, %v2410_v12  ;;  %v2646_v44 = vsel %vm2645_vm0, %v2643_v4, %v2644_v63  ;;  %v6632_v60 = vld [vmem:[#allocation37_spill] sm:$0xff]  ;;  %v2474_v0 = vsel %vm4096_vm11, %v5511_v21, 69 }
 0x366   : > { %vm2774_vm12 = vcmp.lt.s32.totalorder %v2773_v35, %v2418_v54  ;;  %v2805_v48 = vrot.slane %v2646_v44, 5  ;;  %v3661_v15 = vadd.f32 %v3660_v14, %v6632_v60  ;;  %v4302_v14 = vld [vmem:[%s4578_s26 + $0x578] sm:$0xff]  ;;  %v4303_v44 = vld [vmem:[%s4578_s26 + $0x680] sm:$0xff] }
 0x367   : > { %v2775_v47 = vsel %vm2774_vm12, %v2773_v35, %v2418_v54  ;;  %v6267_v49 = vpop.trf.xlu1 }
 0x368   : > { %v3321_v55 = vpop.trf.xlu0  ;;  %vm2776_vm4 = vcmp.lt.s32.totalorder %v2775_v47, %v2426_v25 }
 0x369   : > { %v3683_v46 = vadd.f32 %v6184_v37, %v3321_v55  ;;  %v2804_v37 = vrot.slane %v2607_v17, 6  ;;  %v2777_v61 = vsel %vm2776_vm4, %v2775_v47, %v2426_v25  ;;  %v2482_v17 = vsel %vm4096_vm11, %v5526_v19, 69  ;;  %v4301_v25 = vld [vmem:[%s4578_s26 + $0x570] sm:$0xff] }
 0x36a   : > { %vm2778_vm9 = vcmp.lt.s32.totalorder %v2777_v61, %v2434_v18  ;;  %v2999_v35 = vand.u32 2147483647, %v4301_v25  ;;  %v4310_v25 = vld [vmem:[%s4578_s26 + $0x5a0] sm:$0xff] }
 0x36b   : > { %3470 = vxpose.xlu2.b32.cont [6/16] %v3027_v62, 128  ;;  %v2779_v31 = vsel %vm2778_vm9, %v2777_v61, %v2434_v18  ;;  %3438 = vxpose.xlu1.b32.cont [6/16] (narrow) %v2996_v6, 32  ;;  %v2813_v28 = vsel %vm2812_vm5, %v2804_v37, %v2805_v48  ;;  %v3000_v18 = vand.u32 2147483647, %v4302_v14  ;;  %v3001_v61 = vand.u32 2147483647, %v4304_v52 }
 0x36c   : > { %3406 = vxpose.xlu0.b32.cont [6/16] %v2995_v10, 128  ;;  %v3387_v9 = vpop.trf.xlu2  ;;  %vm2780_vm14 = vcmp.lt.s32.totalorder %v2779_v31, %v2442_v38  ;;  %v6283_v12 = vsel %vm2814_vm10, %v5898_v1, %v2813_v28  ;;  %v3662_v1 = vrot.slane %v3661_v15, 4  ;;  %v4300_v10 = vld [vmem:[%s4578_s26 + $0x670] sm:$0xff] }
 0x36d   : > { %v6272_v29 = vadd.f32 %v3709_v51, %v3387_v9  ;;  %v2781_v51 = vsel %vm2780_vm14, %v2779_v31, %v2442_v38  ;;  %v3031_v55 = vand.u32 2147483647, %v4300_v10  ;;  %v3033_v38 = vand.u32 2147483647, %v4303_v44 }
 0x36e   : > { %vm2782_vm13 = vcmp.lt.s32.totalorder %v2781_v51, %v2450_v42 }
 0x36f   : > { %v2783_v62 = vsel %vm2782_vm13, %v2781_v51, %v2450_v42  ;;  %v6292_v54 = vpop.trf.xlu1  ;;  %v4305_v42 = vld [vmem:[%s4578_s26 + $0x588] sm:$0xff]  ;;  %v4307_v51 = vld [vmem:[%s4578_s26 + $0x590] sm:$0xff] }
 0x370   : > { %v3322_v43 = vpop.trf.xlu0  ;;  %vm2784_vm15 = vcmp.lt.s32.totalorder %v2783_v62, %v2458_v5  ;;  %v3002_v31 = vand.u32 2147483647, %v4305_v42  ;;  %v4312_v42 = vld [vmem:[%s4578_s26 + $0x6b0] sm:$0xff] }
 0x371   : > { %v3684_v36 = vadd.f32 %v3683_v46, %v3322_v43  ;;  %v2785_v26 = vsel %vm2784_vm15, %v2783_v62, %v2458_v5  ;;  %v3663_v46 = vadd.f32 %v3662_v1, %v3661_v15  ;;  %v4306_v15 = vld [vmem:[%s4578_s26 + $0x690] sm:$0xff]  ;;  %v4308_v1 = vld [vmem:[%s4578_s26 + $0x598] sm:$0xff] }
 0x372   : > { %vm2786_vm3 = vcmp.lt.s32.totalorder %v2785_v26, %v2466_v34  ;;  %v3035_v43 = vand.u32 2147483647, %v4306_v15 }
 0x373   : > { %3471 = vxpose.xlu2.b32.cont [7/16] %v3029_v3, 128  ;;  %v2787_v4 = vsel %vm2786_vm3, %v2785_v26, %v2466_v34  ;;  %3439 = vxpose.xlu1.b32.cont [7/16] (narrow) %v2998_v45, 32  ;;  %v3664_v9 = vrot.slane %v3663_v46, 2 }
 0x374   : > { %3407 = vxpose.xlu0.b32.cont [7/16] %v2997_v40, 128  ;;  %vm2788_vm6 = vcmp.lt.s32.totalorder %v2787_v4, %v2474_v0 }
 0x375   : > { %v2789_v6 = vsel %vm2788_vm6, %v2787_v4, %v2474_v0  ;;  %v3665_v48 = vadd.f32 %v3664_v9, %v3663_v46  ;;  %v3004_v0 = vand.u32 2147483647, %v4308_v1 }
 0x376   : > { %vm2790_vm7 = vcmp.lt.s32.totalorder %v2789_v6, %v2482_v17 }
 0x377   : > { %v2791_v47 = vsel %vm2790_vm7, %v2789_v6, %v2482_v17  ;;  %v6306_v37 = vpop.trf.xlu1  ;;  %v3666_v40 = vrot.slane %v3665_v48, 1 }
 0x378   : > { %v3323_v63 = vpop.trf.xlu0  ;;  %vm2792_vm8 = vcmp.lt.s32.totalorder %v2791_v47, %v2490_v56 }
 0x379   : > { %v3685_v39 = vadd.f32 %v3684_v36, %v3323_v63  ;;  %v3003_v36 = vand.u32 2147483647, %v4307_v51  ;;  %v3667_v33 = vadd.f32 %v3666_v40, %v3665_v48  ;;  %v2151_v63 = vmax.f32 %v6267_v49, %v6292_v54  ;;  %v6633_v48 = vld [vmem:[#allocation38_spill] sm:$0xff] }
 0x37a   : > { %v2793_v14 = vsel %vm2792_vm8, %v2791_v47, %v2490_v56 }
 0x37b   : > { %3472 = vxpose.xlu2.b32.cont [8/16] %v3031_v55, 128  ;;  %3440 = vxpose.xlu1.b32.cont [8/16] (narrow) %v3000_v18, 32  ;;  %v3795_v26 = vmul.f32 0.00625, %v3667_v33  ;;  %v4309_v55 = vld [vmem:[%s4578_s26 + $0x6a0] sm:$0xff]  ;;  %v2794_v9 = vrot.slane %v2793_v14, 4  ;;  %v4314_v33 = vld [vmem:[%s4578_s26 + $0x5b8] sm:$0xff] }
 0x37c   : > { %3408 = vxpose.xlu0.b32.cont [8/16] %v2999_v35, 128  ;;  %v3037_v17 = vand.u32 2147483647, %v4309_v55  ;;  %v3005_v35 = vand.u32 2147483647, %v4310_v25  ;;  %v4315_v55 = vld [vmem:[%s4578_s26 + $0x6c0] sm:$0xff] }
 0x37d   : > { %v3810_v46 = vrot.slane %v3795_v26, 6  ;;  %vm2795_vm12 = vcmp.lt.s32.totalorder %v2793_v14, %v2794_v9 }
 0x37e   : > { %v2796_v56 = vsel %vm2795_vm12, %v2793_v14, %v2794_v9 }
 0x37f   : > { %v6311_v28 = vpop.trf.xlu1 }
 0x380   : > { %v3324_v23 = vpop.trf.xlu0 }
 0x381   : > { %v3686_v3 = vadd.f32 %v3685_v39, %v3324_v23  ;;  %v2754_v39 = vsel %vm2753_vm2, %v6006_v11, %v6000_v8  ;;  %v2152_v8 = vmax.f32 %v2151_v63, %v6306_v37 }
 0x382   : > { %v2755_v18 = vrot.slane %v2754_v39, 4 }
 0x383   : > { %v3687_v24 = vrot.slane %v3686_v3, 4  ;;  %3473 = vxpose.xlu2.b32.cont [9/16] %v3033_v38, 128  ;;  %3441 = vxpose.xlu1.b32.cont [9/16] (narrow) %v3002_v31, 32  ;;  %v4311_v38 = vld [vmem:[%s4578_s26 + $0x5a8] sm:$0xff]  ;;  %v3039_v31 = vand.u32 2147483647, %v4312_v42 }
 0x384   : > { %3409 = vxpose.xlu0.b32.cont [9/16] %v3001_v61, 128  ;;  %v3006_v52 = vand.u32 2147483647, %v4311_v38  ;;  %vm2756_vm11 = vcmp.lt.s32.totalorder %v2754_v39, %v2755_v18  ;;  %v4319_v38 = vld [vmem:[%s4578_s26 + $0x5d0] sm:$0xff] }
 0x385   : > { %v3688_v60 = vadd.f32 %v3687_v24, %v3686_v3  ;;  %v2757_v11 = vsel %vm2756_vm11, %v2754_v39, %v2755_v18  ;;  %v2797_v3 = vrot.slane %v2796_v56, 2  ;;  %v4313_v24 = vld [vmem:[%s4578_s26 + $0x5b0] sm:$0xff] }
 0x386   : > { %v2758_v47 = vrot.slane %v2757_v11, 2  ;;  %v3007_v40 = vand.u32 2147483647, %v4313_v24  ;;  %v4318_v18 = vld [vmem:[%s4578_s26 + $0x6d0] sm:$0xff]  ;;  %v4322_v24 = vld [vmem:[%s4578_s26 + $0x5e0] sm:$0xff] }
 0x387   : > { %v3689_v5 = vrot.slane %v3688_v60, 2  ;;  %v6315_v62 = vpop.trf.xlu1  ;;  %vm2798_vm0 = vcmp.lt.s32.totalorder %v2796_v56, %v2797_v3  ;;  %v3043_v9 = vand.u32 2147483647, %v4318_v18 }
 0x388   : > { %vm2759_vm2 = vcmp.lt.s32.totalorder %v2757_v11, %v2758_v47 }
 0x389   : > { %v3690_v45 = vadd.f32 %v3689_v5, %v3688_v60  ;;  %v2153_v60 = vmax.f32 %v2152_v8, %v6311_v28  ;;  %v2760_v15 = vsel %vm2759_vm2, %v2757_v11, %v2758_v47  ;;  %v4320_v8 = vld [vmem:[%s4578_s26 + $0x5d8] sm:$0xff] }
 0x38a   : > { %v2761_v5 = vrot.slane %v2760_v15, 1  ;;  %v3012_v11 = vand.u32 2147483647, %v4320_v8 }
 0x38b   : > { %v3691_v34 = vrot.slane %v3690_v45, 1  ;;  %3474 = vxpose.xlu2.b32.cont [10/16] %v3035_v43, 128  ;;  %3442 = vxpose.xlu1.b32.cont [10/16] (narrow) %v3004_v0, 32  ;;  %v2799_v43 = vsel %vm2798_vm0, %v2796_v56, %v2797_v3  ;;  %v4321_v3 = vld [vmem:[%s4578_s26 + $0x6e0] sm:$0xff] }
 0x38c   : > { %3410 = vxpose.xlu0.b32.cont [10/16] %v3003_v36, 128  ;;  %v2800_v51 = vrot.slane %v2799_v43, 1  ;;  %vm2762_vm4 = vcmp.lt.s32.totalorder %v2760_v15, %v2761_v5  ;;  %v3045_v42 = vand.u32 2147483647, %v4321_v3 }
 0x38d   : > { %v3692_v10 = vadd.f32 %v3691_v34, %v3690_v45  ;;  %v3008_v45 = vand.u32 2147483647, %v4314_v33  ;;  %v2154_v34 = vmax.f32 %v2153_v60, %v6315_v62  ;;  %v2763_v1 = vsel %vm2762_vm4, %v2760_v15, %v2761_v5  ;;  %v4324_v33 = vld [vmem:[%s4578_s26 + $0x6f0] sm:$0xff] }
 0x38e   : > { %v2808_v26 = vrot.slane %v2763_v1, 2  ;;  %v4325_v1 = vld [vmem:[%s4578_s26 + $0x5f0] sm:$0xff] }
 0x38f   : > { %v3796_v4 = vmul.f32 0.00625, %v3692_v10  ;;  %v6328_v44 = vpop.trf.xlu1 }
 0x391   : > { %v3811_v6 = vrot.slane %v3796_v4, 5  ;;  %v4316_v4 = vld [vmem:[%s4578_s26 + $0x5c0] sm:$0xff] }
 0x392   : > { %v3009_v25 = vand.u32 2147483647, %v4316_v4 }
 0x393   : > { %3475 = vxpose.xlu2.b32.cont [11/16] %v3037_v17, 128  ;;  %v3817_v61 = vsel %vm2812_vm5, %v3810_v46, %v3811_v6  ;;  %3443 = vxpose.xlu1.b32.cont [11/16] (narrow) %v3006_v52, 32  ;;  %vm2801_vm5 = vcmp.lt.s32.totalorder %v2799_v43, %v2800_v51  ;;  %v3041_v17 = vand.u32 2147483647, %v4315_v55  ;;  %v2155_v46 = vmax.f32 %v2154_v34, %v6328_v44  ;;  %v4317_v6 = vld [vmem:[%s4578_s26 + $0x5c8] sm:$0xff] }
 0x394   : > { %3411 = vxpose.xlu0.b32.cont [11/16] %v3005_v35, 128  ;;  %v6334_v23 = vsel %vm2814_vm10, %v6633_v48, %v3817_v61  ;;  %v2802_v0 = vsel %vm2801_vm5, %v2799_v43, %v2800_v51  ;;  %vm2818_vm10 = vcmask 1046534   ;;  %v3010_v39 = vand.u32 2147483647, %v4317_v6  ;;  %v4323_v43 = vld [vmem:[%s4578_s26 + $0x5e8] sm:$0xff] }
 0x395   : > { %v2809_v10 = vrot.slane %v2802_v0, 1  ;;  %v3011_v52 = vand.u32 2147483647, %v4319_v38  ;;  %v3014_v5 = vand.u32 2147483647, %v4323_v43 }
 0x396   : > { %v3015_v0 = vand.u32 2147483647, %v4325_v1  ;;  %v4335_v1 = vld [vmem:[%s4578_s26 + $0x648] sm:$0xff] }
 0x397   : > { %v6340_v36 = vpop.trf.xlu1  ;;  %v6347_v35 = vsel %vm2818_vm10, %v2808_v26, %v2809_v10  ;;  %v4326_v10 = vld [vmem:[%s4578_s26 + $0x5f8] sm:$0xff] }
 0x398   : > { %v2156_v14 = vmax.f32 %v2155_v46, %v6340_v36  ;;  %v3016_v55 = vand.u32 2147483647, %v4326_v10  ;;  %v4336_v10 = vld [vmem:[%s4578_s26 + $0x740] sm:$0xff] }
 0x39b   : > { %3476 = vxpose.xlu2.b32.cont [12/16] %v3039_v31, 128  ;;  %3444 = vxpose.xlu1.b32.cont [12/16] (narrow) %v3008_v45, 32  ;;  %v3047_v45 = vand.u32 2147483647, %v4324_v33 }
 0x39c   : > { %3412 = vxpose.xlu0.b32.cont [12/16] %v3007_v40, 128  ;;  %v3013_v40 = vand.u32 2147483647, %v4322_v24 }
 0x39f   : > { %v6350_v63 = vpop.trf.xlu1 }
 0x3a0   : > { %v2157_v61 = vmax.f32 %v2156_v14, %v6350_v63 }
 0x3a3   : > { %3477 = vxpose.xlu2.b32.cont [13/16] %v3041_v17, 128  ;;  %3445 = vxpose.xlu1.b32.cont [13/16] (narrow) %v3010_v39, 32  ;;  %v4329_v39 = vld [vmem:[%s4578_s26 + $0x618] sm:$0xff] }
 0x3a4   : > { %3413 = vxpose.xlu0.b32.cont [13/16] %v3009_v25, 128  ;;  %v4327_v25 = vld [vmem:[%s4578_s26 + $0x608] sm:$0xff] }
 0x3a7   : > { %v1802_v48 = vpop.trf.xlu1 }
 0x3a8   : > { %v6360_v56 = vsel %vm1931_vm1, %v1802_v48, -inf  ;;  %v4331_v48 = vld [vmem:[%s4578_s26 + $0x628] sm:$0xff] }
 0x3a9   : > { %v2158_v47 = vmax.f32 %v2157_v61, %v6360_v56 }
 0x3ab   : > { %3478 = vxpose.xlu2.b32.cont [14/16] %v3043_v9, 128  ;;  %v2166_v31 = vrot.slane %v2158_v47, 4  ;;  %3446 = vxpose.xlu1.b32.cont [14/16] (narrow) %v3012_v11, 32 }
 0x3ac   : > { %3414 = vxpose.xlu0.b32.cont [14/16] %v3011_v52, 128 }
 0x3ad   : > { %v2167_v60 = vmax.f32 %v2158_v47, %v2166_v31  ;;  %v6416_v47 = vpop.trf.xlu2 }
 0x3af   : > { %v2168_v15 = vrot.slane %v2167_v60, 2 }
 0x3b1   : > { %v2169_v51 = vmax.f32 %v2167_v60, %v2168_v15 }
 0x3b3   : > { %3479 = vxpose.xlu2.b32.cont [15/16] %v3045_v42, 128  ;;  %v2170_v34 = vrot.slane %v2169_v51, 1  ;;  %3447 = vxpose.xlu1.b32.cont [15/16] (narrow) %v3014_v5, 32  ;;  %v4334_v5 = vld [vmem:[%s4578_s26 + $0x730] sm:$0xff] }
 0x3b4   : > { %3415 = vxpose.xlu0.b32.cont [15/16] %v3013_v40, 128 }
 0x3b5   : > { %v6368_v26 = vmax.f32 %v2169_v51, %v2170_v34 }
 0x3b7   : > { %vm2239_vm1 = vcmp.eq.f32.partialorder %v6267_v49, %v6368_v26  ;;  %vm2247_vm9 = vcmp.eq.f32.partialorder %v6292_v54, %v6368_v26  ;;  %vm2255_vm14 = vcmp.eq.f32.partialorder %v6306_v37, %v6368_v26  ;;  %vm2263_vm13 = vcmp.eq.f32.partialorder %v6311_v28, %v6368_v26  ;;  %v4328_v37 = vld [vmem:[%s4578_s26 + $0x700] sm:$0xff] }
 0x3b8   : > { %v2367_v17 = vsel %vm2239_vm1, %v5285_v20, 69  ;;  %v2375_v4 = vsel %vm2247_vm9, %v5358_v32, 69  ;;  %v2383_v49 = vsel %vm2255_vm14, %v5374_v16, 69  ;;  %v3018_v54 = vand.u32 2147483647, %v4327_v25 }
 0x3b9   : > { %vm2271_vm15 = vcmp.eq.f32.partialorder %v6315_v62, %v6368_v26  ;;  %vm2647_vm3 = vcmp.lt.s32.totalorder %v2367_v17, %v2375_v4  ;;  %v2391_v46 = vsel %vm2263_vm13, %v5389_v13, 69  ;;  %v3049_v20 = vand.u32 2147483647, %v4328_v37 }
 0x3ba   : > { %v2648_v6 = vsel %vm2647_vm3, %v2367_v17, %v2375_v4  ;;  %vm2279_vm6 = vcmp.eq.f32.partialorder %v6328_v44, %v6368_v26  ;;  %v2399_v32 = vsel %vm2271_vm15, %v5399_v27, 69  ;;  %vm2287_vm8 = vcmp.eq.f32.partialorder %v6340_v36, %v6368_v26 }
 0x3bb   : > { %3480 = vxpose.xlu2.b32.end [16/16] %v3047_v45, 128  ;;  %3448 = vxpose.xlu1.b32.end [16/16] (narrow) %v3016_v55, 32  ;;  %vm2649_vm7 = vcmp.lt.s32.totalorder %v2648_v6, %v2383_v49  ;;  %v2407_v16 = vsel %vm2279_vm6, %v5416_v7, 69  ;;  %vm2295_vm12 = vcmp.eq.f32.partialorder %v6350_v63, %v6368_v26  ;;  %v2415_v62 = vsel %vm2287_vm8, %v5428_v53, 69  ;;  %v4330_v7 = vld [vmem:[%s4578_s26 + $0x710] sm:$0xff] }
 0x3bc   : > { %3416 = vxpose.xlu0.b32.end [16/16] %v3015_v0, 128  ;;  %v2650_v28 = vsel %vm2649_vm7, %v2648_v6, %v2383_v49  ;;  %v3020_v27 = vand.u32 2147483647, %v4329_v39  ;;  %vm2303_vm0 = vcmp.eq.f32.partialorder %v6360_v56, %v6368_v26  ;;  %v2423_v36 = vsel %vm2295_vm12, %v5442_v2, 69  ;;  %v4332_v56 = vld [vmem:[%s4578_s26 + $0x720] sm:$0xff]  ;;  %v4337_v6 = vld [vmem:[%s4578_s26 + $0x658] sm:$0xff] }
 0x3bd   : > { %vm2651_vm11 = vcmp.lt.s32.totalorder %v2650_v28, %v2391_v46  ;;  %v3051_v18 = vand.u32 2147483647, %v4330_v7  ;;  %vm4093_vm5 = vcmp.eq.f32.partialorder %v6368_v26, -inf  ;;  %v2431_v63 = vsel %vm2303_vm0, %v5295_v30, 69 }
 0x3be   : > { %v2652_v13 = vsel %vm2651_vm11, %v2650_v28, %v2391_v46  ;;  %v2716_v53 = vrot.slane %v6040_v58, 4  ;;  %v2439_v38 = vsel %vm4093_vm5, %v5468_v59, 69  ;;  %v2447_v52 = vsel %vm4093_vm5, %v5480_v50, 69  ;;  %v4338_v28 = vld [vmem:[%s4578_s26 + $0x750] sm:$0xff] }
 0x3bf   : > { %vm2653_vm2 = vcmp.lt.s32.totalorder %v2652_v13, %v2399_v32  ;;  %v3022_v30 = vand.u32 2147483647, %v4331_v48  ;;  %v2455_v8 = vsel %vm4093_vm5, %v5492_v22, 69  ;;  %v3053_v59 = vand.u32 2147483647, %v4332_v56 }
 0x3c0   : > { %v2654_v44 = vsel %vm2653_vm2, %v2652_v13, %v2399_v32  ;;  %vm2717_vm15 = vcmp.lt.s32.totalorder %v6040_v58, %v2716_v53  ;;  %v2463_v50 = vsel %vm4093_vm5, %v5504_v41, 69  ;;  %v2471_v22 = vsel %vm4093_vm5, %v5511_v21, 69  ;;  %v4333_v41 = vld [vmem:[%s4578_s26 + $0x638] sm:$0xff] }
 0x3c1   : > { %vm2655_vm4 = vcmp.lt.s32.totalorder %v2654_v44, %v2407_v16  ;;  %v2718_v42 = vsel %vm2717_vm15, %v6040_v58, %v2716_v53  ;;  %v2479_v40 = vsel %vm4093_vm5, %v5526_v19, 69  ;;  %v3024_v15 = vand.u32 2147483647, %v4333_v41  ;;  %v4340_v53 = vld [vmem:[%s4578_s26 + $0x760] sm:$0xff]  ;;  %v4345_v41 = vld [vmem:[%s4578_s26 + $0x698] sm:$0xff] }
 0x3c2   : > { %v2656_v14 = vsel %vm2655_vm4, %v2654_v44, %v2407_v16  ;;  %v2719_v24 = vrot.slane %v2718_v42, 2  ;;  %v2487_v58 = vsel %vm4093_vm5, %v6601_v57, 69  ;;  %v3055_v21 = vand.u32 2147483647, %v4334_v5 }
 0x3c3   : > { %3529 = vxpose.xlu1.b32.start [1/16] %v3049_v20, 128  ;;  %vm2657_vm1 = vcmp.lt.s32.totalorder %v2656_v14, %v2415_v62  ;;  %v3026_v0 = vand.u32 2147483647, %v4335_v1  ;;  %v3057_v55 = vand.u32 2147483647, %v4336_v10  ;;  %v3028_v37 = vand.u32 2147483647, %v4337_v6 }
 0x3c4   : > { %3497 = vxpose.xlu0.b32.start [1/16] (narrow) %v3018_v54, 32  ;;  %v2658_v9 = vsel %vm2657_vm1, %v2656_v14, %v2415_v62  ;;  %vm2720_vm12 = vcmp.lt.s32.totalorder %v2718_v42, %v2719_v24  ;;  %v3059_v16 = vand.u32 2147483647, %v4338_v28  ;;  %v4348_v1 = vld [vmem:[%s4578_s26 + $0x7a0] sm:$0xff]  ;;  %v4349_v10 = vld [vmem:[%s4578_s26 + $0x708] sm:$0xff] }
 0x3c5   : > { %vm2659_vm9 = vcmp.lt.s32.totalorder %v2658_v9, %v2423_v36  ;;  %v2721_v45 = vsel %vm2720_vm12, %v2718_v42, %v2719_v24 }
 0x3c6   : > { %v2660_v2 = vsel %vm2659_vm9, %v2658_v9, %v2423_v36  ;;  %v2722_v57 = vrot.slane %v2721_v45, 1  ;;  %vm2816_vm9 = vcmask 1044484  }
 0x3c7   : > { %vm2661_vm14 = vcmp.lt.s32.totalorder %v2660_v2, %v2431_v63 }
 0x3c8   : > { %v2662_v61 = vsel %vm2661_vm14, %v2660_v2, %v2431_v63  ;;  %vm2723_vm5 = vcmp.lt.s32.totalorder %v2721_v45, %v2722_v57  ;;  %vm2820_vm14 = vcmask 1045508  }
 0x3c9   : > { %vm2663_vm13 = vcmp.lt.s32.totalorder %v2662_v61, %v2439_v38  ;;  %v2724_v20 = vsel %vm2723_vm5, %v2721_v45, %v2722_v57 }
 0x3ca   : > { %v2664_v11 = vsel %vm2663_vm13, %v2662_v61, %v2439_v38  ;;  %v2807_v62 = vrot.slane %v2724_v20, 3  ;;  %vm2822_vm13 = vcmask 1043456   ;;  %v3061_v38 = vand.u32 2147483647, %v4340_v53  ;;  %v4352_v20 = vld [vmem:[%s4578_s26 + $0x718] sm:$0xff] }
 0x3cb   : > { %3530 = vxpose.xlu1.b32.cont [2/16] %v3051_v18, 128  ;;  %vm2665_vm3 = vcmp.lt.s32.totalorder %v2664_v11, %v2447_v52  ;;  %v4339_v18 = vld [vmem:[%s4578_s26 + $0x668] sm:$0xff] }
 0x3cc   : > { %3498 = vxpose.xlu0.b32.cont [2/16] (narrow) %v3020_v27, 32  ;;  %v2666_v3 = vsel %vm2665_vm3, %v2664_v11, %v2447_v52  ;;  %v3030_v63 = vand.u32 2147483647, %v4339_v18 }
 0x3cd   : > { %vm2667_vm6 = vcmp.lt.s32.totalorder %v2666_v3, %v2455_v8 }
 0x3ce   : > { %v2668_v31 = vsel %vm2667_vm6, %v2666_v3, %v2455_v8 }
 0x3cf   : > { %vm2669_vm7 = vcmp.lt.s32.totalorder %v2668_v31, %v2463_v50 }
 0x3d0   : > { %v2670_v60 = vsel %vm2669_vm7, %v2668_v31, %v2463_v50  ;;  %v4343_v50 = vld [vmem:[%s4578_s26 + $0x688] sm:$0xff] }
 0x3d1   : > { %vm2671_vm8 = vcmp.lt.s32.totalorder %v2670_v60, %v2471_v22  ;;  %v3034_v3 = vand.u32 2147483647, %v4343_v50  ;;  %v4363_v50 = vld [vmem:[%s4578_s26 + $0x7f0] sm:$0xff] }
 0x3d2   : > { %v2672_v43 = vsel %vm2671_vm8, %v2670_v60, %v2471_v22  ;;  %v4344_v22 = vld [vmem:[%s4578_s26 + $0x780] sm:$0xff] }
 0x3d3   : > { %3531 = vxpose.xlu1.b32.cont [3/16] %v3053_v59, 128  ;;  %vm2673_vm11 = vcmp.lt.s32.totalorder %v2672_v43, %v2479_v40  ;;  %v3065_v31 = vand.u32 2147483647, %v4344_v22 }
 0x3d4   : > { %3499 = vxpose.xlu0.b32.cont [3/16] (narrow) %v3022_v30, 32  ;;  %v2674_v51 = vsel %vm2673_vm11, %v2672_v43, %v2479_v40  ;;  %v4342_v30 = vld [vmem:[%s4578_s26 + $0x770] sm:$0xff] }
 0x3d5   : > { %vm2675_vm2 = vcmp.lt.s32.totalorder %v2674_v51, %v2487_v58  ;;  %v3063_v8 = vand.u32 2147483647, %v4342_v30  ;;  %v4346_v43 = vld [vmem:[%s4578_s26 + $0x790] sm:$0xff]  ;;  %v4361_v30 = vld [vmem:[%s4578_s26 + $0x748] sm:$0xff] }
 0x3d6   : > { %v2676_v19 = vsel %vm2675_vm2, %v2674_v51, %v2487_v58  ;;  %v3067_v5 = vand.u32 2147483647, %v4346_v43 }
 0x3d7   : > { %v2677_v34 = vrot.slane %v2676_v19, 4 }
 0x3d9   : > { %vm2678_vm0 = vcmp.lt.s32.totalorder %v2676_v19, %v2677_v34 }
 0x3da   : > { %v2679_v26 = vsel %vm2678_vm0, %v2676_v19, %v2677_v34  ;;  %v4347_v19 = vld [vmem:[%s4578_s26 + $0x6a8] sm:$0xff] }
 0x3db   : > { %3532 = vxpose.xlu1.b32.cont [4/16] %v3055_v21, 128  ;;  %v2680_v17 = vrot.slane %v2679_v26, 2  ;;  %v3038_v45 = vand.u32 2147483647, %v4347_v19 }
 0x3dc   : > { %3500 = vxpose.xlu0.b32.cont [4/16] (narrow) %v3024_v15, 32  ;;  %v3481_v33 = vpop.trf.xlu2  ;;  %v3036_v15 = vand.u32 2147483647, %v4345_v41  ;;  %v4365_v41 = vld [vmem:[%s4578_s26 + $0x768] sm:$0xff] }
 0x3dd   : > { %vm2681_vm4 = vcmp.lt.s32.totalorder %v2679_v26, %v2680_v17 }
 0x3de   : > { %v2682_v25 = vsel %vm2681_vm4, %v2679_v26, %v2680_v17 }
 0x3df   : > { %v2683_v54 = vrot.slane %v2682_v25, 1 }
 0x3e1   : > { %vm2684_vm1 = vcmp.lt.s32.totalorder %v2682_v25, %v2683_v54 }
 0x3e2   : > { %v2685_v32 = vsel %vm2684_vm1, %v2682_v25, %v2683_v54  ;;  %v4351_v54 = vld [vmem:[%s4578_s26 + $0x7b0] sm:$0xff] }
 0x3e3   : > { %3533 = vxpose.xlu1.b32.cont [5/16] %v3057_v55, 128  ;;  %v2806_v13 = vrot.slane %v2685_v32, 4  ;;  %v3050_v55 = vand.u32 2147483647, %v4349_v10  ;;  %v3052_v32 = vand.u32 2147483647, %v4352_v20 }
 0x3e4   : > { %3501 = vxpose.xlu0.b32.cont [5/16] (narrow) %v3026_v0, 32  ;;  %v3482_v4 = vpop.trf.xlu2  ;;  %v3069_v0 = vand.u32 2147483647, %v4348_v1  ;;  %v3711_v1 = vadd.f32 %v6272_v29, %v6416_v47 }
 0x3e5   : > { %v3743_v49 = vadd.f32 %v3482_v4, %v3481_v33  ;;  %v2817_v27 = vsel %vm2816_vm9, %v2806_v13, %v2807_v62  ;;  %v4350_v4 = vld [vmem:[%s4578_s26 + $0x6b8] sm:$0xff]  ;;  %3561 = vxpose.xlu2.b32.start [1/16] (narrow) %v3050_v55, 32 }
 0x3e6   : > { %v2821_v36 = vsel %vm2820_vm14, %v2817_v27, %v6347_v35  ;;  %v4355_v27 = vld [vmem:[%s4578_s26 + $0x728] sm:$0xff]  ;;  %v3712_v10 = vrot.slane %v3711_v1, 4 }
 0x3e7   : > { %v2823_v14 = vsel %vm2822_vm13, %v6283_v12, %v2821_v36  ;;  %v4341_v12 = vld [vmem:[%s4578_s26 + $0x678] sm:$0xff]  ;;  %v3054_v36 = vand.u32 2147483647, %v4355_v27 }
 0x3e8   : > { %v3417_v46 = vpop.trf.xlu0  ;;  %2824 = vst [vmem:[%s6449_s9] sm:$0xff] %v2823_v14  ;;  %v3032_v61 = vand.u32 2147483647, %v4341_v12 }
 0x3eb   : > { %3534 = vxpose.xlu1.b32.cont [6/16] %v3059_v16, 128  ;;  %v4353_v16 = vld [vmem:[%s4578_s26 + $0x6c8] sm:$0xff] }
 0x3ec   : > { %3502 = vxpose.xlu0.b32.cont [6/16] (narrow) %v3028_v37, 32  ;;  %v3483_v44 = vpop.trf.xlu2  ;;  %v3042_v13 = vand.u32 2147483647, %v4353_v16 }
 0x3ed   : > { %v3744_v39 = vadd.f32 %v3743_v49, %v3483_v44  ;;  %v3040_v49 = vand.u32 2147483647, %v4350_v4  ;;  %3562 = vxpose.xlu2.b32.cont [2/16] (narrow) %v3052_v32, 32  ;;  %v4354_v44 = vld [vmem:[%s4578_s26 + $0x7c0] sm:$0xff]  ;;  %v3713_v4 = vadd.f32 %v3712_v10, %v3711_v1 }
 0x3ef   : > { %v3714_v20 = vrot.slane %v3713_v4, 2 }
 0x3f0   : > { %v3418_v7 = vpop.trf.xlu0 }
 0x3f1   : > { %v3718_v9 = vadd.f32 %v3418_v7, %v3417_v46  ;;  %v3071_v46 = vand.u32 2147483647, %v4351_v54  ;;  %v4356_v7 = vld [vmem:[%s4578_s26 + $0x6d8] sm:$0xff]  ;;  %v3715_v29 = vadd.f32 %v3714_v20, %v3713_v4 }
 0x3f2   : > { %v3044_v18 = vand.u32 2147483647, %v4356_v7  ;;  %v4368_v54 = vld [vmem:[%s4578_s26 + $0x798] sm:$0xff] }
 0x3f3   : > { %3535 = vxpose.xlu1.b32.cont [7/16] %v3061_v38, 128  ;;  %v4358_v38 = vld [vmem:[%s4578_s26 + $0x738] sm:$0xff] }
 0x3f4   : > { %3503 = vxpose.xlu0.b32.cont [7/16] (narrow) %v3030_v63, 32  ;;  %v3484_v35 = vpop.trf.xlu2 }
 0x3f5   : > { %v3745_v2 = vadd.f32 %v3744_v39, %v3484_v35  ;;  %v3073_v39 = vand.u32 2147483647, %v4354_v44  ;;  %3563 = vxpose.xlu2.b32.cont [3/16] (narrow) %v3054_v36, 32  ;;  %v3056_v35 = vand.u32 2147483647, %v4358_v38 }
 0x3f8   : > { %v3419_v52 = vpop.trf.xlu0 }
 0x3f9   : > { %v3719_v48 = vadd.f32 %v3718_v9, %v3419_v52  ;;  %v4357_v9 = vld [vmem:[%s4578_s26 + $0x7d0] sm:$0xff]  ;;  %v4359_v52 = vld [vmem:[%s4578_s26 + $0x6e8] sm:$0xff] }
 0x3fa   : > { %v3075_v53 = vand.u32 2147483647, %v4357_v9  ;;  %v3046_v12 = vand.u32 2147483647, %v4359_v52 }
 0x3fb   : > { %3536 = vxpose.xlu1.b32.cont [8/16] %v3063_v8, 128  ;;  %v3058_v8 = vand.u32 2147483647, %v4361_v30 }
 0x3fc   : > { %3504 = vxpose.xlu0.b32.cont [8/16] (narrow) %v3032_v61, 32  ;;  %v3485_v11 = vpop.trf.xlu2  ;;  %v4360_v61 = vld [vmem:[%s4578_s26 + $0x7e0] sm:$0xff] }
 0x3fd   : > { %v3746_v56 = vadd.f32 %v3745_v2, %v3485_v11  ;;  %3564 = vxpose.xlu2.b32.cont [4/16] (narrow) %v3056_v35, 32 }
 0x400   : > { %v3420_v59 = vpop.trf.xlu0 }
 0x401   : > { %v3720_v42 = vadd.f32 %v3719_v48, %v3420_v59  ;;  %v3077_v48 = vand.u32 2147483647, %v4360_v61 }
 0x403   : > { %3537 = vxpose.xlu1.b32.cont [9/16] %v3065_v31, 128 }
 0x404   : > { %3505 = vxpose.xlu0.b32.cont [9/16] (narrow) %v3034_v3, 32  ;;  %v3486_v24 = vpop.trf.xlu2  ;;  %v3079_v3 = vand.u32 2147483647, %v4363_v50 }
 0x405   : > { %v3747_v40 = vadd.f32 %v3746_v56, %v3486_v24  ;;  %v4362_v56 = vld [vmem:[%s4578_s26 + $0x6f8] sm:$0xff]  ;;  %3565 = vxpose.xlu2.b32.cont [5/16] (narrow) %v3058_v8, 32  ;;  %v3449_v24 = vpop.trf.xlu1 }
 0x406   : > { %v3048_v59 = vand.u32 2147483647, %v4362_v56 }
 0x408   : > { %v3421_v60 = vpop.trf.xlu0 }
 0x409   : > { %v3721_v58 = vadd.f32 %v3720_v42, %v3421_v60  ;;  %v4364_v42 = vld [vmem:[%s4578_s26 + $0x758] sm:$0xff] }
 0x40a   : > { %v3060_v22 = vand.u32 2147483647, %v4364_v42 }
 0x40b   : > { %3538 = vxpose.xlu1.b32.cont [10/16] %v3067_v5, 128 }
 0x40c   : > { %3506 = vxpose.xlu0.b32.cont [10/16] (narrow) %v3036_v15, 32  ;;  %v3487_v21 = vpop.trf.xlu2  ;;  %v3062_v15 = vand.u32 2147483647, %v4365_v41 }
 0x40d   : > { %v3748_v51 = vadd.f32 %v3747_v40, %v3487_v21  ;;  %3566 = vxpose.xlu2.b32.cont [6/16] (narrow) %v3060_v22, 32  ;;  %v3450_v43 = vpop.trf.xlu1 }
 0x410   : > { %v3422_v33 = vpop.trf.xlu0 }
 0x411   : > { %v3722_v34 = vadd.f32 %v3721_v58, %v3422_v33 }
 0x413   : > { %3539 = vxpose.xlu1.b32.cont [11/16] %v3069_v0, 128 }
 0x414   : > { %3507 = vxpose.xlu0.b32.cont [11/16] (narrow) %v3038_v45, 32  ;;  %v3488_v57 = vpop.trf.xlu2 }
 0x415   : > { %v3749_v26 = vadd.f32 %v3748_v51, %v3488_v57  ;;  %3567 = vxpose.xlu2.b32.cont [7/16] (narrow) %v3062_v15, 32  ;;  %v4366_v51 = vld [vmem:[%s4578_s26 + $0x778] sm:$0xff]  ;;  %v3451_v45 = vpop.trf.xlu1  ;;  %v4367_v57 = vld [vmem:[%s4578_s26 + $0x788] sm:$0xff] }
 0x416   : > { %v3064_v33 = vand.u32 2147483647, %v4366_v51 }
 0x418   : > { %v3423_v17 = vpop.trf.xlu0 }
 0x419   : > { %v3723_v25 = vadd.f32 %v3722_v34, %v3423_v17 }
 0x41b   : > { %3540 = vxpose.xlu1.b32.cont [12/16] %v3071_v46, 128  ;;  %v3068_v46 = vand.u32 2147483647, %v4368_v54 }
 0x41c   : > { %3508 = vxpose.xlu0.b32.cont [12/16] (narrow) %v3040_v49, 32  ;;  %v3489_v6 = vpop.trf.xlu2 }
 0x41d   : > { %v6464_v37 = vadd.f32 %v3749_v26, %v3489_v6  ;;  %3568 = vxpose.xlu2.b32.cont [8/16] (narrow) %v3064_v33, 32  ;;  %v3066_v26 = vand.u32 2147483647, %v4367_v57  ;;  %v3452_v49 = vpop.trf.xlu1 }
 0x420   : > { %v3424_v28 = vpop.trf.xlu0 }
 0x421   : > { %v3724_v62 = vadd.f32 %v3723_v25, %v3424_v28 }
 0x423   : > { %3541 = vxpose.xlu1.b32.cont [13/16] %v3073_v39, 128  ;;  %v3716_v39 = vrot.slane %v3715_v29, 1 }
 0x424   : > { %3509 = vxpose.xlu0.b32.cont [13/16] (narrow) %v3042_v13, 32 }
 0x425   : > { %3569 = vxpose.xlu2.b32.cont [9/16] (narrow) %v3066_v26, 32 }
 0x428   : > { %v3425_v14 = vpop.trf.xlu0 }
 0x429   : > { %v3725_v63 = vadd.f32 %v3724_v62, %v3425_v14  ;;  %v4369_v62 = vld [vmem:[%s4578_s26 + $0x7a8] sm:$0xff]  ;;  %v3717_v14 = vadd.f32 %v3716_v39, %v3715_v29 }
 0x42a   : > { %v3070_v44 = vand.u32 2147483647, %v4369_v62 }
 0x42b   : > { %3542 = vxpose.xlu1.b32.cont [14/16] %v3075_v53, 128  ;;  %v3797_v35 = vmul.f32 0.00625, %v3717_v14 }
 0x42c   : > { %3510 = vxpose.xlu0.b32.cont [14/16] (narrow) %v3044_v18, 32  ;;  %v4370_v18 = vld [vmem:[%s4578_s26 + $0x7b8] sm:$0xff] }
 0x42d   : > { %3570 = vxpose.xlu2.b32.cont [10/16] (narrow) %v3068_v46, 32 }
 0x430   : > { %v3426_v2 = vpop.trf.xlu0 }
 0x431   : > { %v3726_v60 = vadd.f32 %v3725_v63, %v3426_v2  ;;  %v3072_v63 = vand.u32 2147483647, %v4370_v18 }
 0x433   : > { %3543 = vxpose.xlu1.b32.cont [15/16] %v3077_v48, 128  ;;  %v4371_v48 = vld [vmem:[%s4578_s26 + $0x7c8] sm:$0xff] }
 0x434   : > { %3511 = vxpose.xlu0.b32.cont [15/16] (narrow) %v3046_v12, 32  ;;  %v3812_v12 = vrot.slane %v3797_v35, 4  ;;  %v3074_v30 = vand.u32 2147483647, %v4371_v48 }
 0x435   : > { %3571 = vxpose.xlu2.b32.cont [11/16] (narrow) %v3070_v44, 32 }
 0x438   : > { %v3427_v11 = vpop.trf.xlu0 }
 0x439   : > { %v3727_v58 = vadd.f32 %v3726_v60, %v3427_v11 }
 0x43b   : > { %3544 = vxpose.xlu1.b32.end [16/16] %v3079_v3, 128 }
 0x43c   : > { %3512 = vxpose.xlu0.b32.end [16/16] (narrow) %v3048_v59, 32 }
 0x43d   : > { %3572 = vxpose.xlu2.b32.cont [12/16] (narrow) %v3072_v63, 32 }
 0x440   : > { %v3428_v31 = vpop.trf.xlu0 }
 0x441   : > { %v3728_v21 = vadd.f32 %v3727_v58, %v3428_v31 }
 0x445   : > { %3573 = vxpose.xlu2.b32.cont [13/16] (narrow) %v3074_v30, 32 }
 0x448   : > { %v3429_v40 = vpop.trf.xlu0 }
 0x449   : > { %v3729_v19 = vadd.f32 %v3728_v21, %v3429_v40 }
 0x450   : > { %v3430_v5 = vpop.trf.xlu0 }
 0x451   : > { %v3730_v0 = vadd.f32 %v3729_v19, %v3430_v5 }
 0x458   : > { %v3431_v34 = vpop.trf.xlu0 }
 0x459   : > { %v3731_v55 = vadd.f32 %v3730_v0, %v3431_v34 }
 0x460   : > { %v3432_v17 = vpop.trf.xlu0 }
 0x461   : > { %v3732_v25 = vadd.f32 %v3731_v55, %v3432_v17 }
 0x463   : > { %v3733_v6 = vadd.f32 %v3732_v25, %v3449_v24 }
 0x465   : > { %v3734_v32 = vadd.f32 %v3733_v6, %v3450_v43 }
 0x467   : > { %v3735_v28 = vadd.f32 %v3734_v32, %v3451_v45  ;;  %v3545_v13 = vpop.trf.xlu1 }
 0x469   : > { %v3736_v47 = vadd.f32 %v3735_v28, %v3452_v49 }
 0x46b   : > { %v3737_v16 = vrot.slane %v3736_v47, 4 }
 0x46d   : > { %v3738_v27 = vadd.f32 %v3737_v16, %v3736_v47 }
 0x46f   : > { %v3739_v36 = vrot.slane %v3738_v27, 2  ;;  %v3546_v53 = vpop.trf.xlu1 }
 0x470   : > { %v3768_v38 = vadd.f32 %v3546_v53, %v3545_v13 }
 0x471   : > { %v3740_v7 = vadd.f32 %v3739_v36, %v3738_v27 }
 0x473   : > { %v3741_v9 = vrot.slane %v3740_v7, 1 }
 0x475   : > { %v3742_v2 = vadd.f32 %v3741_v9, %v3740_v7 }
 0x477   : > { %v3798_v52 = vmul.f32 0.00625, %v3742_v2  ;;  %v3547_v8 = vpop.trf.xlu1 }
 0x478   : > { %v3769_v56 = vadd.f32 %v3768_v38, %v3547_v8 }
 0x479   : > { %v3813_v61 = vrot.slane %v3798_v52, 3 }
 0x47b   : > { %v6489_v11 = vsel %vm2816_vm9, %v3812_v12, %v3813_v61 }
 0x47c   : > { %4402 = shalt.err (!%p4399_p3)
}
 0x47d   : > { %4188 = dma.vmem_to_hbm [thread:$0]  (%p4529_p5), %s3844_s20, 128, %s3846_s24, %s3826_s25   ;;  %v4372_v59 = vld [vmem:[%s4578_s26 + $0x7d8] sm:$0xff]  ;;  %v3490_v22 = vpop.trf.xlu2  ;;  %v4373_v31 = vld [vmem:[%s4578_s26 + $0x7e8] sm:$0xff]  ;;  %v3513_v57 = vpop.trf.xlu0 }
 0x47e   : > { %v3076_v50 = vand.u32 2147483647, %v4372_v59  ;;  %v3078_v24 = vand.u32 2147483647, %v4373_v31  ;;  %v4374_v15 = vld [vmem:[%s4578_s26 + $0x7f8] sm:$0xff]  ;;  %v3751_v1 = vadd.f32 %v6464_v37, %v3490_v22  ;;  %s3855_s11 = scalar_lea.hbm %s6556_s3, %s4147_s10  ;;  %s177_s17 = scalar_lea.vmem [#allocation4], %s3956_s8 }
 0x47f   : > { %v3548_v3 = vpop.trf.xlu1  ;;  %v3080_v58 = vand.u32 2147483647, %v4374_v15  ;;  %s3857_s19 = sshll.u32 %s177_s17, 4  ;;  %s3859_s20 = sshll.u32 %s3855_s11, 4  ;;  %s3858_s19 = int_to_ptr.vmem [resolvable:$true] %s3857_s19  ;;  %s3860_s20 = int_to_ptr.hbm [resolvable:$true] %s3859_s20 }
 0x480   : > { %v3770_v42 = vadd.f32 %v3769_v56, %v3548_v3  ;;  %3574 = vxpose.xlu2.b32.cont [14/16] (narrow) %v3076_v50, 32  ;;  %s3831_s16 = scalar_lea.sflag [#allocation5], %s6436_s7  ;;  %s4417_s10 = sshra.s32 %s3860_s20, 4  ;;  %s4418_s10 = int_to_ptr.hbm [resolvable:$true] %s4417_s10 }
 0x481   : > { %s4419_s24 = scalar_lea.hbm %s4418_s10, 8  ;;  %s4423_s27 = scalar_lea.hbm %s6556_s3, 16 }
 0x482   : > { %p4420_p4 = scmp.ne.s32.totalorder %s4418_s10, %s4419_s24  ;;  %p4424_p9 = scmp.lt.s32.totalorder %s4418_s10, %s6556_s3 }
 0x483   : > { %p4425_p10 = scmp.lt.s32.totalorder %s4423_s27, %s4419_s24 }
 0x484   : > { %p4421_p7 = pnand %p4420_p4, %p4529_p5 }
 0x485   : > { %v3491_v41 = vpop.trf.xlu2  ;;  %v3514_v25 = vpop.trf.xlu0  ;;  %p4426_p11 = por %p4425_p10, %p4424_p9 }
 0x486   : > { %v3752_v10 = vadd.f32 %v3751_v1, %v3491_v41  ;;  %p4422_p8 = pneg %p4421_p7 }
 0x487   : > { %v3549_v40 = vpop.trf.xlu1 }
 0x488   : > { %v3771_v60 = vadd.f32 %v3770_v42, %v3549_v40  ;;  %3575 = vxpose.xlu2.b32.cont [15/16] (narrow) %v3078_v24, 32  ;;  %p4427_p12 = pnand %p4426_p11, %p4422_p8 }
 0x48d   : > { %v3492_v5 = vpop.trf.xlu2  ;;  %v3515_v32 = vpop.trf.xlu0 }
 0x48e   : > { %v3753_v55 = vadd.f32 %v3752_v10, %v3492_v5 }
 0x48f   : > { %v3550_v43 = vpop.trf.xlu1 }
 0x490   : > { %3576 = vxpose.xlu2.b32.end [16/16] (narrow) %v3080_v58, 32  ;;  %v3772_v29 = vadd.f32 %v3771_v60, %v3550_v43 }
 0x495   : > { %v3493_v33 = vpop.trf.xlu2  ;;  %v3516_v36 = vpop.trf.xlu0 }
 0x496   : > { %v3754_v49 = vadd.f32 %v3753_v55, %v3493_v33 }
 0x497   : > { %v3551_v21 = vpop.trf.xlu1 }
 0x498   : > { %v3773_v47 = vadd.f32 %v3772_v29, %v3551_v21 }
 0x49d   : > { %v3494_v45 = vpop.trf.xlu2 }
 0x49e   : > { %v3755_v54 = vadd.f32 %v3754_v49, %v3494_v45 }
 0x49f   : > { %v3552_v51 = vpop.trf.xlu1 }
 0x4a0   : > { %v3774_v37 = vadd.f32 %v3773_v47, %v3552_v51 }
 0x4a5   : > { %v3495_v0 = vpop.trf.xlu2 }
 0x4a6   : > { %v3756_v20 = vadd.f32 %v3755_v54, %v3495_v0 }
 0x4a7   : > { %v3553_v19 = vpop.trf.xlu1 }
 0x4a8   : > { %v3775_v44 = vadd.f32 %v3774_v37, %v3553_v19 }
 0x4ad   : > { %v3496_v17 = vpop.trf.xlu2 }
 0x4ae   : > { %v3757_v28 = vadd.f32 %v3756_v20, %v3496_v17 }
 0x4af   : > { %v3554_v34 = vpop.trf.xlu1 }
 0x4b0   : > { %v3758_v13 = vadd.f32 %v3757_v28, %v3513_v57  ;;  %v3776_v27 = vadd.f32 %v3775_v44, %v3554_v34 }
 0x4b2   : > { %v3759_v39 = vadd.f32 %v3758_v13, %v3514_v25 }
 0x4b4   : > { %v3760_v14 = vadd.f32 %v3759_v39, %v3515_v32 }
 0x4b5   : > { %v3577_v6 = vpop.trf.xlu2 }
 0x4b6   : > { %v3761_v63 = vadd.f32 %v3760_v14, %v3516_v36 }
 0x4b7   : > { %v3555_v26 = vpop.trf.xlu1 }
 0x4b8   : > { %v3777_v7 = vadd.f32 %v3776_v27, %v3555_v26  ;;  %v3762_v35 = vrot.slane %v3761_v63, 4 }
 0x4ba   : > { %v3763_v61 = vadd.f32 %v3762_v35, %v3761_v63 }
 0x4bc   : > { %v3764_v8 = vrot.slane %v3763_v61, 2 }
 0x4bd   : > { %v3578_v62 = vpop.trf.xlu2 }
 0x4be   : > { %v3765_v3 = vadd.f32 %v3764_v8, %v3763_v61 }
 0x4bf   : > { %v3556_v4 = vpop.trf.xlu1 }
 0x4c0   : > { %v3778_v9 = vadd.f32 %v3777_v7, %v3556_v4  ;;  %v3766_v31 = vrot.slane %v3765_v3, 1 }
 0x4c2   : > { %v3767_v60 = vadd.f32 %v3766_v31, %v3765_v3 }
 0x4c4   : > { %v3799_v58 = vmul.f32 0.00625, %v3767_v60 }
 0x4c5   : > { %v3579_v38 = vpop.trf.xlu2 }
 0x4c6   : > { %v3814_v21 = vrot.slane %v3799_v58, 2 }
 0x4c7   : > { %v3557_v46 = vpop.trf.xlu1 }
 0x4c8   : > { %v3779_v53 = vadd.f32 %v3778_v9, %v3557_v46 }
 0x4cd   : > { %v3580_v59 = vpop.trf.xlu2 }
 0x4cf   : > { %v3558_v16 = vpop.trf.xlu1 }
 0x4d0   : > { %v3780_v2 = vadd.f32 %v3779_v53, %v3558_v16 }
 0x4d7   : > { %v3559_v18 = vpop.trf.xlu1 }
 0x4d8   : > { %v3781_v52 = vadd.f32 %v3780_v2, %v3559_v18 }
 0x4df   : > { %v3560_v12 = vpop.trf.xlu1 }
 0x4e0   : > { %v3782_v48 = vadd.f32 %v3781_v52, %v3560_v12 }
 0x4e2   : > { %v3783_v30 = vadd.f32 %v3782_v48, %v3577_v6 }
 0x4e4   : > { %v3784_v56 = vadd.f32 %v3783_v30, %v3578_v62 }
 0x4e6   : > { %v3785_v50 = vadd.f32 %v3784_v56, %v3579_v38 }
 0x4e8   : > { %v3786_v42 = vadd.f32 %v3785_v50, %v3580_v59 }
 0x4ea   : > { %v3787_v22 = vrot.slane %v3786_v42, 4 }
 0x4ec   : > { %v3788_v24 = vadd.f32 %v3787_v22, %v3786_v42 }
 0x4ee   : > { %v3789_v40 = vrot.slane %v3788_v24, 2 }
 0x4f0   : > { %v3790_v41 = vadd.f32 %v3789_v40, %v3788_v24 }
 0x4f2   : > { %v3791_v15 = vrot.slane %v3790_v41, 1 }
 0x4f4   : > { %v3792_v43 = vadd.f32 %v3791_v15, %v3790_v41 }
 0x4f6   : > { %v3800_v5 = vmul.f32 0.00625, %v3792_v43 }
 0x4f8   : > { %v3815_v51 = vrot.slane %v3800_v5, 1 }
 0x4fa   : > { %v3820_v33 = vsel %vm2818_vm10, %v3814_v21, %v3815_v51 }
 0x4fb   : > { %v3821_v19 = vsel %vm2820_vm14, %v6489_v11, %v3820_v33 }
 0x4fc   : > { %v3822_v45 = vsel %vm2822_vm13, %v6334_v23, %v3821_v19 }
 0x4fd   : > { %3824 = vst [vmem:[%s177_s17] sm:$0xff] %v3822_v45 }
 0x4fe   : > { %4430 = shalt.err (!%p4427_p12)
}
 0x4ff   : > { %4189 = dma.vmem_to_hbm [thread:$0]  (%p4529_p5), %s3858_s19, 128, %s3860_s20, %s3831_s16  }
 0x500 PF: > { %p4199_p13 = scmp.ge.s32.totalorder %s4469_s15, 2  ;;  %s3871_s7 = sand.u32 1, %s4457_s12  }
 0x501   : > { %s3872_s30 = scalar_lea.sflag [#allocation3], %s3871_s7 }
 0x502   : > { %p4193_p0 = pnand %p4199_p13, %p4533_p6 }
 0x504   : > { %p4194_p1 = pneg %p4193_p0 }
 0x506   : > { %4448 = dma.done.wait (%p4194_p1), %s3872_s30, 128  }
 0x507   : > { %4450 = vsyncadd (%p4194_p1), %s3872_s30, 4294967168  ;;  %s3882_s4 = scalar_lea.sflag [#allocation5], %s3871_s7 }
 0x508   : > { %4452 = dma.done.wait (%p4194_p1), %s3882_s4, 128  }
 0x509   : > { %4454 = vsyncadd (%p4194_p1), %s3882_s4, 4294967168  ;;  %p17_p5 = scmp.ge.s32.totalorder %s4516_s18, 4   ;;  %s6634_s12 = smov %s4461_s13 }
 0x50a   : > { %s6635_s13 = smov %s4465_s14  ;;  %s6636_s14 = smov %s4527_s21 }
 0x50b   : > { %s6637_s15 = smov %s4516_s18  ;;  %19 = sbr.rel (!%p17_p5) target bundleno = 5 (0x5), region = 80 }
 0x510   :  { %3888 = vsyncpa [#allocation3], 1 }
 0x511   :  { %3890 = vsyncpa [#allocation3 + $0x1], 1 }
 0x512   :  { %3891 = vsyncpa [#allocation5], 1 }
 0x513   :  { %3893 = vsyncpa [#allocation5 + $0x1], 1 }

</bundles_post_ra>
